<compile_context>
chip_gen: v5e
topology: v5e:2x2
jax: 0.10.0
libtpu: 0.0.40
codegen_flags: <defaults>
</compile_context>

<pallas_src>
import functools
import math

import numpy as np

import jax
import jax.numpy as jnp
from jax.experimental import pallas as pl
from jax.experimental.pallas import tpu as pltpu

_CONV_BLOCK_M = 1024   # conv matmuls: big tiles, tiny per-block VMEM (K<=1152, N<=128)
_HEAD_BLOCK_M = 256    # fused FC head: weights dominate VMEM, keep M tile modest
_NORM_BLOCK_M = 512
_VMEM_LIMIT = 64 * 1024 * 1024


def _m_tiles(m, block_m):
    """M-tile choice: full array if tiny; otherwise >=2 grid steps (both v7x TCs
    get work) capped at block_m.  Tiles are multiples of 32 so u8/bf16/f32
    sublane tilings all stay legal; the last block may be ragged (no jnp.pad —
    Pallas masks the writeback, garbage rows never reach HBM)."""
    if m < 128:
        return m, 1
    half = (m + 1) // 2
    bm = min(block_m, ((half + 31) // 32) * 32)
    return bm, pl.cdiv(m, bm)


# ----------------------------------------------------------------------------
# Observation normalization: ((obs - mean) * rsqrt(var)).clip(-5, 5)
# ----------------------------------------------------------------------------
def _obs_norm_kernel(obs_ref, mean_ref, var_ref, o_ref):
    # uint8 -> i32 -> f32 in-kernel (obs travels HBM->VMEM as 1 byte/elem)
    x = obs_ref[...].astype(jnp.int32).astype(jnp.float32)
    inv = jax.lax.rsqrt(var_ref[...] + 1e-8)            # EUP slot; eps guards var≈0
    x = (x - mean_ref[...]) * inv
    o_ref[...] = jnp.clip(x, -5.0, 5.0).astype(o_ref.dtype)


def obs_norm(obs2d_u8, mean2d, var2d, block_m=_NORM_BLOCK_M):
    m, n = obs2d_u8.shape
    bm, steps = _m_tiles(m, block_m)
    return pl.pallas_call(
        _obs_norm_kernel,
        grid=(steps,),
        in_specs=[
            pl.BlockSpec((bm, n), lambda i: (i, 0)),
            pl.BlockSpec((1, n), lambda i: (0, 0)),
            pl.BlockSpec((1, n), lambda i: (0, 0)),
        ],
        out_specs=pl.BlockSpec((bm, n), lambda i: (i, 0)),
        out_shape=jax.ShapeDtypeStruct((m, n), jnp.bfloat16),
        compiler_params=pltpu.CompilerParams(
            dimension_semantics=("parallel",), vmem_limit_bytes=_VMEM_LIMIT),
        cost_estimate=pl.CostEstimate(
            flops=4 * m * n, transcendentals=n,
            bytes_accessed=m * n + 8 * n + 2 * m * n),
    )(obs2d_u8, mean2d, var2d)


# ----------------------------------------------------------------------------
# Single matmul (conv1) and dual K-half matmul (conv2/conv3)
# ----------------------------------------------------------------------------
def _matmul_bias_act_kernel(x_ref, w_ref, b_ref, o_ref, *, act):
    x = x_ref[...].astype(jnp.bfloat16)                  # no-op: inputs already bf16
    acc = jnp.dot(x, w_ref[...], preferred_element_type=jnp.float32)
    acc = acc + b_ref[...]
    if act == "relu":
        acc = jnp.maximum(acc, 0.0)
    elif act == "leaky_relu":
        acc = jnp.maximum(acc, 0.01 * acc)               # single vmul + vmax
    o_ref[...] = acc.astype(o_ref.dtype)


def matmul_bias_act(x, w_bf16, b, act="none", out_dtype=jnp.bfloat16,
                    block_m=_CONV_BLOCK_M):
    m, k = x.shape
    k2, n = w_bf16.shape
    assert k == k2
    b2 = b.reshape(1, n).astype(jnp.float32)
    bm, steps = _m_tiles(m, block_m)
    kern = functools.partial(_matmul_bias_act_kernel, act=act)
    return pl.pallas_call(
        kern,
        grid=(steps,),
        in_specs=[
            pl.BlockSpec((bm, k), lambda i: (i, 0)),
            pl.BlockSpec((k, n), lambda i: (0, 0)),
            pl.BlockSpec((1, n), lambda i: (0, 0)),
        ],
        out_specs=pl.BlockSpec((bm, n), lambda i: (i, 0)),
        out_shape=jax.ShapeDtypeStruct((m, n), out_dtype),
        compiler_params=pltpu.CompilerParams(
            dimension_semantics=("parallel",), vmem_limit_bytes=_VMEM_LIMIT),
        cost_estimate=pl.CostEstimate(
            flops=2 * m * n * k, transcendentals=0,
            bytes_accessed=(x.dtype.itemsize * m * k + 2 * k * n + 4 * n
                            + np.dtype(out_dtype).itemsize * m * n)),
    )(x, w_bf16, b2)


def _dual_matmul_bias_act_kernel(xt_ref, xp_ref, wt_ref, wp_ref, b_ref, o_ref, *, act):
    xt = xt_ref[...].astype(jnp.bfloat16)
    xp = xp_ref[...].astype(jnp.bfloat16)
    at = jnp.dot(xt, wt_ref[...], preferred_element_type=jnp.float32)
    ap = jnp.dot(xp, wp_ref[...], preferred_element_type=jnp.float32)
    acc = jnp.concatenate([at, ap], axis=1) + b_ref[...]  # lane-concat -> 128 wide
    if act == "relu":
        acc = jnp.maximum(acc, 0.0)
    elif act == "leaky_relu":
        acc = jnp.maximum(acc, 0.01 * acc)
    o_ref[...] = acc.astype(o_ref.dtype)                   # single unmasked store


def dual_matmul_bias_act(xt, xp, wt_bf16, wp_bf16, b, act="none",
                         out_dtype=jnp.bfloat16, block_m=_CONV_BLOCK_M):
    m, kt = xt.shape
    _, kp = xp.shape
    nt = wt_bf16.shape[1]
    npd = wp_bf16.shape[1]
    n = nt + npd
    b2 = b.reshape(1, n).astype(jnp.float32)
    bm, steps = _m_tiles(m, block_m)
    kern = functools.partial(_dual_matmul_bias_act_kernel, act=act)
    return pl.pallas_call(
        kern,
        grid=(steps,),
        in_specs=[
            pl.BlockSpec((bm, kt), lambda i: (i, 0)),
            pl.BlockSpec((bm, kp), lambda i: (i, 0)),
            pl.BlockSpec((kt, nt), lambda i: (0, 0)),
            pl.BlockSpec((kp, npd), lambda i: (0, 0)),
            pl.BlockSpec((1, n), lambda i: (0, 0)),
        ],
        out_specs=pl.BlockSpec((bm, n), lambda i: (i, 0)),
        out_shape=jax.ShapeDtypeStruct((m, n), out_dtype),
        compiler_params=pltpu.CompilerParams(
            dimension_semantics=("parallel",), vmem_limit_bytes=_VMEM_LIMIT),
        cost_estimate=pl.CostEstimate(
            flops=2 * m * (kt * nt + kp * npd), transcendentals=0,
            bytes_accessed=(xt.dtype.itemsize * m * (kt + kp)
                            + 2 * (kt * nt + kp * npd) + 4 * n
                            + np.dtype(out_dtype).itemsize * m * n)),
    )(xt, xp, wt_bf16, wp_bf16, b2)


# ----------------------------------------------------------------------------
# Fused FC head: target l1, predictor l1->relu->l2->relu->l3, novelty, critic
# ----------------------------------------------------------------------------
def _fused_head_kernel(ft_ref, fp_ref, wt1_ref, bt1_ref, wp1_ref, bp1_ref,
                       p2w_ref, p2b_ref, p3w_ref, p3b_ref,
                       core_ref, cw_ref, cb_ref,
                       tfeat_ref, pfeat_ref, scal_ref):
    ft = ft_ref[...].astype(jnp.bfloat16)
    fp = fp_ref[...].astype(jnp.bfloat16)

    # target linear (no activation); predictor l1 -> relu -> l2 -> relu -> l3
    t = jnp.dot(ft, wt1_ref[...], preferred_element_type=jnp.float32) + bt1_ref[...]
    h = jnp.dot(fp, wp1_ref[...], preferred_element_type=jnp.float32) + bp1_ref[...]
    h = jnp.maximum(h, 0.0)
    h = jnp.dot(h.astype(jnp.bfloat16), p2w_ref[...],
                preferred_element_type=jnp.float32) + p2b_ref[...]
    h = jnp.maximum(h, 0.0)
    p = jnp.dot(h.astype(jnp.bfloat16), p3w_ref[...],
                preferred_element_type=jnp.float32) + p3b_ref[...]
    tfeat_ref[...] = t
    pfeat_ref[...] = p

    # novelty = 0.5 * ||t - p||^2 per row (VPU + XLU reduce: free filler)
    d = t - p
    nov = 0.5 * jnp.sum(d * d, axis=1, keepdims=True)
    # int critic: elementwise mul + row-reduce (avoids a width-1 MXU matmul)
    v = jnp.sum(core_ref[...] * cw_ref[...], axis=1, keepdims=True) + cb_ref[0, 0]

    # lane-dense scalar slab: lane 0 = novelty, lane 1 = int_value
    lane = jax.lax.broadcasted_iota(jnp.int32, scal_ref.shape, 1)
    scal_ref[...] = jnp.where(lane == 0, nov, jnp.where(lane == 1, v, 0.0))


def fused_rnd_head(feat_t, feat_p, wt1, bt1, wp1, bp1, p2w, p2b, p3w, p3b,
                   core, cw_row, cb, block_m=_HEAD_BLOCK_M):
    m, per = feat_t.shape
    rnd_dim = wt1.shape[1]
    cc = core.shape[1]
    bm, steps = _m_tiles(m, block_m)

    flops = 2 * m * (2 * per * rnd_dim + 2 * rnd_dim * rnd_dim + cc)
    bytes_accessed = (2 * m * 2 * per + 4 * m * cc
                      + 2 * (2 * per * rnd_dim + 2 * rnd_dim * rnd_dim)
                      + 4 * 4 * rnd_dim + 4 * cc + 4
                      + 4 * m * (2 * rnd_dim + 128))

    # TODO(synk): if `per` grows past the VMEM budget (e.g. 84x84 obs), add a K
    # grid axis marked 'arbitrary' with an f32 accumulator scratch (P3 pattern).
    tfeat, pfeat, scal = pl.pallas_call(
        _fused_head_kernel,
        grid=(steps,),
        in_specs=[
            pl.BlockSpec((bm, per), lambda i: (i, 0)),
            pl.BlockSpec((bm, per), lambda i: (i, 0)),
            pl.BlockSpec((per, rnd_dim), lambda i: (0, 0)),
            pl.BlockSpec((1, rnd_dim), lambda i: (0, 0)),
            pl.BlockSpec((per, rnd_dim), lambda i: (0, 0)),
            pl.BlockSpec((1, rnd_dim), lambda i: (0, 0)),
            pl.BlockSpec((rnd_dim, rnd_dim), lambda i: (0, 0)),
            pl.BlockSpec((1, rnd_dim), lambda i: (0, 0)),
            pl.BlockSpec((rnd_dim, rnd_dim), lambda i: (0, 0)),
            pl.BlockSpec((1, rnd_dim), lambda i: (0, 0)),
            pl.BlockSpec((bm, cc), lambda i: (i, 0)),
            pl.BlockSpec((1, cc), lambda i: (0, 0)),
            pl.BlockSpec(memory_space=pltpu.MemorySpace.SMEM),   # (1,1) critic bias
        ],
        out_specs=[
            pl.BlockSpec((bm, rnd_dim), lambda i: (i, 0)),
            pl.BlockSpec((bm, rnd_dim), lambda i: (i, 0)),
            pl.BlockSpec((bm, 128), lambda i: (i, 0)),
        ],
        out_shape=[
            jax.ShapeDtypeStruct((m, rnd_dim), jnp.float32),
            jax.ShapeDtypeStruct((m, rnd_dim), jnp.float32),
            jax.ShapeDtypeStruct((m, 128), jnp.float32),
        ],
        compiler_params=pltpu.CompilerParams(
            dimension_semantics=("parallel",), vmem_limit_bytes=_VMEM_LIMIT),
        cost_estimate=pl.CostEstimate(flops=flops, transcendentals=0,
                                      bytes_accessed=bytes_accessed),
    )(feat_t, feat_p, wt1, bt1, wp1, bp1, p2w, p2b, p3w, p3b, core, cw_row, cb)
    return tfeat, pfeat, scal[:, 0], scal[:, 1:2]


# ----------------------------------------------------------------------------
# Conv via im2col (glue) + Pallas matmul (hot path)
# ----------------------------------------------------------------------------
def _im2col(x_nhwc, kh, kw, stride):
    n, h, w, c = x_nhwc.shape
    oh = (h - kh) // stride + 1
    ow = (w - kw) // stride + 1
    cols = []
    for i in range(kh):
        for j in range(kw):
            cols.append(x_nhwc[:, i: i + stride * oh: stride, j: j + stride * ow: stride, :])
    p = jnp.stack(cols, axis=3)  # (N, OH, OW, KH*KW, C)
    return p.reshape(n * oh * ow, kh * kw * c), oh, ow


def _wcol_bf16(w_oihw):
    cout, cin, kh, kw = w_oihw.shape
    # (Cout, Cin, KH, KW) -> (KH, KW, Cin, Cout) -> (K, Cout) matches patch order
    return jnp.transpose(w_oihw, (2, 3, 1, 0)).reshape(kh * kw * cin, cout).astype(jnp.bfloat16)


def conv2d_shared(x_nhwc, tw, pw, tb, pb, stride, act, block_m=_CONV_BLOCK_M):
    """Conv over a SHARED input, both nets' filters Cout-concatenated (no zeros)."""
    kh, kw = tw.shape[2], tw.shape[3]
    patches, oh, ow = _im2col(x_nhwc, kh, kw, stride)
    w = jnp.concatenate([_wcol_bf16(tw), _wcol_bf16(pw)], axis=1)
    b = jnp.concatenate([tb, pb], axis=0)
    y = matmul_bias_act(patches, w, b, act, out_dtype=jnp.bfloat16, block_m=block_m)
    return y.reshape(x_nhwc.shape[0], oh, ow, w.shape[1])


def conv2d_dual(x_nhwc, tw, pw, tb, pb, stride, act, block_m=_CONV_BLOCK_M):
    """Per-net conv (target channels = first half of C, predictor = second half):
    two K-half dots inside one kernel, one 128-lane store — no zero MXU blocks."""
    ci_t = tw.shape[1]
    kh, kw = tw.shape[2], tw.shape[3]
    pt, oh, ow = _im2col(x_nhwc[..., :ci_t], kh, kw, stride)
    pp, _, _ = _im2col(x_nhwc[..., ci_t:], kh, kw, stride)
    b = jnp.concatenate([tb, pb], axis=0)
    y = dual_matmul_bias_act(pt, pp, _wcol_bf16(tw), _wcol_bf16(pw), b, act,
                             out_dtype=jnp.bfloat16, block_m=block_m)
    return y.reshape(x_nhwc.shape[0], oh, ow, tw.shape[0] + pw.shape[0])


# ----------------------------------------------------------------------------
# Forward
# ----------------------------------------------------------------------------
def _nhwc_fc_rows(l1_w, c, oh, ow):
    """Permute NCHW-flatten FC rows to NHWC-flatten order (constant under jit),
    eliminating the runtime NHWC->NCHW activation transpose."""
    rnd = l1_w.shape[1]
    return l1_w.reshape(c, oh, ow, rnd).transpose(1, 2, 0, 3).reshape(c * oh * ow, rnd)


def rnd_net_forward(params, obs_nchw, core_output):
    """Returns (int_rewards, int_values, predict_next_feature, target_next_feature)."""
    n, c, h, w = obs_nchw.shape
    # atari path: last frame only; obs stays uint8 all the way into the norm kernel
    obs2d = obs_nchw[:, -1, :, :].reshape(n, h * w)
    mean2d = params["obs_rms_mean"].reshape(1, h * w).astype(jnp.float32)
    var2d = params["obs_rms_var"].reshape(1, h * w).astype(jnp.float32)
    x = obs_norm(obs2d, mean2d, var2d)            # (n, h*w) bf16
    x_nhwc = x.reshape(n, h, w, 1)                # single channel: NCHW == NHWC

    tp, pd = params["target"], params["predictor"]

    h1 = conv2d_shared(x_nhwc, tp["c1_w"], pd["c1_w"], tp["c1_b"], pd["c1_b"], 4, "leaky_relu")
    h2 = conv2d_dual(h1, tp["c2_w"], pd["c2_w"], tp["c2_b"], pd["c2_b"], 2, "leaky_relu")
    h3 = conv2d_dual(h2, tp["c3_w"], pd["c3_w"], tp["c3_b"], pd["c3_b"], 1, "leaky_relu")

    nb, oh, ow, cc2 = h3.shape
    cpn = cc2 // 2                                # channels per network (64)
    feat_t = h3[..., :cpn].reshape(nb, cpn * oh * ow)   # NHWC flatten, bf16
    feat_p = h3[..., cpn:].reshape(nb, cpn * oh * ow)

    wt1 = _nhwc_fc_rows(tp["l1_w"], cpn, oh, ow).astype(jnp.bfloat16)
    wp1 = _nhwc_fc_rows(pd["l1_w"], cpn, oh, ow).astype(jnp.bfloat16)

    target_feature, predict_feature, int_rewards, int_values = fused_rnd_head(
        feat_t, feat_p,
        wt1, tp["l1_b"].reshape(1, -1),
        wp1, pd["l1_b"].reshape(1, -1),
        pd["l2_w"].astype(jnp.bfloat16), pd["l2_b"].reshape(1, -1),
        pd["l3_w"].astype(jnp.bfloat16), pd["l3_b"].reshape(1, -1),
        core_output.astype(jnp.float32),
        params["critic_w"].reshape(1, -1).astype(jnp.float32),  # int_critic_linear
        params["critic_b"].reshape(1, 1).astype(jnp.float32),
    )
    return int_rewards, int_values, predict_feature, target_feature


# ----------------------------------------------------------------------------
# Deterministic parameter construction (PyTorch-layout weights; repacking above
# is constant-folded under jit)
# ----------------------------------------------------------------------------
def init_params(key, h, w, rnd_dim, core_out_size):
    def conv_w(k, cout, cin, kh, kw):
        return jax.random.normal(k, (cout, cin, kh, kw), jnp.float32) / math.sqrt(cin * kh * kw)

    def lin_w(k, fin, fout):
        return jax.random.normal(k, (fin, fout), jnp.float32) / math.sqrt(fin)

    def conv_out(s, kk, st):
        return (s - kk) // st + 1

    oh = conv_out(conv_out(conv_out(h, 8, 4), 4, 2), 3, 1)
    ow = conv_out(conv_out(conv_out(w, 8, 4), 4, 2), 3, 1)
    feat_dim = 64 * oh * ow

    ks = jax.random.split(key, 12)
    target = {
        "c1_w": conv_w(ks[0], 32, 1, 8, 8), "c1_b": jnp.zeros((32,), jnp.float32),
        "c2_w": conv_w(ks[1], 64, 32, 4, 4), "c2_b": jnp.zeros((64,), jnp.float32),
        "c3_w": conv_w(ks[2], 64, 64, 3, 3), "c3_b": jnp.zeros((64,), jnp.float32),
        "l1_w": lin_w(ks[3], feat_dim, rnd_dim), "l1_b": jnp.zeros((rnd_dim,), jnp.float32),
    }
    predictor = {
        "c1_w": conv_w(ks[4], 32, 1, 8, 8), "c1_b": jnp.zeros((32,), jnp.float32),
        "c2_w": conv_w(ks[5], 64, 32, 4, 4), "c2_b": jnp.zeros((64,), jnp.float32),
        "c3_w": conv_w(ks[6], 64, 64, 3, 3), "c3_b": jnp.zeros((64,), jnp.float32),
        "l1_w": lin_w(ks[7], feat_dim, rnd_dim), "l1_b": jnp.zeros((rnd_dim,), jnp.float32),
        "l2_w": lin_w(ks[8], rnd_dim, rnd_dim), "l2_b": jnp.zeros((rnd_dim,), jnp.float32),
        "l3_w": lin_w(ks[9], rnd_dim, rnd_dim), "l3_b": jnp.zeros((rnd_dim,), jnp.float32),
    }
    params = {
        "target": target,
        "predictor": predictor,
        # registered buffers (atari: n_channel = 1): zeros / ones as in __init__
        "obs_rms_mean": jnp.zeros((1, 1, h, w), jnp.float32),
        "obs_rms_var": jnp.ones((1, 1, h, w), jnp.float32),
        # int_critic_linear = nn.Linear(core_out_size, 1); stored pre-transposed
        "critic_w": lin_w(ks[10], core_out_size, 1),
        "critic_b": jnp.zeros((1,), jnp.float32),
    }
    return params


# TODO(synk): AGACNet's adversary policy path (AdvModel forward_head/core/tail,
# categorical log-prob / KL intrinsic rewards), the RNN core, the episodic
# CellCounter, and the stateful RMS / rewems buffer updates are host-side /
# module-external dependencies not expressible as a single forward kernel here.

if __name__ == "__main__":
    N, C, H, W = 2, 4, 36, 36          # frame-stacked atari-style obs (NCHW, uint8)
    CORE_OUT = 32
    RND_DIM = 512

    key = jax.random.PRNGKey(0)
    k_params, k_obs, k_core = jax.random.split(key, 3)

    params = init_params(k_params, H, W, RND_DIM, CORE_OUT)
    obs = jax.random.randint(k_obs, (N, C, H, W), 0, 256, jnp.int32).astype(jnp.uint8)
    core_output = jax.random.normal(k_core, (N, CORE_OUT), jnp.float32)

    fwd = jax.jit(functools.partial(rnd_net_forward, params))
    int_rewards, int_values, predict_feature, target_feature = fwd(obs, core_output)
    jax.block_until_ready((int_rewards, int_values, predict_feature, target_feature))

    assert int_rewards.shape == (N,)
    assert int_values.shape == (N, 1)
    assert predict_feature.shape == (N, RND_DIM)
    assert target_feature.shape == (N, RND_DIM)
    assert bool(jnp.all(jnp.isfinite(int_rewards))) and bool(jnp.all(jnp.isfinite(int_values)))
    print("KERNEL_OK")
</pallas_src>

<mosaic_0001>
module attributes {stable_mosaic.version = 11 : i64} {
  func.func @_obs_norm_kernel(%arg0: i32, %arg1: memref<2x1296xi8, #tpu.memory_space<vmem>>, %arg2: memref<1x1296xf32, #tpu.memory_space<vmem>>, %arg3: memref<1x1296xf32, #tpu.memory_space<vmem>>, %arg4: memref<2x1296xbf16, #tpu.memory_space<vmem>>) attributes {dimension_semantics = [#tpu.dimension_semantics<parallel>], iteration_bounds = array<i64: 1>, scalar_prefetch = 0 : i64, scratch_operands = 0 : i64, tpu.core_type = #tpu.core_type<tc>, window_params = [{transform_indices = @transform_0, window_bounds = array<i64: 2, 1296>}, {pipeline_mode = #tpu.pipeline_mode<synchronous>, transform_indices = @transform_1, window_bounds = array<i64: 1, 1296>}, {pipeline_mode = #tpu.pipeline_mode<synchronous>, transform_indices = @transform_2, window_bounds = array<i64: 1, 1296>}, {transform_indices = @transform_3, window_bounds = array<i64: 2, 1296>}]} {
    %c0 = arith.constant 0 : index
    %c0_0 = arith.constant 0 : index
    %0 = vector.load %arg1[%c0, %c0_0] : memref<2x1296xi8, #tpu.memory_space<vmem>>, vector<2x1296xi8>
    %1 = arith.extui %0 : vector<2x1296xi8> to vector<2x1296xi32>
    %2 = arith.sitofp %1 : vector<2x1296xi32> to vector<2x1296xf32>
    %c0_1 = arith.constant 0 : index
    %c0_2 = arith.constant 0 : index
    %3 = vector.load %arg3[%c0_1, %c0_2] : memref<1x1296xf32, #tpu.memory_space<vmem>>, vector<1x1296xf32>
    %cst = arith.constant 9.99999993E-9 : f32
    %4 = vector.broadcast %cst : f32 to vector<1x1296xf32>
    %5 = arith.addf %3, %4 : vector<1x1296xf32>
    %6 = math.rsqrt %5 : vector<1x1296xf32>
    %c0_3 = arith.constant 0 : index
    %c0_4 = arith.constant 0 : index
    %7 = vector.load %arg2[%c0_3, %c0_4] : memref<1x1296xf32, #tpu.memory_space<vmem>>, vector<1x1296xf32>
    %8 = vector.broadcast %7 : vector<1x1296xf32> to vector<2x1296xf32>
    %9 = arith.subf %2, %8 : vector<2x1296xf32>
    %10 = vector.broadcast %6 : vector<1x1296xf32> to vector<2x1296xf32>
    %11 = arith.mulf %9, %10 : vector<2x1296xf32>
    %cst_5 = arith.constant -5.000000e+00 : f32
    %cst_6 = arith.constant 5.000000e+00 : f32
    %12 = vector.broadcast %cst_5 : f32 to vector<2x1296xf32>
    %13 = arith.maximumf %12, %11 : vector<2x1296xf32>
    %14 = vector.broadcast %cst_6 : f32 to vector<2x1296xf32>
    %15 = arith.minimumf %14, %13 : vector<2x1296xf32>
    %16 = arith.truncf %15 : vector<2x1296xf32> to vector<2x1296xbf16>
    %c0_7 = arith.constant 0 : index
    %c0_8 = arith.constant 0 : index
    %17 = vector.load %arg4[%c0_7, %c0_8] : memref<2x1296xbf16, #tpu.memory_space<vmem>>, vector<2x1296xbf16>
    tpu.vector_store %arg4[%c0_7, %c0_8], %16 {strides = array<i32>} : memref<2x1296xbf16, #tpu.memory_space<vmem>>, vector<2x1296xbf16>,
    return
  }
  func.func @transform_0(%arg0: i32) -> (i32, i32) {
    %c0_i32 = arith.constant 0 : i32
    %c0_i32_0 = arith.constant 0 : i32
    return %arg0, %c0_i32 : i32, i32
  }
  func.func @transform_1(%arg0: i32) -> (i32, i32) {
    %c0_i32 = arith.constant 0 : i32
    %c0_i32_0 = arith.constant 0 : i32
    %c0_i32_1 = arith.constant 0 : i32
    return %c0_i32, %c0_i32_0 : i32, i32
  }
  func.func @transform_2(%arg0: i32) -> (i32, i32) {
    %c0_i32 = arith.constant 0 : i32
    %c0_i32_0 = arith.constant 0 : i32
    %c0_i32_1 = arith.constant 0 : i32
    return %c0_i32, %c0_i32_0 : i32, i32
  }
  func.func @transform_3(%arg0: i32) -> (i32, i32) {
    %c0_i32 = arith.constant 0 : i32
    %c0_i32_0 = arith.constant 0 : i32
    return %arg0, %c0_i32 : i32, i32
  }
}

module attributes {stable_mosaic.version = 11 : i64} {
  func.func @_matmul_bias_act_kernel(%arg0: i32, %arg1: memref<64x64xbf16, #tpu.memory_space<vmem>>, %arg2: memref<64x64xbf16, #tpu.memory_space<vmem>>, %arg3: memref<1x64xf32, #tpu.memory_space<vmem>>, %arg4: memref<64x64xbf16, #tpu.memory_space<vmem>>) attributes {dimension_semantics = [#tpu.dimension_semantics<parallel>], iteration_bounds = array<i64: 2>, scalar_prefetch = 0 : i64, scratch_operands = 0 : i64, tpu.core_type = #tpu.core_type<tc>, window_params = [{transform_indices = @transform_0, window_bounds = array<i64: 64, 64>}, {pipeline_mode = #tpu.pipeline_mode<synchronous>, transform_indices = @transform_1, window_bounds = array<i64: 64, 64>}, {pipeline_mode = #tpu.pipeline_mode<synchronous>, transform_indices = @transform_2, window_bounds = array<i64: 1, 64>}, {transform_indices = @transform_3, window_bounds = array<i64: 64, 64>}]} {
    %c0 = arith.constant 0 : index
    %c0_0 = arith.constant 0 : index
    %0 = vector.load %arg1[%c0, %c0_0] : memref<64x64xbf16, #tpu.memory_space<vmem>>, vector<64x64xbf16>
    %c0_1 = arith.constant 0 : index
    %c0_2 = arith.constant 0 : index
    %1 = vector.load %arg2[%c0_1, %c0_2] : memref<64x64xbf16, #tpu.memory_space<vmem>>, vector<64x64xbf16>
    %cst = arith.constant dense<0.000000e+00> : vector<64x64xf32>
    %2 = tpu.matmul %0, %1, %cst {dimension_numbers = #tpu.dot_dimension_numbers<[1], [0], [0], [1], [0, 0, 1, 1], [], []>} : vector<64x64xbf16>, vector<64x64xbf16>, vector<64x64xf32> -> vector<64x64xf32>
    %c0_3 = arith.constant 0 : index
    %c0_4 = arith.constant 0 : index
    %3 = vector.load %arg3[%c0_3, %c0_4] : memref<1x64xf32, #tpu.memory_space<vmem>>, vector<1x64xf32>
    %4 = vector.broadcast %3 : vector<1x64xf32> to vector<64x64xf32>
    %5 = arith.addf %2, %4 : vector<64x64xf32>
    %cst_5 = arith.constant 0.00999999977 : f32
    %6 = vector.broadcast %cst_5 : f32 to vector<64x64xf32>
    %7 = arith.mulf %6, %5 : vector<64x64xf32>
    %8 = arith.maximumf %5, %7 : vector<64x64xf32>
    %9 = arith.truncf %8 : vector<64x64xf32> to vector<64x64xbf16>
    %c0_6 = arith.constant 0 : index
    %c0_7 = arith.constant 0 : index
    %10 = vector.load %arg4[%c0_6, %c0_7] : memref<64x64xbf16, #tpu.memory_space<vmem>>, vector<64x64xbf16>
    tpu.vector_store %arg4[%c0_6, %c0_7], %9 {strides = array<i32>} : memref<64x64xbf16, #tpu.memory_space<vmem>>, vector<64x64xbf16>,
    return
  }
  func.func @transform_0(%arg0: i32) -> (i32, i32) {
    %c0_i32 = arith.constant 0 : i32
    %c0_i32_0 = arith.constant 0 : i32
    return %arg0, %c0_i32 : i32, i32
  }
  func.func @transform_1(%arg0: i32) -> (i32, i32) {
    %c0_i32 = arith.constant 0 : i32
    %c0_i32_0 = arith.constant 0 : i32
    %c0_i32_1 = arith.constant 0 : i32
    return %c0_i32, %c0_i32_0 : i32, i32
  }
  func.func @transform_2(%arg0: i32) -> (i32, i32) {
    %c0_i32 = arith.constant 0 : i32
    %c0_i32_0 = arith.constant 0 : i32
    %c0_i32_1 = arith.constant 0 : i32
    return %c0_i32, %c0_i32_0 : i32, i32
  }
  func.func @transform_3(%arg0: i32) -> (i32, i32) {
    %c0_i32 = arith.constant 0 : i32
    %c0_i32_0 = arith.constant 0 : i32
    return %arg0, %c0_i32 : i32, i32
  }
}

module attributes {stable_mosaic.version = 11 : i64} {
  func.func @_dual_matmul_bias_act_kernel(%arg0: i32, %arg1: memref<18x512xbf16, #tpu.memory_space<vmem>>, %arg2: memref<18x512xbf16, #tpu.memory_space<vmem>>, %arg3: memref<512x64xbf16, #tpu.memory_space<vmem>>, %arg4: memref<512x64xbf16, #tpu.memory_space<vmem>>, %arg5: memref<1x128xf32, #tpu.memory_space<vmem>>, %arg6: memref<18x128xbf16, #tpu.memory_space<vmem>>) attributes {dimension_semantics = [#tpu.dimension_semantics<parallel>], iteration_bounds = array<i64: 1>, scalar_prefetch = 0 : i64, scratch_operands = 0 : i64, tpu.core_type = #tpu.core_type<tc>, window_params = [{transform_indices = @transform_0, window_bounds = array<i64: 18, 512>}, {transform_indices = @transform_1, window_bounds = array<i64: 18, 512>}, {pipeline_mode = #tpu.pipeline_mode<synchronous>, transform_indices = @transform_2, window_bounds = array<i64: 512, 64>}, {pipeline_mode = #tpu.pipeline_mode<synchronous>, transform_indices = @transform_3, window_bounds = array<i64: 512, 64>}, {pipeline_mode = #tpu.pipeline_mode<synchronous>, transform_indices = @transform_4, window_bounds = array<i64: 1, 128>}, {transform_indices = @transform_5, window_bounds = array<i64: 18, 128>}]} {
    %c0 = arith.constant 0 : index
    %c0_0 = arith.constant 0 : index
    %0 = vector.load %arg1[%c0, %c0_0] : memref<18x512xbf16, #tpu.memory_space<vmem>>, vector<18x512xbf16>
    %c0_1 = arith.constant 0 : index
    %c0_2 = arith.constant 0 : index
    %1 = vector.load %arg2[%c0_1, %c0_2] : memref<18x512xbf16, #tpu.memory_space<vmem>>, vector<18x512xbf16>
    %c0_3 = arith.constant 0 : index
    %c0_4 = arith.constant 0 : index
    %2 = vector.load %arg3[%c0_3, %c0_4] : memref<512x64xbf16, #tpu.memory_space<vmem>>, vector<512x64xbf16>
    %cst = arith.constant dense<0.000000e+00> : vector<18x64xf32>
    %3 = tpu.matmul %0, %2, %cst {dimension_numbers = #tpu.dot_dimension_numbers<[1], [0], [0], [1], [0, 0, 1, 1], [], []>} : vector<18x512xbf16>, vector<512x64xbf16>, vector<18x64xf32> -> vector<18x64xf32>
    %c0_5 = arith.constant 0 : index
    %c0_6 = arith.constant 0 : index
    %4 = vector.load %arg4[%c0_5, %c0_6] : memref<512x64xbf16, #tpu.memory_space<vmem>>, vector<512x64xbf16>
    %cst_7 = arith.constant dense<0.000000e+00> : vector<18x64xf32>
    %5 = tpu.matmul %1, %4, %cst_7 {dimension_numbers = #tpu.dot_dimension_numbers<[1], [0], [0], [1], [0, 0, 1, 1], [], []>} : vector<18x512xbf16>, vector<512x64xbf16>, vector<18x64xf32> -> vector<18x64xf32>
    %6 = tpu.concatenate %3, %5 in 1 : vector<18x64xf32>, vector<18x64xf32> -> vector<18x128xf32>
    %c0_8 = arith.constant 0 : index
    %c0_9 = arith.constant 0 : index
    %7 = vector.load %arg5[%c0_8, %c0_9] : memref<1x128xf32, #tpu.memory_space<vmem>>, vector<1x128xf32>
    %8 = vector.broadcast %7 : vector<1x128xf32> to vector<18x128xf32>
    %9 = arith.addf %6, %8 : vector<18x128xf32>
    %cst_10 = arith.constant 0.00999999977 : f32
    %10 = vector.broadcast %cst_10 : f32 to vector<18x128xf32>
    %11 = arith.mulf %10, %9 : vector<18x128xf32>
    %12 = arith.maximumf %9, %11 : vector<18x128xf32>
    %13 = arith.truncf %12 : vector<18x128xf32> to vector<18x128xbf16>
    %c0_11 = arith.constant 0 : index
    %c0_12 = arith.constant 0 : index
    %14 = vector.load %arg6[%c0_11, %c0_12] : memref<18x128xbf16, #tpu.memory_space<vmem>>, vector<18x128xbf16>
    tpu.vector_store %arg6[%c0_11, %c0_12], %13 {strides = array<i32>} : memref<18x128xbf16, #tpu.memory_space<vmem>>, vector<18x128xbf16>,
    return
  }
  func.func @transform_0(%arg0: i32) -> (i32, i32) {
    %c0_i32 = arith.constant 0 : i32
    %c0_i32_0 = arith.constant 0 : i32
    return %arg0, %c0_i32 : i32, i32
  }
  func.func @transform_1(%arg0: i32) -> (i32, i32) {
    %c0_i32 = arith.constant 0 : i32
    %c0_i32_0 = arith.constant 0 : i32
    return %arg0, %c0_i32 : i32, i32
  }
  func.func @transform_2(%arg0: i32) -> (i32, i32) {
    %c0_i32 = arith.constant 0 : i32
    %c0_i32_0 = arith.constant 0 : i32
    %c0_i32_1 = arith.constant 0 : i32
    return %c0_i32, %c0_i32_0 : i32, i32
  }
  func.func @transform_3(%arg0: i32) -> (i32, i32) {
    %c0_i32 = arith.constant 0 : i32
    %c0_i32_0 = arith.constant 0 : i32
    %c0_i32_1 = arith.constant 0 : i32
    return %c0_i32, %c0_i32_0 : i32, i32
  }
  func.func @transform_4(%arg0: i32) -> (i32, i32) {
    %c0_i32 = arith.constant 0 : i32
    %c0_i32_0 = arith.constant 0 : i32
    %c0_i32_1 = arith.constant 0 : i32
    return %c0_i32, %c0_i32_0 : i32, i32
  }
  func.func @transform_5(%arg0: i32) -> (i32, i32) {
    %c0_i32 = arith.constant 0 : i32
    %c0_i32_0 = arith.constant 0 : i32
    return %arg0, %c0_i32 : i32, i32
  }
}

module attributes {stable_mosaic.version = 11 : i64} {
  func.func @_dual_matmul_bias_act_kernel(%arg0: i32, %arg1: memref<2x576xbf16, #tpu.memory_space<vmem>>, %arg2: memref<2x576xbf16, #tpu.memory_space<vmem>>, %arg3: memref<576x64xbf16, #tpu.memory_space<vmem>>, %arg4: memref<576x64xbf16, #tpu.memory_space<vmem>>, %arg5: memref<1x128xf32, #tpu.memory_space<vmem>>, %arg6: memref<2x128xbf16, #tpu.memory_space<vmem>>) attributes {dimension_semantics = [#tpu.dimension_semantics<parallel>], iteration_bounds = array<i64: 1>, scalar_prefetch = 0 : i64, scratch_operands = 0 : i64, tpu.core_type = #tpu.core_type<tc>, window_params = [{transform_indices = @transform_0, window_bounds = array<i64: 2, 576>}, {transform_indices = @transform_1, window_bounds = array<i64: 2, 576>}, {pipeline_mode = #tpu.pipeline_mode<synchronous>, transform_indices = @transform_2, window_bounds = array<i64: 576, 64>}, {pipeline_mode = #tpu.pipeline_mode<synchronous>, transform_indices = @transform_3, window_bounds = array<i64: 576, 64>}, {pipeline_mode = #tpu.pipeline_mode<synchronous>, transform_indices = @transform_4, window_bounds = array<i64: 1, 128>}, {transform_indices = @transform_5, window_bounds = array<i64: 2, 128>}]} {
    %c0 = arith.constant 0 : index
    %c0_0 = arith.constant 0 : index
    %0 = vector.load %arg1[%c0, %c0_0] : memref<2x576xbf16, #tpu.memory_space<vmem>>, vector<2x576xbf16>
    %c0_1 = arith.constant 0 : index
    %c0_2 = arith.constant 0 : index
    %1 = vector.load %arg2[%c0_1, %c0_2] : memref<2x576xbf16, #tpu.memory_space<vmem>>, vector<2x576xbf16>
    %c0_3 = arith.constant 0 : index
    %c0_4 = arith.constant 0 : index
    %2 = vector.load %arg3[%c0_3, %c0_4] : memref<576x64xbf16, #tpu.memory_space<vmem>>, vector<576x64xbf16>
    %cst = arith.constant dense<0.000000e+00> : vector<2x64xf32>
    %3 = tpu.matmul %0, %2, %cst {dimension_numbers = #tpu.dot_dimension_numbers<[1], [0], [0], [1], [0, 0, 1, 1], [], []>} : vector<2x576xbf16>, vector<576x64xbf16>, vector<2x64xf32> -> vector<2x64xf32>
    %c0_5 = arith.constant 0 : index
    %c0_6 = arith.constant 0 : index
    %4 = vector.load %arg4[%c0_5, %c0_6] : memref<576x64xbf16, #tpu.memory_space<vmem>>, vector<576x64xbf16>
    %cst_7 = arith.constant dense<0.000000e+00> : vector<2x64xf32>
    %5 = tpu.matmul %1, %4, %cst_7 {dimension_numbers = #tpu.dot_dimension_numbers<[1], [0], [0], [1], [0, 0, 1, 1], [], []>} : vector<2x576xbf16>, vector<576x64xbf16>, vector<2x64xf32> -> vector<2x64xf32>
    %6 = tpu.concatenate %3, %5 in 1 : vector<2x64xf32>, vector<2x64xf32> -> vector<2x128xf32>
    %c0_8 = arith.constant 0 : index
    %c0_9 = arith.constant 0 : index
    %7 = vector.load %arg5[%c0_8, %c0_9] : memref<1x128xf32, #tpu.memory_space<vmem>>, vector<1x128xf32>
    %8 = vector.broadcast %7 : vector<1x128xf32> to vector<2x128xf32>
    %9 = arith.addf %6, %8 : vector<2x128xf32>
    %cst_10 = arith.constant 0.00999999977 : f32
    %10 = vector.broadcast %cst_10 : f32 to vector<2x128xf32>
    %11 = arith.mulf %10, %9 : vector<2x128xf32>
    %12 = arith.maximumf %9, %11 : vector<2x128xf32>
    %13 = arith.truncf %12 : vector<2x128xf32> to vector<2x128xbf16>
    %c0_11 = arith.constant 0 : index
    %c0_12 = arith.constant 0 : index
    %14 = vector.load %arg6[%c0_11, %c0_12] : memref<2x128xbf16, #tpu.memory_space<vmem>>, vector<2x128xbf16>
    tpu.vector_store %arg6[%c0_11, %c0_12], %13 {strides = array<i32>} : memref<2x128xbf16, #tpu.memory_space<vmem>>, vector<2x128xbf16>,
    return
  }
  func.func @transform_0(%arg0: i32) -> (i32, i32) {
    %c0_i32 = arith.constant 0 : i32
    %c0_i32_0 = arith.constant 0 : i32
    return %arg0, %c0_i32 : i32, i32
  }
  func.func @transform_1(%arg0: i32) -> (i32, i32) {
    %c0_i32 = arith.constant 0 : i32
    %c0_i32_0 = arith.constant 0 : i32
    return %arg0, %c0_i32 : i32, i32
  }
  func.func @transform_2(%arg0: i32) -> (i32, i32) {
    %c0_i32 = arith.constant 0 : i32
    %c0_i32_0 = arith.constant 0 : i32
    %c0_i32_1 = arith.constant 0 : i32
    return %c0_i32, %c0_i32_0 : i32, i32
  }
  func.func @transform_3(%arg0: i32) -> (i32, i32) {
    %c0_i32 = arith.constant 0 : i32
    %c0_i32_0 = arith.constant 0 : i32
    %c0_i32_1 = arith.constant 0 : i32
    return %c0_i32, %c0_i32_0 : i32, i32
  }
  func.func @transform_4(%arg0: i32) -> (i32, i32) {
    %c0_i32 = arith.constant 0 : i32
    %c0_i32_0 = arith.constant 0 : i32
    %c0_i32_1 = arith.constant 0 : i32
    return %c0_i32, %c0_i32_0 : i32, i32
  }
  func.func @transform_5(%arg0: i32) -> (i32, i32) {
    %c0_i32 = arith.constant 0 : i32
    %c0_i32_0 = arith.constant 0 : i32
    return %arg0, %c0_i32 : i32, i32
  }
}

module attributes {stable_mosaic.version = 11 : i64} {
  func.func @_fused_head_kernel(%arg0: i32, %arg1: memref<2x64xbf16, #tpu.memory_space<vmem>>, %arg2: memref<2x64xbf16, #tpu.memory_space<vmem>>, %arg3: memref<64x512xbf16, #tpu.memory_space<vmem>>, %arg4: memref<1x512xf32, #tpu.memory_space<vmem>>, %arg5: memref<64x512xbf16, #tpu.memory_space<vmem>>, %arg6: memref<1x512xf32, #tpu.memory_space<vmem>>, %arg7: memref<512x512xbf16, #tpu.memory_space<vmem>>, %arg8: memref<1x512xf32, #tpu.memory_space<vmem>>, %arg9: memref<512x512xbf16, #tpu.memory_space<vmem>>, %arg10: memref<1x512xf32, #tpu.memory_space<vmem>>, %arg11: memref<2x32xf32, #tpu.memory_space<vmem>>, %arg12: memref<1x32xf32, #tpu.memory_space<vmem>>, %arg13: memref<1x1xf32, #tpu.memory_space<smem>>, %arg14: memref<2x512xf32, #tpu.memory_space<vmem>>, %arg15: memref<2x512xf32, #tpu.memory_space<vmem>>, %arg16: memref<2x128xf32, #tpu.memory_space<vmem>>) attributes {dimension_semantics = [#tpu.dimension_semantics<parallel>], iteration_bounds = array<i64: 1>, scalar_prefetch = 0 : i64, scratch_operands = 0 : i64, tpu.core_type = #tpu.core_type<tc>, window_params = [{transform_indices = @transform_0, window_bounds = array<i64: 2, 64>}, {transform_indices = @transform_1, window_bounds = array<i64: 2, 64>}, {pipeline_mode = #tpu.pipeline_mode<synchronous>, transform_indices = @transform_2, window_bounds = array<i64: 64, 512>}, {pipeline_mode = #tpu.pipeline_mode<synchronous>, transform_indices = @transform_3, window_bounds = array<i64: 1, 512>}, {pipeline_mode = #tpu.pipeline_mode<synchronous>, transform_indices = @transform_4, window_bounds = array<i64: 64, 512>}, {pipeline_mode = #tpu.pipeline_mode<synchronous>, transform_indices = @transform_5, window_bounds = array<i64: 1, 512>}, {pipeline_mode = #tpu.pipeline_mode<synchronous>, transform_indices = @transform_6, window_bounds = array<i64: 512, 512>}, {pipeline_mode = #tpu.pipeline_mode<synchronous>, transform_indices = @transform_7, window_bounds = array<i64: 1, 512>}, {pipeline_mode = #tpu.pipeline_mode<synchronous>, transform_indices = @transform_8, window_bounds = array<i64: 512, 512>}, {pipeline_mode = #tpu.pipeline_mode<synchronous>, transform_indices = @transform_9, window_bounds = array<i64: 1, 512>}, {transform_indices = @transform_10, window_bounds = array<i64: 2, 32>}, {pipeline_mode = #tpu.pipeline_mode<synchronous>, transform_indices = @transform_11, window_bounds = array<i64: 1, 32>}, {transform_indices = @transform_12, window_bounds = array<i64: 1, 1>}, {transform_indices = @transform_13, window_bounds = array<i64: 2, 512>}, {transform_indices = @transform_14, window_bounds = array<i64: 2, 512>}, {transform_indices = @transform_15, window_bounds = array<i64: 2, 128>}]} {
    %c0 = arith.constant 0 : index
    %c0_0 = arith.constant 0 : index
    %0 = vector.load %arg1[%c0, %c0_0] : memref<2x64xbf16, #tpu.memory_space<vmem>>, vector<2x64xbf16>
    %c0_1 = arith.constant 0 : index
    %c0_2 = arith.constant 0 : index
    %1 = vector.load %arg2[%c0_1, %c0_2] : memref<2x64xbf16, #tpu.memory_space<vmem>>, vector<2x64xbf16>
    %c0_3 = arith.constant 0 : index
    %c0_4 = arith.constant 0 : index
    %2 = vector.load %arg3[%c0_3, %c0_4] : memref<64x512xbf16, #tpu.memory_space<vmem>>, vector<64x512xbf16>
    %cst = arith.constant dense<0.000000e+00> : vector<2x512xf32>
    %3 = tpu.matmul %0, %2, %cst {dimension_numbers = #tpu.dot_dimension_numbers<[1], [0], [0], [1], [0, 0, 1, 1], [], []>} : vector<2x64xbf16>, vector<64x512xbf16>, vector<2x512xf32> -> vector<2x512xf32>
    %c0_5 = arith.constant 0 : index
    %c0_6 = arith.constant 0 : index
    %4 = vector.load %arg4[%c0_5, %c0_6] : memref<1x512xf32, #tpu.memory_space<vmem>>, vector<1x512xf32>
    %5 = vector.broadcast %4 : vector<1x512xf32> to vector<2x512xf32>
    %6 = arith.addf %3, %5 : vector<2x512xf32>
    %c0_7 = arith.constant 0 : index
    %c0_8 = arith.constant 0 : index
    %7 = vector.load %arg5[%c0_7, %c0_8] : memref<64x512xbf16, #tpu.memory_space<vmem>>, vector<64x512xbf16>
    %cst_9 = arith.constant dense<0.000000e+00> : vector<2x512xf32>
    %8 = tpu.matmul %1, %7, %cst_9 {dimension_numbers = #tpu.dot_dimension_numbers<[1], [0], [0], [1], [0, 0, 1, 1], [], []>} : vector<2x64xbf16>, vector<64x512xbf16>, vector<2x512xf32> -> vector<2x512xf32>
    %c0_10 = arith.constant 0 : index
    %c0_11 = arith.constant 0 : index
    %9 = vector.load %arg6[%c0_10, %c0_11] : memref<1x512xf32, #tpu.memory_space<vmem>>, vector<1x512xf32>
    %10 = vector.broadcast %9 : vector<1x512xf32> to vector<2x512xf32>
    %11 = arith.addf %8, %10 : vector<2x512xf32>
    %cst_12 = arith.constant 0.000000e+00 : f32
    %12 = vector.broadcast %cst_12 : f32 to vector<2x512xf32>
    %13 = arith.maximumf %11, %12 : vector<2x512xf32>
    %14 = arith.truncf %13 : vector<2x512xf32> to vector<2x512xbf16>
    %c0_13 = arith.constant 0 : index
    %c0_14 = arith.constant 0 : index
    %15 = vector.load %arg7[%c0_13, %c0_14] : memref<512x512xbf16, #tpu.memory_space<vmem>>, vector<512x512xbf16>
    %cst_15 = arith.constant dense<0.000000e+00> : vector<2x512xf32>
    %16 = tpu.matmul %14, %15, %cst_15 {dimension_numbers = #tpu.dot_dimension_numbers<[1], [0], [0], [1], [0, 0, 1, 1], [], []>} : vector<2x512xbf16>, vector<512x512xbf16>, vector<2x512xf32> -> vector<2x512xf32>
    %c0_16 = arith.constant 0 : index
    %c0_17 = arith.constant 0 : index
    %17 = vector.load %arg8[%c0_16, %c0_17] : memref<1x512xf32, #tpu.memory_space<vmem>>, vector<1x512xf32>
    %18 = vector.broadcast %17 : vector<1x512xf32> to vector<2x512xf32>
    %19 = arith.addf %16, %18 : vector<2x512xf32>
    %cst_18 = arith.constant 0.000000e+00 : f32
    %20 = vector.broadcast %cst_18 : f32 to vector<2x512xf32>
    %21 = arith.maximumf %19, %20 : vector<2x512xf32>
    %22 = arith.truncf %21 : vector<2x512xf32> to vector<2x512xbf16>
    %c0_19 = arith.constant 0 : index
    %c0_20 = arith.constant 0 : index
    %23 = vector.load %arg9[%c0_19, %c0_20] : memref<512x512xbf16, #tpu.memory_space<vmem>>, vector<512x512xbf16>
    %cst_21 = arith.constant dense<0.000000e+00> : vector<2x512xf32>
    %24 = tpu.matmul %22, %23, %cst_21 {dimension_numbers = #tpu.dot_dimension_numbers<[1], [0], [0], [1], [0, 0, 1, 1], [], []>} : vector<2x512xbf16>, vector<512x512xbf16>, vector<2x512xf32> -> vector<2x512xf32>
    %c0_22 = arith.constant 0 : index
    %c0_23 = arith.constant 0 : index
    %25 = vector.load %arg10[%c0_22, %c0_23] : memref<1x512xf32, #tpu.memory_space<vmem>>, vector<1x512xf32>
    %26 = vector.broadcast %25 : vector<1x512xf32> to vector<2x512xf32>
    %27 = arith.addf %24, %26 : vector<2x512xf32>
    %c0_24 = arith.constant 0 : index
    %c0_25 = arith.constant 0 : index
    %28 = vector.load %arg14[%c0_24, %c0_25] : memref<2x512xf32, #tpu.memory_space<vmem>>, vector<2x512xf32>
    tpu.vector_store %arg14[%c0_24, %c0_25], %6 {strides = array<i32>} : memref<2x512xf32, #tpu.memory_space<vmem>>, vector<2x512xf32>,
    %c0_26 = arith.constant 0 : index
    %c0_27 = arith.constant 0 : index
    %29 = vector.load %arg15[%c0_26, %c0_27] : memref<2x512xf32, #tpu.memory_space<vmem>>, vector<2x512xf32>
    tpu.vector_store %arg15[%c0_26, %c0_27], %27 {strides = array<i32>} : memref<2x512xf32, #tpu.memory_space<vmem>>, vector<2x512xf32>,
    %30 = arith.subf %6, %27 : vector<2x512xf32>
    %31 = arith.mulf %30, %30 : vector<2x512xf32>
    %cst_28 = arith.constant dense<0.000000e+00> : vector<2xf32>
    %32 = vector.multi_reduction <add>, %31, %cst_28 [1] : vector<2x512xf32> to vector<2xf32>
    %33 = vector.shape_cast %32 : vector<2xf32> to vector<2x1xf32>
    %cst_29 = arith.constant 5.000000e-01 : f32
    %34 = vector.broadcast %cst_29 : f32 to vector<2x1xf32>
    %35 = arith.mulf %34, %33 : vector<2x1xf32>
    %c0_30 = arith.constant 0 : index
    %c0_31 = arith.constant 0 : index
    %36 = vector.load %arg11[%c0_30, %c0_31] : memref<2x32xf32, #tpu.memory_space<vmem>>, vector<2x32xf32>
    %c0_32 = arith.constant 0 : index
    %c0_33 = arith.constant 0 : index
    %37 = vector.load %arg12[%c0_32, %c0_33] : memref<1x32xf32, #tpu.memory_space<vmem>>, vector<1x32xf32>
    %38 = vector.broadcast %37 : vector<1x32xf32> to vector<2x32xf32>
    %39 = arith.mulf %36, %38 : vector<2x32xf32>
    %cst_34 = arith.constant dense<0.000000e+00> : vector<2xf32>
    %40 = vector.multi_reduction <add>, %39, %cst_34 [1] : vector<2x32xf32> to vector<2xf32>
    %41 = vector.shape_cast %40 : vector<2xf32> to vector<2x1xf32>
    %c0_35 = arith.constant 0 : index
    %c0_36 = arith.constant 0 : index
    %42 = memref.load %arg13[%c0_35, %c0_36] : memref<1x1xf32, #tpu.memory_space<smem>>
    %43 = vector.broadcast %42 : f32 to vector<2x1xf32>
    %44 = arith.addf %41, %43 : vector<2x1xf32>
    %45 = tpu.iota {dimensions = array<i32: 1>} : vector<2x128xi32>
    %c0_i32 = arith.constant 0 : i32
    %46 = vector.broadcast %c0_i32 : i32 to vector<2x128xi32>
    %47 = arith.cmpi eq, %45, %46 : vector<2x128xi32>
    %c1_i32 = arith.constant 1 : i32
    %48 = vector.broadcast %c1_i32 : i32 to vector<2x128xi32>
    %49 = arith.cmpi eq, %45, %48 : vector<2x128xi32>
    %cst_37 = arith.constant 0.000000e+00 : f32
    %50 = vector.shape_cast %44 : vector<2x1xf32> to vector<2x1xf32>
    %51 = vector.broadcast %50 : vector<2x1xf32> to vector<2x128xf32>
    %52 = vector.broadcast %cst_37 : f32 to vector<2x128xf32>
    %53 = arith.select %49, %51, %52 : vector<2x128xi1>, vector<2x128xf32>
    %54 = vector.shape_cast %35 : vector<2x1xf32> to vector<2x1xf32>
    %55 = vector.broadcast %54 : vector<2x1xf32> to vector<2x128xf32>
    %56 = arith.select %47, %55, %53 : vector<2x128xi1>, vector<2x128xf32>
    %c0_38 = arith.constant 0 : index
    %c0_39 = arith.constant 0 : index
    %57 = vector.load %arg16[%c0_38, %c0_39] : memref<2x128xf32, #tpu.memory_space<vmem>>, vector<2x128xf32>
    tpu.vector_store %arg16[%c0_38, %c0_39], %56 {strides = array<i32>} : memref<2x128xf32, #tpu.memory_space<vmem>>, vector<2x128xf32>,
    return
  }
  func.func @transform_0(%arg0: i32) -> (i32, i32) {
    %c0_i32 = arith.constant 0 : i32
    %c0_i32_0 = arith.constant 0 : i32
    return %arg0, %c0_i32 : i32, i32
  }
  func.func @transform_1(%arg0: i32) -> (i32, i32) {
    %c0_i32 = arith.constant 0 : i32
    %c0_i32_0 = arith.constant 0 : i32
    return %arg0, %c0_i32 : i32, i32
  }
  func.func @transform_2(%arg0: i32) -> (i32, i32) {
    %c0_i32 = arith.constant 0 : i32
    %c0_i32_0 = arith.constant 0 : i32
    %c0_i32_1 = arith.constant 0 : i32
    return %c0_i32, %c0_i32_0 : i32, i32
  }
  func.func @transform_3(%arg0: i32) -> (i32, i32) {
    %c0_i32 = arith.constant 0 : i32
    %c0_i32_0 = arith.constant 0 : i32
    %c0_i32_1 = arith.constant 0 : i32
    return %c0_i32, %c0_i32_0 : i32, i32
  }
  func.func @transform_4(%arg0: i32) -> (i32, i32) {
    %c0_i32 = arith.constant 0 : i32
    %c0_i32_0 = arith.constant 0 : i32
    %c0_i32_1 = arith.constant 0 : i32
    return %c0_i32, %c0_i32_0 : i32, i32
  }
  func.func @transform_5(%arg0: i32) -> (i32, i32) {
    %c0_i32 = arith.constant 0 : i32
    %c0_i32_0 = arith.constant 0 : i32
    %c0_i32_1 = arith.constant 0 : i32
    return %c0_i32, %c0_i32_0 : i32, i32
  }
  func.func @transform_6(%arg0: i32) -> (i32, i32) {
    %c0_i32 = arith.constant 0 : i32
    %c0_i32_0 = arith.constant 0 : i32
    %c0_i32_1 = arith.constant 0 : i32
    return %c0_i32, %c0_i32_0 : i32, i32
  }
  func.func @transform_7(%arg0: i32) -> (i32, i32) {
    %c0_i32 = arith.constant 0 : i32
    %c0_i32_0 = arith.constant 0 : i32
    %c0_i32_1 = arith.constant 0 : i32
    return %c0_i32, %c0_i32_0 : i32, i32
  }
  func.func @transform_8(%arg0: i32) -> (i32, i32) {
    %c0_i32 = arith.constant 0 : i32
    %c0_i32_0 = arith.constant 0 : i32
    %c0_i32_1 = arith.constant 0 : i32
    return %c0_i32, %c0_i32_0 : i32, i32
  }
  func.func @transform_9(%arg0: i32) -> (i32, i32) {
    %c0_i32 = arith.constant 0 : i32
    %c0_i32_0 = arith.constant 0 : i32
    %c0_i32_1 = arith.constant 0 : i32
    return %c0_i32, %c0_i32_0 : i32, i32
  }
  func.func @transform_10(%arg0: i32) -> (i32, i32) {
    %c0_i32 = arith.constant 0 : i32
    %c0_i32_0 = arith.constant 0 : i32
    return %arg0, %c0_i32 : i32, i32
  }
  func.func @transform_11(%arg0: i32) -> (i32, i32) {
    %c0_i32 = arith.constant 0 : i32
    %c0_i32_0 = arith.constant 0 : i32
    %c0_i32_1 = arith.constant 0 : i32
    return %c0_i32, %c0_i32_0 : i32, i32
  }
  func.func @transform_12(%arg0: i32) -> (i32, i32) {
    %c0_i32 = arith.constant 0 : i32
    %c0_i32_0 = arith.constant 0 : i32
    %c0_i32_1 = arith.constant 0 : i32
    return %c0_i32, %c0_i32_0 : i32, i32
  }
  func.func @transform_13(%arg0: i32) -> (i32, i32) {
    %c0_i32 = arith.constant 0 : i32
    %c0_i32_0 = arith.constant 0 : i32
    return %arg0, %c0_i32 : i32, i32
  }
  func.func @transform_14(%arg0: i32) -> (i32, i32) {
    %c0_i32 = arith.constant 0 : i32
    %c0_i32_0 = arith.constant 0 : i32
    return %arg0, %c0_i32 : i32, i32
  }
  func.func @transform_15(%arg0: i32) -> (i32, i32) {
    %c0_i32 = arith.constant 0 : i32
    %c0_i32_0 = arith.constant 0 : i32
    return %arg0, %c0_i32 : i32, i32
  }
}

</mosaic_0001>

<bundles_post_ra>
// kernel: squeeze.2
= control target key start
LH: loop header
LB: loop body
LE: loop exit
PB: predicated region body
PF: predicated region fallthrough
CT: control target
= control target key end

     0   :  { %s212_s14 = smov 3  ;;  %vm214_vm0 = vcmask 31744   ;;  %s225_s15 = smov 3  ;;  %vm250_vm1 = vcmask 195584   ;;  %vm230_vm2 = vcmask 64512   ;;  %vm246_vm3 = vcmask 97280   ;;  %s790_s0 = inlined_call_operand.vmem [shape: u8[2,36,36], index: 0, kind: input, shape index: {}]   ;;  %s791_s1 = inlined_call_operand.vmem [shape: u8[2,1296], index: 1, kind: output, shape index: {}]  }
   0x1   :  { %v637_v0 = vld [vmem:[%s790_s0 + $0xa] sm:$0xff]   ;;  %v182_v1 = vld [vmem:[%s790_s0] sm:$0xff]   ;;  %v633_v18 = vld [vmem:[%s790_s0 + $0x12] sm:$0x3]  ;;  %s302_s16 = smov 3  ;;  %s228_s17 = smov 3 }
   0x2   :  { %v89_v2 = vunpack.c.0.s8 %v637_v0  ;;  %v183_v3 = vunpack.c.0.s8 %v182_v1  ;;  %v70_v4 = vunpack.c.1.s8 %v637_v0  ;;  %v165_v5 = vunpack.c.1.s8 %v182_v1  ;;  %v638_v20 = vld [vmem:[%s790_s0 + $0x8] sm:$0x3]  ;;  %s209_s0 = smov 3  ;;  %s305_s18 = smov 3 }
   0x3   :  { %v51_v6 = vunpack.c.2.s8 %v637_v0  ;;  %v146_v7 = vunpack.c.2.s8 %v182_v1  ;;  %v32_v12 = vunpack.c.3.s8 %v637_v0  ;;  %v127_v13 = vunpack.c.3.s8 %v182_v1  ;;  %s241_s19 = smov 3  ;;  %s244_s20 = smov 3 }
   0x4   :  { %v93_v8 = vand.u32 255, %v89_v2  ;;  %v187_v9 = vand.u32 255, %v183_v3  ;;  %v74_v10 = vand.u32 255, %v70_v4  ;;  %v169_v11 = vand.u32 255, %v165_v5  ;;  %s683_s21 = smov 124   ;;  %s257_s22 = smov 3 }
   0x5   :  { %v55_v14 = vand.u32 255, %v51_v6  ;;  %v150_v15 = vand.u32 255, %v146_v7  ;;  %v36_v16 = vand.u32 255, %v32_v12  ;;  %v131_v17 = vand.u32 255, %v127_v13  ;;  %s260_s23 = smov 3  ;;  %s684_s24 = smov 104  }
   0x6   :  { %98 = vst [vmem:[#allocation1 + $0x28] sm:$0xff] %v93_v8  ;;  %v13_v19 = vunpack.c.0.s8 %v633_v18  ;;  %v108_v21 = vunpack.c.0.s8 %v638_v20  ;;  %s685_s25 = smov 116   ;;  %s318_s26 = smov 3  ;;  %vm262_vm4 = vcmask 130048   ;;  %vm278_vm5 = vcmask 1043458  }
   0x7   :  { %191 = vst [vmem:[#allocation1] sm:$0xff] %v187_v9  ;;  %s321_s27 = smov 3  ;;  %s273_s28 = smov 3  ;;  %vm266_vm6 = vcmask 162816   ;;  %vm234_vm7 = vcmask 228352   ;;  %vm218_vm8 = vcmask 261120  }
   0x8   :  { %79 = vst [vmem:[#allocation1 + $0x30] sm:$0xff] %v74_v10  ;;  %v17_v22 = vand.u32 255, %v13_v19  ;;  %v112_v23 = vand.u32 255, %v108_v21  ;;  %s276_s29 = smov 12  ;;  %s281_s30 = smov 3  ;;  %vm195_vm9 = vcmask 1041409  }
   0x9   :  { %174 = vst [vmem:[#allocation1 + $0x8] sm:$0xff] %v169_v11  ;;  %s284_s2 = smov 12  ;;  %s686_s3 = smov 120   ;;  %vm197_vm10 = vcmask 293888   ;;  %vm297_vm11 = vcmask 1048416   ;;  %vm221_vm12 = vcmask 1048544  }
   0xa   :  { %60 = vst [vmem:[#allocation1 + $0x38] sm:$0xff] %v55_v14  ;;  %s334_s4 = smov 3  ;;  %s337_s5 = smov 3  ;;  %vm314_vm13 = vcmask 1048384   ;;  %vm253_vm14 = vcmask 1048480   ;;  %vm237_vm15 = vcmask 1048512  }
   0xb   :  { %155 = vst [vmem:[#allocation1 + $0x10] sm:$0xff] %v150_v15  ;;  %s687_s6 = smov 112   ;;  %s688_s7 = smov 108  }
   0xc   :  { %41 = vst [vmem:[#allocation1 + $0x40] sm:$0xff] %v36_v16  ;;  %s350_s8 = smov 3  ;;  %s689_s9 = smov 100  }
   0xd   :  { %136 = vst [vmem:[#allocation1 + $0x18] sm:$0xff] %v131_v17  ;;  %s358_s10 = smov 3  ;;  %s690_s11 = smov 96   ;;  %v200_v19 = vld [vmem:[#allocation1 + $0x28] sm:$0x1]  }
   0xe   :  { %v210_v24 = vld [vmem:[#allocation1 + $0x7] ss:$40 sm:%s209_s0]   ;;  %22 = vst [vmem:[#allocation1 + $0x48] sm:$0xff] %v17_v22  ;;  %v274_v38 = vld [vmem:[#allocation1 + $0x3] ss:$40 sm:%s273_s28]   ;;  %s691_s12 = smov 92  }
   0xf   :  { %v213_v25 = vld [vmem:[#allocation1 + $0x7] ss:$40 sm:%s212_s14]   ;;  %117 = vst [vmem:[#allocation1 + $0x20] sm:$0xff] %v112_v23  ;;  %v282_v40 = vld [vmem:[#allocation1 + $0x3] ss:$40 sm:%s281_s30]   ;;  %s366_s13 = smov 3 }
  0x10   :  { %v215_v26 = vsel %vm214_vm0, %v213_v25, %v210_v24  ;;  %v303_v27 = vld [vmem:[#allocation1 + $0xa] ss:$40 sm:%s302_s16]   ;;  %v226_v28 = vld [vmem:[#allocation1 + $0xe] ss:$40 sm:%s225_s15]   ;;  %s374_s0 = smov 3  ;;  %s692_s14 = smov 88  }
  0x11   :  { %216 = vrot.lane.b32.xlu0 %v215_v26, %s683_s21  ;;  %v306_v29 = vld [vmem:[#allocation1 + $0xa] ss:$40 sm:%s305_s18]   ;;  %v229_v30 = vld [vmem:[#allocation1 + $0xe] ss:$40 sm:%s228_s17]   ;;  %v367_v54 = vld [vmem:[#allocation1 + $0xd] ss:$40 sm:%s366_s13]  }
  0x12   :  { %v242_v31 = vld [vmem:[#allocation1 + $0x15] ss:$40 sm:%s241_s19]   ;;  %v308_v33 = vsel %vm250_vm1, %v306_v29, %v303_v27  ;;  %v231_v35 = vsel %vm230_vm2, %v229_v30, %v226_v28  ;;  %v319_v44 = vld [vmem:[#allocation1 + $0x11] ss:$40 sm:%s318_s26]   ;;  %v359_v53 = vld [vmem:[#allocation1 + $0x6] ss:$40 sm:%s358_s10]  }
  0x13   :  { %v245_v32 = vld [vmem:[#allocation1 + $0x15] ss:$40 sm:%s244_s20]   ;;  %309 = vrot.lane.b32.xlu2 %v308_v33, %s684_s24  ;;  %v322_v45 = vld [vmem:[#allocation1 + $0x11] ss:$40 sm:%s321_s27]   ;;  %v375_v55 = vld [vmem:[#allocation1 + $0x14] ss:$40 sm:%s374_s0]  }
  0x14   :  { %v247_v34 = vsel %vm246_vm3, %v245_v32, %v242_v31  ;;  %v258_v36 = vld [vmem:[#allocation1 + $0x1c] ss:$40 sm:%s257_s22]   ;;  %v324_v48 = vsel %vm234_vm7, %v322_v45, %v319_v44  ;;  %v335_v49 = vld [vmem:[#allocation1 + $0x18] ss:$40 sm:%s334_s4]   ;;  %v351_v52 = vld [vmem:[#allocation1 + $0x1f] ss:$40 sm:%s350_s8]  }
  0x15   :  { %248 = vrot.lane.b32.xlu1 %v247_v34, %s685_s25  ;;  %v261_v37 = vld [vmem:[#allocation1 + $0x1c] ss:$40 sm:%s260_s23]   ;;  %v338_v50 = vld [vmem:[#allocation1 + $0x18] ss:$40 sm:%s337_s5]   ;;  %s382_s15 = smov 3  ;;  %s390_s16 = smov 3 }
  0x16   :  { %v277_v39 = vld [vmem:[#allocation1 - $0x2d] ss:$40 sm:%s276_s29]   ;;  %v263_v41 = vsel %vm262_vm4, %v261_v37, %v258_v36  ;;  %v340_v51 = vsel %vm218_vm8, %v338_v50, %v335_v49  ;;  %s393_s17 = smov 12  ;;  %s693_s18 = smov 84   ;;  %v391_v57 = vld [vmem:[#allocation1 + $0x2] ss:$40 sm:%s390_s16]  }
  0x17   :  { %v279_v42 = vsel %vm278_vm5, %v277_v39, %v274_v38  ;;  %v285_v43 = vld [vmem:[#allocation1 - $0x2d] ss:$40 sm:%s284_s2]   ;;  %s694_s19 = smov 80   ;;  %v394_v58 = vld [vmem:[#allocation1 - $0x2e] ss:$40 sm:%s393_s17]   ;;  %s404_s20 = smov 3 }
  0x18   :  { %v287_v46 = vsel %vm278_vm5, %v285_v43, %v282_v40  ;;  %v383_v56 = vld [vmem:[#allocation1 + $0x1b] ss:$40 sm:%s382_s15]   ;;  %s695_s21 = smov 76   ;;  %v396_v59 = vsel %vm278_vm5, %v394_v58, %v391_v57  ;;  %v405_v60 = vld [vmem:[#allocation1 + $0x9] ss:$40 sm:%s404_s20]   ;;  %s412_s22 = smov 3 }
  0x19   :  { %232 = vrot.lane.b32.xlu0 %v231_v35, %s686_s3  ;;  %v289_v47 = vsel %vm266_vm6, %v287_v46, %v279_v42  ;;  %s696_s23 = smov 72   ;;  %s697_s24 = smov 68   ;;  %v413_v61 = vld [vmem:[#allocation1 + $0x10] ss:$40 sm:%s412_s22]  }
  0x1a   :  { %s420_s25 = smov 3  ;;  %s428_s26 = smov 3  ;;  %v192_v16 = vld [vmem:[#allocation1] sm:$0x1]   ;;  %v202_v20 = vld [vmem:[#allocation1 + $0x47] sm:$0x2]  }
  0x1b   :  { %290 = vrot.lane.b32.xlu2 %v289_v47, %s688_s7  ;;  %s698_s27 = smov 64   ;;  %v421_v62 = vld [vmem:[#allocation1 + $0x17] ss:$40 sm:%s420_s25]   ;;  %v429_v63 = vld [vmem:[#allocation1 + $0x1e] ss:$40 sm:%s428_s26]   ;;  %s436_s28 = smov 3  ;;  %v204_v21 = vsel %vm195_vm9, %v202_v20, %v200_v19 }
  0x1c   :  { %s699_s29 = smov 60   ;;  %s700_s30 = smov 56   ;;  %v437_v0 = vld [vmem:[#allocation1 + $0x5] ss:$40 sm:%s436_s28]   ;;  %v194_v17 = vld [vmem:[#allocation1 + $0x1f] sm:$0x2]  }
  0x1d   :  { %264 = vrot.lane.b32.xlu1 %v263_v41, %s687_s6  ;;  %s444_s2 = smov 3  ;;  %s452_s3 = smov 3  ;;  %v196_v18 = vsel %vm195_vm9, %v194_v17, %v192_v16  ;;  %207 = vst.msk [vmem:[#allocation0 + $0x1] ss:$72 sm:$0x3] %vm197_vm10, %v204_v21   ;;  %vm456_vm9 = vcmask 654688  }
  0x1e   :  { %s701_s4 = smov 52   ;;  %v445_v1 = vld [vmem:[#allocation1 + $0xc] ss:$40 sm:%s444_s2]   ;;  %v453_v2 = vld [vmem:[#allocation1 + $0x13] ss:$40 sm:%s452_s3]   ;;  %s460_s5 = smov 3 }
  0x1f   :  { %s468_s6 = smov 3  ;;  %s471_s7 = smov 12  ;;  %v461_v3 = vld [vmem:[#allocation1 + $0x1a] ss:$40 sm:%s460_s5]  }
  0x20   :  { %s702_s8 = smov 48   ;;  %v469_v4 = vld [vmem:[#allocation1 + $0x1] ss:$40 sm:%s468_s6]   ;;  %s482_s10 = smov 3 }
  0x21   :  { %325 = vrot.lane.b32.xlu0 %v324_v48, %s689_s9  ;;  %s703_s9 = smov 44   ;;  %v472_v5 = vld [vmem:[#allocation1 - $0x2f] ss:$40 sm:%s471_s7]   ;;  %v483_v7 = vld [vmem:[#allocation1 + $0x8] ss:$40 sm:%s482_s10]   ;;  %s705_s13 = smov 36  }
  0x22   :  { %v474_v6 = vsel %vm278_vm5, %v472_v5, %v469_v4  ;;  %s706_s0 = smov 32   ;;  %s506_s15 = smov 3  ;;  %198 = vst.msk [vmem:[#allocation0] ss:$72 sm:$0x3] %vm197_vm10, %v196_v18   ;;  %vm330_vm5 = vcmask 1048352  }
  0x23   :  { %352 = vrot.lane.b32.xlu2 %v351_v52, %s691_s12  ;;  %s490_s12 = smov 3  ;;  %s707_s16 = smov 28   ;;  %v507_v10 = vld [vmem:[#allocation1 + $0x1d] ss:$40 sm:%s506_s15]   ;;  %vm386_vm10 = vcmask 917088  }
  0x24   :  { %v491_v8 = vld [vmem:[#allocation1 + $0xf] ss:$40 sm:%s490_s12]   ;;  %s514_s17 = smov 3  ;;  %s522_s20 = smov 3 }
  0x25   :  { %341 = vrot.lane.b32.xlu1 %v340_v51, %s690_s11  ;;  %s704_s11 = smov 40   ;;  %v515_v11 = vld [vmem:[#allocation1 + $0x4] ss:$40 sm:%s514_s17]   ;;  %s710_s22 = smov 16   ;;  %v523_v12 = vld [vmem:[#allocation1 + $0xb] ss:$40 sm:%s522_s20]  }
  0x26   :  { %s712_s25 = smov 8   ;;  %s713_s26 = smov 4  }
  0x29   :  { %360 = vrot.lane.b32.xlu0 %v359_v53, %s692_s14  ;;  %s498_s14 = smov 3 }
  0x2a   :  { %v499_v9 = vld [vmem:[#allocation1 + $0x16] ss:$40 sm:%s498_s14]  }
  0x2b   :  { %376 = vrot.lane.b32.xlu2 %v375_v55, %s694_s19  ;;  %s709_s19 = smov 20  }
  0x2d   :  { %368 = vrot.lane.b32.xlu1 %v367_v54, %s693_s18  ;;  %s708_s18 = smov 24  }
  0x31   :  { %384 = vrot.lane.b32.xlu0 %v383_v56, %s695_s21  ;;  %s530_s21 = smov 3 }
  0x32   :  { %v531_v13 = vld [vmem:[#allocation1 + $0x12] ss:$40 sm:%s530_s21]  }
  0x33   :  { %406 = vrot.lane.b32.xlu2 %v405_v60, %s697_s24  ;;  %s711_s24 = smov 12  }
  0x35   :  { %397 = vrot.lane.b32.xlu1 %v396_v59, %s696_s23  ;;  %s538_s23 = smov 3 }
  0x36   :  { %v539_v14 = vld [vmem:[#allocation1 + $0x19] ss:$40 sm:%s538_s23]  }
  0x39   :  { %414 = vrot.lane.b32.xlu0 %v413_v61, %s698_s27 }
  0x3b   :  { %430 = vrot.lane.b32.xlu2 %v429_v63, %s700_s30 }
  0x3d   :  { %422 = vrot.lane.b32.xlu1 %v421_v62, %s699_s29 }
  0x41   :  { %438 = vrot.lane.b32.xlu0 %v437_v0, %s701_s4 }
  0x43   :  { %454 = vrot.lane.b32.xlu2 %v453_v2, %s703_s9 }
  0x45   :  { %446 = vrot.lane.b32.xlu1 %v445_v1, %s702_s8 }
  0x49   :  { %462 = vrot.lane.b32.xlu0 %v461_v3, %s704_s11 }
  0x4b   :  { %484 = vrot.lane.b32.xlu2 %v483_v7, %s706_s0 }
  0x4d   :  { %475 = vrot.lane.b32.xlu1 %v474_v6, %s705_s13 }
  0x51   :  { %492 = vrot.lane.b32.xlu0 %v491_v8, %s707_s16 }
  0x53   :  { %508 = vrot.lane.b32.xlu2 %v507_v10, %s709_s19 }
  0x55   :  { %500 = vrot.lane.b32.xlu1 %v499_v9, %s708_s18 }
  0x59   :  { %516 = vrot.lane.b32.xlu0 %v515_v11, %s710_s22 }
  0x5b   :  { %532 = vrot.lane.b32.xlu2 %v531_v13, %s712_s25 }
  0x5d   :  { %524 = vrot.lane.b32.xlu1 %v523_v12, %s711_s24 }
  0x61   :  { %540 = vrot.lane.b32.xlu0 %v539_v14, %s713_s26 }
  0x6d   :  { %v310_v15 = vpop.permute.xlu2 %309  }
  0x75   :  { %v291_v22 = vpop.permute.xlu2 %290  }
  0x76   :  { %296 = vst.msk [vmem:[#allocation0 + $0x4e] sm:$0xc] %vm262_vm4, %v291_v22  }
  0x77   :  { %298 = vst.msk [vmem:[#allocation0] sm:$0x3] %vm297_vm11, %v291_v22  }
  0x78   :  { %300 = vst.msk [vmem:[#allocation0 + $0x46] sm:$0xc] %vm297_vm11, %v291_v22   ;;  %vm399_vm11 = vcmask 884288  }
  0x7d   :  { %v626_v23 = vld [vmem:[#allocation0 + $0x50] sm:$0xf]  ;;  %v353_v24 = vpop.permute.xlu2 %352  }
  0x7e   :  { %v630_v25 = vpack.c.b16 0, %v626_v23 }
  0x80   :  { %v631_v27 = vpack.c.b8 0, %v630_v25 }
  0x82   :  { %651 = vst [vmem:[%s791_s1 + $0xa] sm:$0x1] %v631_v27 }
  0x83   :  { %v217_v26 = vpop.permute.xlu0 %216  }
  0x84   :  { %220 = vst.msk [vmem:[#allocation0 + $0x10] sm:$0x3] %vm218_vm8, %v217_v26   ;;  %vm370_vm8 = vcmask 982688  }
  0x85   :  { %223 = vst.msk [vmem:[#allocation0 + $0x8] sm:$0x3] %vm221_vm12, %v217_v26   ;;  %v377_v29 = vpop.permute.xlu2 %376   ;;  %vm486_vm12 = vcmask 556288  }
  0x86   :  { %316 = vst.msk [vmem:[#allocation0 + $0x10] sm:$0x3] %vm314_vm13, %v310_v15   ;;  %vm416_vm13 = vcmask 818688  }
  0x87   :  { %v249_v28 = vpop.permute.xlu1 %248   ;;  %294 = vst.msk [vmem:[#allocation0 + $0x8] sm:$0x3] %vm262_vm4, %v291_v22   ;;  %vm408_vm4 = vcmask 851488  }
  0x88   :  { %252 = vst.msk [vmem:[#allocation0 + $0x30] sm:$0x3] %vm250_vm1, %v249_v28   ;;  %vm269_vm1 = vcmask 1048448  }
  0x89   :  { %255 = vst.msk [vmem:[#allocation0 + $0x28] sm:$0x3] %vm253_vm14, %v249_v28   ;;  %vm424_vm14 = vcmask 785888  }
  0x8b   :  { %v233_v30 = vpop.permute.xlu0 %232  }
  0x8c   :  { %236 = vst.msk [vmem:[#allocation0 + $0x20] sm:$0x3] %vm234_vm7, %v233_v30   ;;  %vm432_vm7 = vcmask 753088  }
  0x8d   :  { %239 = vst.msk [vmem:[#allocation0 + $0x18] sm:$0x3] %vm237_vm15, %v233_v30   ;;  %v407_v32 = vpop.permute.xlu2 %406   ;;  %vm510_vm15 = vcmask 457888  }
  0x8e   :  { %313 = vst.msk [vmem:[#allocation0 + $0x18] sm:$0x3] %vm246_vm3, %v310_v15   ;;  %vm354_vm3 = vcmask 1048288  }
  0x8f   :  { %v265_v31 = vpop.permute.xlu1 %264   ;;  %410 = vst.msk [vmem:[#allocation0 + $0x10] sm:$0x3] %vm408_vm4, %v407_v32   ;;  %vm534_vm4 = vcmask 359488  }
  0x90   :  { %268 = vst.msk [vmem:[#allocation0 + $0x40] sm:$0x3] %vm266_vm6, %v265_v31   ;;  %vm378_vm6 = vcmask 949888  }
  0x91   :  { %271 = vst.msk [vmem:[#allocation0 + $0x38] sm:$0x3] %vm269_vm1, %v265_v31   ;;  %vm440_vm1 = vcmask 720288  }
  0x92   :  { %356 = vst.msk [vmem:[#allocation0 + $0x40] sm:$0x3] %vm354_vm3, %v353_v24   ;;  %vm448_vm3 = vcmask 687488  }
  0x93   :  { %v326_v33 = vpop.permute.xlu0 %325  }
  0x94   :  { %329 = vst.msk [vmem:[#allocation0 + $0x28] sm:$0x3] %vm230_vm2, %v326_v33   ;;  %vm346_vm2 = vcmask 1048320  }
  0x95   :  { %332 = vst.msk [vmem:[#allocation0 + $0x20] sm:$0x3] %vm330_vm5, %v326_v33   ;;  %v431_v35 = vpop.permute.xlu2 %430   ;;  %vm464_vm5 = vcmask 621888  }
  0x96   :  { %380 = vst.msk [vmem:[#allocation0 + $0x28] sm:$0x3] %vm378_vm6, %v377_v29   ;;  %vm477_vm6 = vcmask 589088  }
  0x97   :  { %v342_v34 = vpop.permute.xlu1 %341   ;;  %434 = vst.msk [vmem:[#allocation0 + $0x40] sm:$0x3] %vm432_vm7, %v431_v35   ;;  %vm502_vm7 = vcmask 490688  }
  0x98   :  { %345 = vst.msk [vmem:[#allocation0 + $0x38] sm:$0x3] %vm214_vm0, %v342_v34   ;;  %vm362_vm0 = vcmask 1015488  }
  0x99   :  { %348 = vst.msk [vmem:[#allocation0 + $0x30] sm:$0x3] %vm346_vm2, %v342_v34   ;;  %vm494_vm2 = vcmask 523488  }
  0x9b   :  { %v361_v36 = vpop.permute.xlu0 %360  }
  0x9c   :  { %364 = vst.msk [vmem:[#allocation0 + $0x8] sm:$0x3] %vm362_vm0, %v361_v36   ;;  %vm518_vm0 = vcmask 425088  }
  0x9d   :  { %v455_v38 = vpop.permute.xlu2 %454  }
  0x9e   :  { %458 = vst.msk [vmem:[#allocation0 + $0x28] sm:$0x3] %vm456_vm9, %v455_v38   ;;  %vm542_vm9 = vcmask 326688  }
  0x9f   :  { %v369_v37 = vpop.permute.xlu1 %368  }
  0xa0   :  { %372 = vst.msk [vmem:[#allocation0 + $0x18] sm:$0x3] %vm370_vm8, %v369_v37   ;;  %vm526_vm8 = vcmask 392288  }
  0xa3   :  { %v385_v39 = vpop.permute.xlu0 %384  }
  0xa4   :  { %388 = vst.msk [vmem:[#allocation0 + $0x38] sm:$0x3] %vm386_vm10, %v385_v39  }
  0xa5   :  { %v485_v41 = vpop.permute.xlu2 %484  }
  0xa6   :  { %488 = vst.msk [vmem:[#allocation0 + $0x10] sm:$0x3] %vm486_vm12, %v485_v41  }
  0xa7   :  { %v398_v40 = vpop.permute.xlu1 %397  }
  0xa8   :  { %400 = vst.msk [vmem:[#allocation0] sm:$0x3] %vm399_vm11, %v398_v40  }
  0xa9   :  { %402 = vst.msk [vmem:[#allocation0 + $0x46] sm:$0xc] %vm399_vm11, %v398_v40  }
  0xab   :  { %v415_v42 = vpop.permute.xlu0 %414  }
  0xac   :  { %418 = vst.msk [vmem:[#allocation0 + $0x20] sm:$0x3] %vm416_vm13, %v415_v42  }
  0xad   :  { %v509_v44 = vpop.permute.xlu2 %508   ;;  %v562_v45 = vld [vmem:[#allocation0 + $0x10] sm:$0xf] }
  0xae   :  { %512 = vst.msk [vmem:[#allocation0 + $0x40] sm:$0x3] %vm510_vm15, %v509_v44   ;;  %v566_v46 = vpack.c.b16 0, %v562_v45 }
  0xaf   :  { %v423_v43 = vpop.permute.xlu1 %422  }
  0xb0   :  { %426 = vst.msk [vmem:[#allocation0 + $0x30] sm:$0x3] %vm424_vm14, %v423_v43   ;;  %v567_v48 = vpack.c.b8 0, %v566_v46 }
  0xb2   :  { %643 = vst [vmem:[%s791_s1 + $0x2] sm:$0x1] %v567_v48 }
  0xb3   :  { %v439_v47 = vpop.permute.xlu0 %438  }
  0xb4   :  { %442 = vst.msk [vmem:[#allocation0 + $0x8] sm:$0x3] %vm440_vm1, %v439_v47  }
  0xb5   :  { %v533_v50 = vpop.permute.xlu2 %532   ;;  %v610_v51 = vld [vmem:[#allocation0 + $0x40] sm:$0xf] }
  0xb6   :  { %v614_v52 = vpack.c.b16 0, %v610_v51  ;;  %536 = vst.msk [vmem:[#allocation0 + $0x28] sm:$0x3] %vm534_vm4, %v533_v50  }
  0xb7   :  { %v447_v49 = vpop.permute.xlu1 %446  }
  0xb8   :  { %450 = vst.msk [vmem:[#allocation0 + $0x18] sm:$0x3] %vm448_vm3, %v447_v49   ;;  %v615_v54 = vpack.c.b8 0, %v614_v52 }
  0xba   :  { %649 = vst [vmem:[%s791_s1 + $0x8] sm:$0x1] %v615_v54 }
  0xbb   :  { %v463_v53 = vpop.permute.xlu0 %462  }
  0xbc   :  { %466 = vst.msk [vmem:[#allocation0 + $0x38] sm:$0x3] %vm464_vm5, %v463_v53  }
  0xbd   :  { %v586_v56 = vld [vmem:[#allocation0 + $0x28] sm:$0xf] }
  0xbe   :  { %v590_v57 = vpack.c.b16 0, %v586_v56 }
  0xbf   :  { %v476_v55 = vpop.permute.xlu1 %475  }
  0xc0   :  { %478 = vst.msk [vmem:[#allocation0] sm:$0x3] %vm477_vm6, %v476_v55   ;;  %v591_v59 = vpack.c.b8 0, %v590_v57 }
  0xc1   :  { %480 = vst.msk [vmem:[#allocation0 + $0x46] sm:$0xc] %vm477_vm6, %v476_v55  }
  0xc2   :  { %646 = vst [vmem:[%s791_s1 + $0x5] sm:$0x1] %v591_v59 }
  0xc3   :  { %v493_v58 = vpop.permute.xlu0 %492  }
  0xc4   :  { %496 = vst.msk [vmem:[#allocation0 + $0x20] sm:$0x3] %vm494_vm2, %v493_v58  }
  0xc7   :  { %v547_v60 = vld [vmem:[#allocation0] sm:$0xf]  ;;  %v501_v61 = vpop.permute.xlu1 %500  }
  0xc8   :  { %v550_v62 = vpack.c.b16 0, %v547_v60  ;;  %v618_v63 = vld [vmem:[#allocation0 + $0x48] sm:$0xf]  ;;  %504 = vst.msk [vmem:[#allocation0 + $0x30] sm:$0x3] %vm502_vm7, %v501_v61  }
  0xc9   :  { %v622_v0 = vpack.c.b16 0, %v618_v63 }
  0xca   :  { %v551_v1 = vpack.c.b8 0, %v550_v62 }
  0xcb   :  { %v578_v2 = vld [vmem:[#allocation0 + $0x20] sm:$0xf]  ;;  %v623_v3 = vpack.c.b8 0, %v622_v0  ;;  %v517_v4 = vpop.permute.xlu0 %516  }
  0xcc   :  { %v582_v5 = vpack.c.b16 0, %v578_v2  ;;  %552 = vst [vmem:[%s791_s1] sm:$0x1] %v551_v1 }
  0xcd   :  { %650 = vst [vmem:[%s791_s1 + $0x9] sm:$0x1] %v623_v3 }
  0xce   :  { %v583_v6 = vpack.c.b8 0, %v582_v5  ;;  %520 = vst.msk [vmem:[#allocation0 + $0x8] sm:$0x3] %vm518_vm0, %v517_v4  }
  0xcf   :  { %v594_v7 = vld [vmem:[#allocation0 + $0x30] sm:$0xf]  ;;  %v525_v8 = vpop.permute.xlu1 %524  }
  0xd0   :  { %645 = vst [vmem:[%s791_s1 + $0x4] sm:$0x1] %v583_v6  ;;  %v598_v9 = vpack.c.b16 0, %v594_v7 }
  0xd1   :  { %528 = vst.msk [vmem:[#allocation0 + $0x18] sm:$0x3] %vm526_vm8, %v525_v8  }
  0xd2   :  { %v599_v10 = vpack.c.b8 0, %v598_v9 }
  0xd3   :  { %v541_v11 = vpop.permute.xlu0 %540  }
  0xd4   :  { %647 = vst [vmem:[%s791_s1 + $0x6] sm:$0x1] %v599_v10 }
  0xd5   :  { %v554_v12 = vld [vmem:[#allocation0 + $0x8] sm:$0xf]  ;;  %544 = vst.msk [vmem:[#allocation0 + $0x38] sm:$0x3] %vm542_vm9, %v541_v11  }
  0xd6   :  { %v558_v13 = vpack.c.b16 0, %v554_v12 }
  0xd8   :  { %v559_v14 = vpack.c.b8 0, %v558_v13  ;;  %v570_v15 = vld [vmem:[#allocation0 + $0x18] sm:$0xf] }
  0xd9   :  { %v574_v16 = vpack.c.b16 0, %v570_v15 }
  0xda   :  { %642 = vst [vmem:[%s791_s1 + $0x1] sm:$0x1] %v559_v14 }
  0xdb   :  { %v575_v17 = vpack.c.b8 0, %v574_v16 }
  0xdc   :  { %v602_v18 = vld [vmem:[#allocation0 + $0x38] sm:$0xf] }
  0xdd   :  { %v606_v19 = vpack.c.b16 0, %v602_v18  ;;  %644 = vst [vmem:[%s791_s1 + $0x3] sm:$0x1] %v575_v17 }
  0xdf   :  { %v607_v20 = vpack.c.b8 0, %v606_v19 }
  0xe1   :  { %648 = vst [vmem:[%s791_s1 + $0x7] sm:$0x1] %v607_v20 }

// kernel: rnd_net_forward.5
= control target key start
LH: loop header
LB: loop body
LE: loop exit
PB: predicated region body
PF: predicated region fallthrough
CT: control target
= control target key end

     0   :  { %vm79_vm0 = vcmask 1043456   ;;  %vm202_vm7 = vcmask 1040384   ;;  %vm206_vm8 = vcmask 1042434   ;;  %vm210_vm9 = vcmask 1041408   ;;  %s322_s0 = inlined_call_operand.vmem [shape: u8[2,1296], index: 0, kind: input, shape index: {}]   ;;  %s323_s2 = inlined_call_operand.vmem [shape: f32[1,1296], index: 2, kind: input, shape index: {}]   ;;  %s324_s1 = inlined_call_operand.vmem [shape: f32[1,1296], index: 1, kind: input, shape index: {}]   ;;  %s325_s3 = inlined_call_operand.vmem [shape: bf16[2,1296], index: 3, kind: output, shape index: {}]  }
   0x1   :  { %v34_v0 = vld [vmem:[%s323_s2] sm:$0xff]  ;;  %v35_v8 = vld [vmem:[%s323_s2 + $0x8] sm:$0x7]  ;;  %vm212_vm10 = vcmask 1044484   ;;  %vm216_vm11 = vcmask 1046534   ;;  %vm233_vm12 = vcmask 1041409  }
   0x2   :  { %v36_v1 = vadd.f32 1e-08, %v34_v0  ;;  %v14_v2 = vld [vmem:[%s322_s0] sm:$0xff]  ;;  %v15_v10 = vld [vmem:[%s322_s0 + $0x8] sm:$0x7]  ;;  %vm220_vm13 = vcmask 1045508   ;;  %vm234_vm14 = vmor %vm233_vm12, %vm202_vm7 }
   0x3   :  { %v58_v3 = vld [vmem:[%s324_s1] sm:$0xff]  ;;  %v16_v4 = vunpack.c.0.s8 %v14_v2  ;;  %v17_v5 = vunpack.c.1.s8 %v14_v2  ;;  %v18_v9 = vunpack.c.2.s8 %v14_v2  ;;  %v19_v13 = vunpack.c.3.s8 %v14_v2  ;;  %v59_v41 = vld [vmem:[%s324_s1 + $0x8] sm:$0x7] }
   0x4   :  { %248 = vrsqrt.f32 %v36_v1  ;;  %v63_v6 = vperm.slane %v58_v3, 1  ;;  %v65_v7 = vperm.slane %v58_v3, 3  ;;  %v62_v11 = vperm.slane %v58_v3, 0 }
   0x5   :  { %v67_v12 = vperm.slane %v58_v3, 5  ;;  %v22_v15 = vand.u32 255, %v16_v4  ;;  %v23_v16 = vand.u32 255, %v17_v5  ;;  %v69_v17 = vperm.slane %v58_v3, 7 }
   0x6   :  { %v287_v18 = vadd.f32 1e-08, %v35_v8  ;;  %v74_v20 = vrot.slane %v63_v6, 4  ;;  %v64_v21 = vperm.slane %v58_v3, 2  ;;  %v75_v22 = vrot.slane %v65_v7, 4 }
   0x7   :  { %v20_v23 = vunpack.c.0.s8 %v15_v10  ;;  %vm44_vm1 = vweird.f32 %v36_v1  ;;  %v24_v24 = vand.u32 255, %v18_v9  ;;  %v66_v26 = vperm.slane %v58_v3, 4 }
   0x8   :  { %250 = vrsqrt.f32 %v287_v18  ;;  %v76_v27 = vrot.slane %v67_v12, 4  ;;  %v25_v28 = vand.u32 255, %v19_v13  ;;  %v28_v29 = vcvt.s32.f32 %v22_v15 }
   0x9   :  { %v29_v30 = vcvt.s32.f32 %v23_v16  ;;  %v68_v31 = vperm.slane %v58_v3, 6  ;;  %v77_v32 = vrot.slane %v69_v17, 4  ;;  %v80_v34 = vsel %vm79_vm0, %v62_v11, %v74_v20 }
   0xa   :  { %v249_v14 = vpop.eup %248  ;;  %v81_v35 = vsel %vm79_vm0, %v64_v21, %v75_v22  ;;  %v21_v36 = vunpack.c.1.s8 %v15_v10  ;;  %v30_v37 = vcvt.s32.f32 %v24_v24  ;;  %v82_v39 = vsel %vm79_vm0, %v66_v26, %v76_v27 }
   0xb   :  { %v39_v19 = vmul.f32 %v249_v14, %v36_v1  ;;  %vm45_vm2 = vweird.f32 %v249_v14  ;;  %v31_v40 = vcvt.s32.f32 %v25_v28  ;;  %v90_v43 = vsub.f32 %v28_v29, %v80_v34 }
   0xc   :  { %vm46_vm3 = vmor %vm44_vm1, %vm45_vm2  ;;  %v91_v44 = vsub.f32 %v29_v30, %v81_v35  ;;  %v83_v45 = vsel %vm79_vm0, %v68_v31, %v77_v32  ;;  %v26_v47 = vand.u32 255, %v20_v23  ;;  %v70_v49 = vperm.slane %v59_v41, 0 }
   0xd   :  { %v40_v25 = vmul.f32 %v249_v14, %v39_v19  ;;  %v92_v50 = vsub.f32 %v30_v37, %v82_v39  ;;  %vm54_vm4 = vweird.f32 %v287_v18  ;;  %v71_v51 = vperm.slane %v59_v41, 1 }
   0xe   :  { %v251_v42 = vpop.eup %250  ;;  %v27_v52 = vand.u32 255, %v21_v36  ;;  %v93_v54 = vsub.f32 %v31_v40, %v83_v45  ;;  %v72_v56 = vperm.slane %v59_v41, 2  ;;  %v32_v17 = vcvt.s32.f32 %v26_v47 }
   0xf   :  { %v41_v33 = vmul.f32 0.5, %v40_v25  ;;  %v49_v48 = vmul.f32 %v251_v42, %v287_v18  ;;  %vm55_vm5 = vweird.f32 %v251_v42  ;;  %v78_v6 = vrot.slane %v71_v51, 4 }
  0x10   :  { %v33_v7 = vcvt.s32.f32 %v27_v52  ;;  %vm56_vm6 = vmor %vm54_vm4, %vm55_vm5  ;;  %vm235_vm15 = vcmask 124930  }
  0x11   :  { %v42_v38 = vsub.f32 1.5, %v41_v33  ;;  %v50_v55 = vmul.f32 %v251_v42, %v49_v48  ;;  %v84_v22 = vsel %vm79_vm0, %v70_v49, %v78_v6  ;;  %vm236_vm1 = vmor %vm235_vm15, %vm234_vm14 }
  0x12   :  { %v95_v23 = vsub.f32 %v33_v7, %v72_v56  ;;  %v94_v30 = vsub.f32 %v32_v17, %v84_v22 }
  0x13   :  { %v43_v46 = vmul.f32 %v249_v14, %v42_v38  ;;  %v51_v3 = vmul.f32 0.5, %v50_v55 }
  0x15   :  { %v47_v53 = vsel %vm46_vm3, %v249_v14, %v43_v46  ;;  %v52_v10 = vsub.f32 1.5, %v51_v3 }
  0x16   :  { %v98_v57 = vperm.slane %v47_v53, 0  ;;  %v99_v58 = vperm.slane %v47_v53, 1  ;;  %v100_v59 = vperm.slane %v47_v53, 2  ;;  %v101_v60 = vperm.slane %v47_v53, 3 }
  0x17   :  { %v102_v61 = vperm.slane %v47_v53, 4  ;;  %v103_v62 = vperm.slane %v47_v53, 5  ;;  %v104_v63 = vperm.slane %v47_v53, 6  ;;  %v105_v0 = vperm.slane %v47_v53, 7 }
  0x18   :  { %v110_v1 = vrot.slane %v99_v58, 4  ;;  %v111_v2 = vrot.slane %v101_v60, 4  ;;  %v53_v19 = vmul.f32 %v251_v42, %v52_v10 }
  0x19   :  { %v112_v4 = vrot.slane %v103_v62, 4  ;;  %v113_v5 = vrot.slane %v105_v0, 4 }
  0x1a   :  { %v115_v8 = vsel %vm79_vm0, %v98_v57, %v110_v1  ;;  %v116_v9 = vsel %vm79_vm0, %v100_v59, %v111_v2  ;;  %v57_v26 = vsel %vm56_vm6, %v251_v42, %v53_v19 }
  0x1b   :  { %v125_v11 = vmul.f32 %v115_v8, %v90_v43  ;;  %v126_v12 = vmul.f32 %v116_v9, %v91_v44  ;;  %v117_v13 = vsel %vm79_vm0, %v102_v61, %v112_v4  ;;  %v118_v14 = vsel %vm79_vm0, %v104_v63, %v113_v5 }
  0x1c   :  { %v127_v15 = vmul.f32 %v117_v13, %v92_v50  ;;  %v128_v16 = vmul.f32 %v118_v14, %v93_v54  ;;  %v106_v27 = vperm.slane %v57_v26, 0  ;;  %v107_v28 = vperm.slane %v57_v26, 1 }
  0x1d   :  { %v242_v20 = vclamps-f32 %v125_v11, 5.0  ;;  %v243_v21 = vclamps-f32 %v126_v12, 5.0  ;;  %v108_v29 = vperm.slane %v57_v26, 2 }
  0x1e   :  { %v244_v24 = vclamps-f32 %v127_v15, 5.0  ;;  %v245_v25 = vclamps-f32 %v128_v16, 5.0  ;;  %v114_v18 = vrot.slane %v107_v28, 4 }
  0x1f   :  { %149 = vst [vmem:[#allocation1] ss:$2 sm:$0xff] %v242_v20  ;;  %v130_v31 = vmul.f32 %v108_v29, %v95_v23 }
  0x20   :  { %151 = vst [vmem:[#allocation1 + $0x10] ss:$2 sm:$0xff] %v243_v21  ;;  %v119_v32 = vsel %vm79_vm0, %v106_v27, %v114_v18 }
  0x21   :  { %153 = vst [vmem:[#allocation1 + $0x20] ss:$2 sm:$0xff] %v244_v24  ;;  %v129_v33 = vmul.f32 %v119_v32, %v94_v30  ;;  %v247_v34 = vclamps-f32 %v130_v31, 5.0 }
  0x22   :  { %155 = vst [vmem:[#allocation1 + $0x30] ss:$2 sm:$0xff] %v245_v25 }
  0x23   :  { %v246_v35 = vclamps-f32 %v129_v33, 5.0 }
  0x26   :  { %v156_v36 = vld.sshfl [vmem:[#allocation1] sm:$0xff pattern:$0x75316420]  ;;  %v157_v37 = vld.sshfl [vmem:[#allocation1 + $0x8] sm:$0xff pattern:$0x75316420] }
  0x27   :  { %v158_v38 = vld.sshfl [vmem:[#allocation1 + $0x10] sm:$0xff pattern:$0x75316420]  ;;  %164 = vst [vmem:[#allocation1] ss:$2 sm:$0xff] %v246_v35  ;;  %v180_v39 = vpack.c.bf16 %v157_v37, %v156_v36 }
  0x28   :  { %v159_v40 = vld.sshfl [vmem:[#allocation1 + $0x18] sm:$0xff pattern:$0x75316420]  ;;  %v160_v42 = vld.sshfl [vmem:[#allocation1 + $0x20] sm:$0xff pattern:$0x75316420] }
  0x29   :  { %165 = vst [vmem:[#allocation1 + $0x10] ss:$2 sm:$0xff] %v247_v34  ;;  %v181_v41 = vpack.c.bf16 %v159_v40, %v158_v38  ;;  %v192_v43 = vrot.slane %v180_v39, 3  ;;  %v161_v44 = vld.sshfl [vmem:[#allocation1 + $0x28] sm:$0xff pattern:$0x75316420] }
  0x2a   :  { %v162_v47 = vld.sshfl [vmem:[#allocation1 + $0x30] sm:$0xff pattern:$0x75316420]  ;;  %v182_v48 = vpack.c.bf16 %v161_v44, %v160_v42  ;;  %v163_v49 = vld.sshfl [vmem:[#allocation1 + $0x38] sm:$0xff pattern:$0x75316420] }
  0x2b   :  { %v193_v45 = vrot.slane %v181_v41, 6  ;;  %v194_v46 = vrot.slane %v181_v41, 1  ;;  %v205_v50 = vsel %vm202_vm7, %v180_v39, %v192_v43  ;;  %v183_v51 = vpack.c.bf16 %v163_v49, %v162_v47 }
  0x2c   :  { %v195_v52 = vrot.slane %v182_v48, 4  ;;  %v196_v53 = vrot.slane %v182_v48, 7 }
  0x2d   :  { %v209_v54 = vsel %vm206_vm8, %v193_v45, %v194_v46  ;;  %v197_v55 = vrot.slane %v183_v51, 2  ;;  %v198_v56 = vrot.slane %v183_v51, 5 }
  0x2e   :  { %v215_v57 = vsel %vm212_vm10, %v195_v52, %v196_v53  ;;  %v166_v58 = vld.sshfl [vmem:[#allocation1] sm:$0xff pattern:$0x75316420]  ;;  %v211_v59 = vsel %vm210_vm9, %v205_v50, %v209_v54  ;;  %v167_v60 = vld.sshfl [vmem:[#allocation1 + $0x8] sm:$0xff pattern:$0x75316420] }
  0x2f   :  { %v219_v62 = vsel %vm216_vm11, %v197_v55, %v198_v56  ;;  %v184_v63 = vpack.c.bf16 %v167_v60, %v166_v58 }
  0x30   :  { %v168_v61 = vld.sshfl [vmem:[#allocation1 + $0x10] sm:$0xff pattern:$0x75316420]  ;;  %v221_v1 = vsel %vm220_vm13, %v215_v57, %v219_v62 }
  0x31   :  { %v185_v0 = vpack.c.bf16 %v168_v61, %v168_v61  ;;  %v222_v2 = vsel %vm79_vm0, %v211_v59, %v221_v1  ;;  %v199_v3 = vrot.slane %v184_v63, 3 }
  0x32   :  { %232 = vst [vmem:[%s325_s3] sm:$0xff] %v222_v2 }
  0x33   :  { %v200_v4 = vrot.slane %v185_v0, 6  ;;  %v201_v5 = vrot.slane %v185_v0, 1  ;;  %v225_v6 = vsel %vm202_vm7, %v184_v63, %v199_v3 }
  0x35   :  { %v228_v7 = vsel %vm206_vm8, %v200_v4, %v201_v5 }
  0x36   :  { %v229_v8 = vsel %vm210_vm9, %v225_v6, %v228_v7 }
  0x37   :  { %237 = vst.msk [vmem:[%s325_s3 + $0x8] sm:$0x7] %vm236_vm1, %v229_v8 }

// kernel: rnd_net_forward.6
= control target key start
LH: loop header
LB: loop body
LE: loop exit
PB: predicated region body
PF: predicated region fallthrough
CT: control target
= control target key end

     0   :  { %s474_s12 = smov 0   ;;  %s531_s0 = inlined_call_operand.vmem [shape: bf16[128,64], index: 0, kind: input, shape index: {}]   ;;  %s532_s1 = inlined_call_operand.vmem [shape: bf16[64,64], index: 1, kind: input, shape index: {}]   ;;  %s533_s2 = inlined_call_operand.vmem [shape: f32[1,64], index: 2, kind: input, shape index: {}]   ;;  %s534_s3 = inlined_call_operand.vmem [shape: bf16[128,64], index: 3, kind: output, shape index: {}]  }
   0x1 LB: > { %s370_s13 = sadd.s32 4294967295, %s452_s12   ;;  %p374_p0 = scmp.ge.s32.totalorder %s452_s12, 1  ;;  %s452_s12 = sphi %s474_s12, %s13_s12  }
   0x2   : > { %p138_p1 = scmp.lt.s32.totalorder %s452_s12, 3 }
   0x4   : > { %p139_p2 = pnand %p374_p0, %p138_p1 }
   0x5   : > { %s375_s16 = sshll.u32 (!%p139_p2), %s370_s13, 3 }
   0x6   : > { %142 = sbr.rel (%p139_p2) target bundleno = 178 (0xb2), region = 32  ;;  %p163_p3 = scmp.lt.s32.totalorder (!%p139_p2), %s375_s16, 15 }
   0xb   : > { %v424_v0 = vld [vmem:[%s532_s1 + $0x18] sm:$0xff]  ;;  %v423_v1 = vld [vmem:[%s532_s1 + $0x10] sm:$0xff]  ;;  %s536_s16 = smov (!%p163_p3, %s375_s16), 15  ;;  %v422_v2 = vld [vmem:[%s532_s1 + $0x8] sm:$0xff]  ;;  %vm239_vm0 = vcmask 523264   ;;  %vm305_vm1 = vcmask 519168  }
   0xc   : > { %256 = vmatpush.bf16.msra.mxu0 %v424_v0  ;;  %425 = vmatpush.bf16.msra.mxu1 %v424_v0  ;;  %s376_s21 = sshll.u32 %s536_s16, 2  ;;  %v421_v3 = vld [vmem:[%s532_s1] sm:$0xff] }
   0xd   : > { %426 = vmatpush.bf16.msra.mxu2 %v424_v0  ;;  %427 = vmatpush.bf16.msra.mxu3 %v424_v0  ;;  %s166_s26 = scalar_lea.vmem %s531_s0, %s376_s21  ;;  %v445_v8 = vld [vmem:[%s533_s2] ss:$0 sm:$0xff]  ;;  %s510_s4 = scalar_lea.vmem %s534_s3, %s376_s21 }
   0xe   : > { %v417_v4 = vld [vmem:[%s166_s26] sm:$0xff]  ;;  %v418_v5 = vld [vmem:[%s166_s26 + $0x8] sm:$0xff]  ;;  %v419_v6 = vld [vmem:[%s166_s26 + $0x10] sm:$0xff] }
   0xf   : > { %v420_v7 = vld [vmem:[%s166_s26 + $0x18] sm:$0xff] }
  0x10   : > { %257 = vmatpush.bf16.msra.mxu0 %v423_v1  ;;  %428 = vmatpush.bf16.msra.mxu1 %v423_v1 }
  0x11   : > { %429 = vmatpush.bf16.msra.mxu2 %v423_v1  ;;  %430 = vmatpush.bf16.msra.mxu3 %v423_v1 }
  0x14   : > { %258 = vmatpush.bf16.msra.mxu0 %v422_v2  ;;  %431 = vmatpush.bf16.msra.mxu1 %v422_v2 }
  0x15   : > { %432 = vmatpush.bf16.msra.mxu2 %v422_v2  ;;  %433 = vmatpush.bf16.msra.mxu3 %v422_v2 }
  0x18   : > { %259 = vmatpush.bf16.msra.mxu0 %v421_v3  ;;  %434 = vmatpush.bf16.msra.mxu1 %v421_v3 }
  0x19   : > { %435 = vmatpush.bf16.msra.mxu2 %v421_v3  ;;  %436 = vmatpush.bf16.msra.mxu3 %v421_v3 }
  0x1b   : > { %411 = vmatmul.msk.bf16.vlgmr.msra.gmra.mxu0 %vm239_vm0, %v417_v4  ;;  %412 = vmatmul.msk.bf16.vlgmr.msra.gmra.mxu1 %vm239_vm0, %v418_v5 }
  0x1c   : > { %413 = vmatmul.msk.bf16.vlgmr.msra.gmra.mxu2 %vm239_vm0, %v419_v6  ;;  %414 = vmatmul.msk.bf16.vlgmr.msra.gmra.mxu3 %vm239_vm0, %v420_v7 }
  0x98   : > { %v261_v9 = vpop.f32.mrf.mxu0  ;;  %v266_v10 = vpop.f32.mrf.mxu1 }
  0x99   : > { %v262_v11 = vadd.f32 %v445_v8, %v261_v9  ;;  %v267_v12 = vadd.f32 %v445_v8, %v266_v10 }
  0x9b   : > { %v281_v13 = vmul.f32 0.01, %v262_v11  ;;  %v283_v14 = vmul.f32 0.01, %v267_v12 }
  0x9d   : > { %v289_v15 = vmax.f32 %v262_v11, %v281_v13  ;;  %v291_v16 = vmax.f32 %v267_v12, %v283_v14 }
  0x9f   : > { %v297_v17 = vpack.c.bf16 %v289_v15, %v289_v15  ;;  %v299_v18 = vpack.c.bf16 %v291_v16, %v291_v16  ;;  %v271_v19 = vpop.f32.mrf.mxu2  ;;  %v276_v20 = vpop.f32.mrf.mxu3 }
  0xa0   : > { %v272_v21 = vadd.f32 %v445_v8, %v271_v19  ;;  %v277_v22 = vadd.f32 %v445_v8, %v276_v20  ;;  %v263_v23 = vpop.f32.mrf.mxu0  ;;  %v268_v24 = vpop.f32.mrf.mxu1 }
  0xa1   : > { %306 = vst.msk [vmem:[%s510_s4] sm:$0xf] %vm305_vm1, %v297_v17  ;;  %v264_v25 = vadd.f32 %v445_v8, %v263_v23  ;;  %v269_v26 = vadd.f32 %v445_v8, %v268_v24 }
  0xa2   : > { %308 = vst.msk [vmem:[%s510_s4 + $0x8] sm:$0xf] %vm305_vm1, %v299_v18  ;;  %v285_v27 = vmul.f32 0.01, %v272_v21  ;;  %v287_v28 = vmul.f32 0.01, %v277_v22 }
  0xa3   : > { %v282_v29 = vmul.f32 0.01, %v264_v25  ;;  %v284_v30 = vmul.f32 0.01, %v269_v26 }
  0xa4   : > { %v293_v31 = vmax.f32 %v272_v21, %v285_v27  ;;  %v295_v32 = vmax.f32 %v277_v22, %v287_v28 }
  0xa5   : > { %v290_v33 = vmax.f32 %v264_v25, %v282_v29  ;;  %v292_v34 = vmax.f32 %v269_v26, %v284_v30 }
  0xa6   : > { %v301_v35 = vpack.c.bf16 %v293_v31, %v293_v31  ;;  %v303_v36 = vpack.c.bf16 %v295_v32, %v295_v32 }
  0xa7   : > { %v298_v37 = vpack.c.bf16 %v290_v33, %v290_v33  ;;  %v300_v38 = vpack.c.bf16 %v292_v34, %v292_v34  ;;  %v273_v39 = vpop.f32.mrf.mxu2  ;;  %v278_v40 = vpop.f32.mrf.mxu3 }
  0xa8   : > { %310 = vst.msk [vmem:[%s510_s4 + $0x10] sm:$0xf] %vm305_vm1, %v301_v35  ;;  %v274_v41 = vadd.f32 %v445_v8, %v273_v39  ;;  %v279_v42 = vadd.f32 %v445_v8, %v278_v40 }
  0xa9   : > { %312 = vst.msk [vmem:[%s510_s4 + $0x18] sm:$0xf] %vm305_vm1, %v303_v36 }
  0xaa   : > { %307 = vst.msk [vmem:[%s510_s4 + $0x4] sm:$0xf] %vm305_vm1, %v298_v37  ;;  %v286_v43 = vmul.f32 0.01, %v274_v41  ;;  %v288_v44 = vmul.f32 0.01, %v279_v42 }
  0xab   : > { %309 = vst.msk [vmem:[%s510_s4 + $0xc] sm:$0xf] %vm305_vm1, %v300_v38 }
  0xac   : > { %v294_v45 = vmax.f32 %v274_v41, %v286_v43  ;;  %v296_v46 = vmax.f32 %v279_v42, %v288_v44 }
  0xae   : > { %v302_v47 = vpack.c.bf16 %v294_v45, %v294_v45  ;;  %v304_v48 = vpack.c.bf16 %v296_v46, %v296_v46 }
  0xb0   : > { %311 = vst.msk [vmem:[%s510_s4 + $0x14] sm:$0xf] %vm305_vm1, %v302_v47 }
  0xb1   : > { %313 = vst.msk [vmem:[%s510_s4 + $0x1c] sm:$0xf] %vm305_vm1, %v304_v48 }
  0xb2 PF: > { %s13_s12 = sadd.s32 1, %s452_s12  }
  0xb3   : > { %p10_p4 = scmp.ge.s32.totalorder %s13_s12, 4  }
  0xb5   :  { %12 = sbr.rel (!%p10_p4) target bundleno = 1 (0x1), region = 62 }

// kernel: rnd_net_forward.7
= control target key start
LH: loop header
LB: loop body
LE: loop exit
PB: predicated region body
PF: predicated region fallthrough
CT: control target
= control target key end

     0   :  { %vm768_vm0 = vcmask 523264   ;;  %s1454_s2 = inlined_call_operand.vmem [shape: bf16[512,64], index: 2, kind: input, shape index: {}]   ;;  %s1455_s0 = inlined_call_operand.vmem [shape: bf16[18,512], index: 0, kind: input, shape index: {}]   ;;  %s1456_s3 = inlined_call_operand.vmem [shape: bf16[512,64], index: 3, kind: input, shape index: {}]   ;;  %s1457_s1 = inlined_call_operand.vmem [shape: bf16[18,512], index: 1, kind: input, shape index: {}]   ;;  %s1458_s4 = inlined_call_operand.vmem [shape: f32[1,128], index: 4, kind: input, shape index: {}]   ;;  %s1459_s5 = inlined_call_operand.vmem [shape: bf16[18,128], index: 5, kind: output, shape index: {}]  }
   0x1   :  { %v1098_v0 = vld [vmem:[%s1454_s2 + $0x38] sm:$0xff]  ;;  %v1097_v4 = vld [vmem:[%s1454_s2 + $0x30] sm:$0xff]  ;;  %v1096_v8 = vld [vmem:[%s1454_s2 + $0x28] sm:$0xff] }
   0x2   :  { %v1106_v1 = vld [vmem:[%s1454_s2 + $0x78] sm:$0xff]  ;;  %322 = vmatpush.bf16.msra.mxu0 %v1098_v0  ;;  %v1105_v5 = vld [vmem:[%s1454_s2 + $0x70] sm:$0xff]  ;;  %v1104_v9 = vld [vmem:[%s1454_s2 + $0x68] sm:$0xff] }
   0x3   :  { %v1114_v2 = vld [vmem:[%s1454_s2 + $0xb8] sm:$0xff]  ;;  %340 = vmatpush.bf16.msra.mxu1 %v1106_v1  ;;  %v1113_v6 = vld [vmem:[%s1454_s2 + $0xb0] sm:$0xff]  ;;  %v1112_v10 = vld [vmem:[%s1454_s2 + $0xa8] sm:$0xff] }
   0x4   :  { %v1122_v3 = vld [vmem:[%s1454_s2 + $0xf8] sm:$0xff]  ;;  %358 = vmatpush.bf16.msra.mxu2 %v1114_v2  ;;  %v1121_v7 = vld [vmem:[%s1454_s2 + $0xf0] sm:$0xff]  ;;  %v1120_v11 = vld [vmem:[%s1454_s2 + $0xe8] sm:$0xff] }
   0x5   :  { %376 = vmatpush.bf16.msra.mxu3 %v1122_v3  ;;  %v1095_v12 = vld [vmem:[%s1454_s2 + $0x20] sm:$0xff]  ;;  %v1094_v16 = vld [vmem:[%s1454_s2 + $0x18] sm:$0xff]  ;;  %v1093_v20 = vld [vmem:[%s1454_s2 + $0x10] sm:$0xff] }
   0x6   :  { %323 = vmatpush.bf16.msra.mxu0 %v1097_v4  ;;  %v1103_v13 = vld [vmem:[%s1454_s2 + $0x60] sm:$0xff]  ;;  %v1102_v17 = vld [vmem:[%s1454_s2 + $0x58] sm:$0xff]  ;;  %v1101_v21 = vld [vmem:[%s1454_s2 + $0x50] sm:$0xff] }
   0x7   :  { %341 = vmatpush.bf16.msra.mxu1 %v1105_v5  ;;  %v1111_v14 = vld [vmem:[%s1454_s2 + $0xa0] sm:$0xff]  ;;  %v1110_v18 = vld [vmem:[%s1454_s2 + $0x98] sm:$0xff]  ;;  %v1109_v22 = vld [vmem:[%s1454_s2 + $0x90] sm:$0xff] }
   0x8   :  { %359 = vmatpush.bf16.msra.mxu2 %v1113_v6  ;;  %v1119_v15 = vld [vmem:[%s1454_s2 + $0xe0] sm:$0xff]  ;;  %v1118_v19 = vld [vmem:[%s1454_s2 + $0xd8] sm:$0xff]  ;;  %v1117_v23 = vld [vmem:[%s1454_s2 + $0xd0] sm:$0xff] }
   0x9   :  { %377 = vmatpush.bf16.msra.mxu3 %v1121_v7  ;;  %v1092_v24 = vld [vmem:[%s1454_s2 + $0x8] sm:$0xff]  ;;  %v1091_v28 = vld [vmem:[%s1454_s2] sm:$0xff]  ;;  %v1085_v33 = vld [vmem:[%s1455_s0 + $0xc] sm:$0xf0] }
   0xa   :  { %324 = vmatpush.bf16.msra.mxu0 %v1096_v8  ;;  %v1100_v25 = vld [vmem:[%s1454_s2 + $0x48] sm:$0xff]  ;;  %v1099_v29 = vld [vmem:[%s1454_s2 + $0x40] sm:$0xff]  ;;  %v799_v35 = vld [vmem:[%s1455_s0 + $0x10] sm:$0xf0] }
   0xb   :  { %342 = vmatpush.bf16.msra.mxu1 %v1104_v9  ;;  %v1108_v26 = vld [vmem:[%s1454_s2 + $0x88] sm:$0xff]  ;;  %v1107_v30 = vld [vmem:[%s1454_s2 + $0x80] sm:$0xff]  ;;  %v1086_v37 = vld [vmem:[%s1455_s0 + $0x14] sm:$0xf0] }
   0xc   :  { %360 = vmatpush.bf16.msra.mxu2 %v1112_v10  ;;  %v1116_v27 = vld [vmem:[%s1454_s2 + $0xc8] sm:$0xff]  ;;  %v1115_v31 = vld [vmem:[%s1454_s2 + $0xc0] sm:$0xff]  ;;  %v807_v39 = vld [vmem:[%s1455_s0 + $0x18] sm:$0xf0] }
   0xd   :  { %378 = vmatpush.bf16.msra.mxu3 %v1120_v11  ;;  %v797_v32 = vld [vmem:[%s1455_s0] sm:$0xf]  ;;  %v1083_v34 = vld [vmem:[%s1455_s0 + $0x4] sm:$0xf]  ;;  %v805_v36 = vld [vmem:[%s1455_s0 + $0x8] sm:$0xf] }
   0xe   :  { %325 = vmatpush.bf16.msra.mxu0 %v1095_v12  ;;  %v1084_v38 = vld [vmem:[%s1455_s0 + $0xc] sm:$0xf]  ;;  %v1146_v40 = vld [vmem:[%s1456_s3 + $0xb8] sm:$0xff]  ;;  %v798_v42 = vor.u32 %v1085_v33, %v797_v32  ;;  %v802_v43 = vor.u32 %v1083_v34, %v799_v35  ;;  %v806_v44 = vor.u32 %v1086_v37, %v805_v36  ;;  %v1145_v48 = vld [vmem:[%s1456_s3 + $0xb0] sm:$0xff] }
   0xf   :  { %343 = vmatpush.bf16.msra.mxu1 %v1103_v13  ;;  %v1130_v41 = vld [vmem:[%s1456_s3 + $0x38] sm:$0xff]  ;;  %v810_v45 = vor.u32 %v1084_v38, %v807_v39  ;;  %v1129_v49 = vld [vmem:[%s1456_s3 + $0x30] sm:$0xff]  ;;  %v1144_v52 = vld [vmem:[%s1456_s3 + $0xa8] sm:$0xff] }
  0x10   :  { %361 = vmatpush.bf16.msra.mxu2 %v1111_v14  ;;  %v1138_v46 = vld [vmem:[%s1456_s3 + $0x78] sm:$0xff]  ;;  %v1137_v50 = vld [vmem:[%s1456_s3 + $0x70] sm:$0xff]  ;;  %v1128_v53 = vld [vmem:[%s1456_s3 + $0x28] sm:$0xff] }
  0x11   :  { %379 = vmatpush.bf16.msra.mxu3 %v1119_v15  ;;  %v1154_v47 = vld [vmem:[%s1456_s3 + $0xf8] sm:$0xff]  ;;  %v1153_v51 = vld [vmem:[%s1456_s3 + $0xf0] sm:$0xff]  ;;  %v24_v54 = vld [vmem:[%s1455_s0 + $0x20] sm:$0x11] }
  0x12   :  { %326 = vmatpush.bf16.msra.mxu0 %v1094_v16  ;;  %v1136_v55 = vld [vmem:[%s1456_s3 + $0x68] sm:$0xff]  ;;  %v1143_v58 = vld [vmem:[%s1456_s3 + $0xa0] sm:$0xff]  ;;  %v110_v60 = vunpack.c.l.b16 %v24_v54  ;;  %v111_v61 = vunpack.c.h.b16 %v24_v54  ;;  %v1142_v2 = vld [vmem:[%s1456_s3 + $0x98] sm:$0xff] }
  0x13   :  { %344 = vmatpush.bf16.msra.mxu1 %v1102_v17  ;;  %v1152_v56 = vld [vmem:[%s1456_s3 + $0xe8] sm:$0xff]  ;;  %v1127_v59 = vld [vmem:[%s1456_s3 + $0x20] sm:$0xff]  ;;  %v1126_v3 = vld [vmem:[%s1456_s3 + $0x18] sm:$0xff] }
  0x14   :  { %362 = vmatpush.bf16.msra.mxu2 %v1110_v18  ;;  %v25_v57 = vld [vmem:[%s1455_s0 + $0x28] sm:$0x11]  ;;  %v1135_v0 = vld [vmem:[%s1456_s3 + $0x60] sm:$0xff]  ;;  %v118_v4 = vpack.c.b16 %v110_v60, %v110_v60  ;;  %v119_v5 = vpack.c.b16 %v111_v61, %v111_v61  ;;  %v1134_v8 = vld [vmem:[%s1456_s3 + $0x58] sm:$0xff] }
  0x15   :  { %380 = vmatpush.bf16.msra.mxu3 %v1118_v19  ;;  %v112_v62 = vunpack.c.l.b16 %v25_v57  ;;  %v113_v63 = vunpack.c.h.b16 %v25_v57  ;;  %v1151_v1 = vld [vmem:[%s1456_s3 + $0xe0] sm:$0xff]  ;;  %v1150_v9 = vld [vmem:[%s1456_s3 + $0xd8] sm:$0xff]  ;;  %v1141_v10 = vld [vmem:[%s1456_s3 + $0x90] sm:$0xff] }
  0x16   :  { %327 = vmatpush.bf16.msra.mxu0 %v1093_v20  ;;  %v1125_v11 = vld [vmem:[%s1456_s3 + $0x10] sm:$0xff]  ;;  %v1140_v14 = vld [vmem:[%s1456_s3 + $0x88] sm:$0xff]  ;;  %v1139_v18 = vld [vmem:[%s1456_s3 + $0x80] sm:$0xff] }
  0x17   :  { %345 = vmatpush.bf16.msra.mxu1 %v1101_v21  ;;  %v120_v6 = vpack.c.b16 %v112_v62, %v112_v62  ;;  %v121_v7 = vpack.c.b16 %v113_v63, %v113_v63  ;;  %v1133_v12 = vld [vmem:[%s1456_s3 + $0x50] sm:$0xff]  ;;  %v1124_v15 = vld [vmem:[%s1456_s3 + $0x8] sm:$0xff]  ;;  %v1123_v19 = vld [vmem:[%s1456_s3] sm:$0xff] }
  0x18   :  { %363 = vmatpush.bf16.msra.mxu2 %v1109_v22  ;;  %v1149_v13 = vld [vmem:[%s1456_s3 + $0xd0] sm:$0xff]  ;;  %v1132_v16 = vld [vmem:[%s1456_s3 + $0x48] sm:$0xff]  ;;  %v1131_v20 = vld [vmem:[%s1456_s3 + $0x40] sm:$0xff] }
  0x19   :  { %381 = vmatpush.bf16.msra.mxu3 %v1117_v23  ;;  %v1148_v17 = vld [vmem:[%s1456_s3 + $0xc8] sm:$0xff]  ;;  %v1147_v21 = vld [vmem:[%s1456_s3 + $0xc0] sm:$0xff]  ;;  %v1089_v23 = vld [vmem:[%s1457_s1 + $0xc] sm:$0xf0] }
  0x1a   :  { %328 = vmatpush.bf16.msra.mxu0 %v1092_v24  ;;  %v941_v22 = vld [vmem:[%s1457_s1] sm:$0xf]  ;;  %v1087_v24 = vld [vmem:[%s1457_s1 + $0x4] sm:$0xf]  ;;  %v31_v35 = vld [vmem:[%s1457_s1 + $0x28] sm:$0x11] }
  0x1b   :  { %346 = vmatpush.bf16.msra.mxu1 %v1100_v25  ;;  %v943_v25 = vld [vmem:[%s1457_s1 + $0x10] sm:$0xf0]  ;;  %v30_v34 = vld [vmem:[%s1457_s1 + $0x20] sm:$0x11]  ;;  %v474_v38 = vunpack.c.l.b16 %v31_v35  ;;  %v475_v39 = vunpack.c.h.b16 %v31_v35 }
  0x1c   :  { %364 = vmatpush.bf16.msra.mxu2 %v1108_v26  ;;  %v949_v26 = vld [vmem:[%s1457_s1 + $0x8] sm:$0xf]  ;;  %v472_v36 = vunpack.c.l.b16 %v30_v34  ;;  %v473_v37 = vunpack.c.h.b16 %v30_v34 }
  0x1d   :  { %382 = vmatpush.bf16.msra.mxu3 %v1116_v27  ;;  %v1090_v27 = vld [vmem:[%s1457_s1 + $0x14] sm:$0xf0] }
  0x1e   :  { %329 = vmatpush.bf16.msra.mxu0 %v1091_v28  ;;  %v1088_v28 = vld [vmem:[%s1457_s1 + $0xc] sm:$0xf]  ;;  %v950_v32 = vor.u32 %v1090_v27, %v949_v26 }
  0x1f   :  { %347 = vmatpush.bf16.msra.mxu1 %v1099_v29  ;;  %v951_v29 = vld [vmem:[%s1457_s1 + $0x18] sm:$0xf0]  ;;  %s1162_s1 = smov 64  }
  0x20   :  { %365 = vmatpush.bf16.msra.mxu2 %v1107_v30  ;;  %v942_v30 = vor.u32 %v1089_v23, %v941_v22  ;;  %v954_v33 = vor.u32 %v1088_v28, %v951_v29 }
  0x21   :  { %383 = vmatpush.bf16.msra.mxu3 %v1115_v31  ;;  %330 = vmatmul.bf16.vlgmr.msra.gmra.mxu0 %v798_v42  ;;  %v946_v31 = vor.u32 %v1087_v24, %v943_v25  ;;  %v482_v42 = vpack.c.b16 %v474_v38, %v474_v38 }
  0x22   :  { %684 = vmatpush.bf16.msrb.mxu0 %v1130_v41  ;;  %348 = vmatmul.bf16.vlgmr.msra.gmra.mxu1 %v802_v43  ;;  %v481_v41 = vpack.c.b16 %v473_v37, %v473_v37  ;;  %v483_v43 = vpack.c.b16 %v475_v39, %v475_v39 }
  0x23   :  { %366 = vmatmul.bf16.vlgmr.msra.gmra.mxu2 %v806_v44  ;;  %702 = vmatpush.bf16.msrb.mxu1 %v1138_v46 }
  0x24   :  { %720 = vmatpush.bf16.msrb.mxu2 %v1146_v40  ;;  %384 = vmatmul.bf16.vlgmr.msra.gmra.mxu3 %v810_v45  ;;  %v480_v40 = vpack.c.b16 %v472_v36, %v472_v36 }
  0x25   :  { %738 = vmatpush.bf16.msrb.mxu3 %v1154_v47 }
  0x26   :  { %685 = vmatpush.bf16.msrb.mxu0 %v1129_v49 }
  0x27   :  { %703 = vmatpush.bf16.msrb.mxu1 %v1137_v50 }
  0x28   :  { %721 = vmatpush.bf16.msrb.mxu2 %v1145_v48 }
  0x29   :  { %739 = vmatpush.bf16.msrb.mxu3 %v1153_v51 }
  0x2a   :  { %686 = vmatpush.bf16.msrb.mxu0 %v1128_v53 }
  0x2b   :  { %704 = vmatpush.bf16.msrb.mxu1 %v1136_v55 }
  0x2c   :  { %722 = vmatpush.bf16.msrb.mxu2 %v1144_v52 }
  0x2d   :  { %740 = vmatpush.bf16.msrb.mxu3 %v1152_v56 }
  0x2e   :  { %687 = vmatpush.bf16.msrb.mxu0 %v1127_v59 }
  0x2f   :  { %705 = vmatpush.bf16.msrb.mxu1 %v1135_v0 }
  0x30   :  { %723 = vmatpush.bf16.msrb.mxu2 %v1143_v58 }
  0x31   :  { %741 = vmatpush.bf16.msrb.mxu3 %v1151_v1  ;;  %335 = vmatmul.bf16.gmra.mxu0 %v118_v4 }
  0x32   :  { %688 = vmatpush.bf16.msrb.mxu0 %v1126_v3  ;;  %353 = vmatmul.bf16.gmra.mxu1 %v119_v5 }
  0x33   :  { %371 = vmatmul.bf16.gmra.mxu2 %v120_v6  ;;  %706 = vmatpush.bf16.msrb.mxu1 %v1134_v8 }
  0x34   :  { %724 = vmatpush.bf16.msrb.mxu2 %v1142_v2  ;;  %389 = vmatmul.bf16.gmra.mxu3 %v121_v7 }
  0x35   :  { %742 = vmatpush.bf16.msrb.mxu3 %v1150_v9 }
  0x36   :  { %689 = vmatpush.bf16.msrb.mxu0 %v1125_v11 }
  0x37   :  { %707 = vmatpush.bf16.msrb.mxu1 %v1133_v12 }
  0x38   :  { %725 = vmatpush.bf16.msrb.mxu2 %v1141_v10 }
  0x39   :  { %743 = vmatpush.bf16.msrb.mxu3 %v1149_v13 }
  0x3a   :  { %690 = vmatpush.bf16.msrb.mxu0 %v1124_v15 }
  0x3b   :  { %708 = vmatpush.bf16.msrb.mxu1 %v1132_v16 }
  0x3c   :  { %726 = vmatpush.bf16.msrb.mxu2 %v1140_v14 }
  0x3d   :  { %744 = vmatpush.bf16.msrb.mxu3 %v1148_v17 }
  0x3e   :  { %691 = vmatpush.bf16.msrb.mxu0 %v1123_v19 }
  0x3f   :  { %709 = vmatpush.bf16.msrb.mxu1 %v1131_v20 }
  0x40   :  { %727 = vmatpush.bf16.msrb.mxu2 %v1139_v18 }
  0x41   :  { %745 = vmatpush.bf16.msrb.mxu3 %v1147_v21  ;;  %692 = vmatmul.bf16.vlgmr.msrb.gmra.mxu0 %v942_v30 }
  0x42   :  { %710 = vmatmul.bf16.vlgmr.msrb.gmra.mxu1 %v946_v31  ;;  %v1161_v31 = vld [vmem:[%s1458_s4] ss:$0 sm:$0xff] }
  0x43   :  { %728 = vmatmul.bf16.vlgmr.msrb.gmra.mxu2 %v950_v32 }
  0x44   :  { %746 = vmatmul.bf16.vlgmr.msrb.gmra.mxu3 %v954_v33 }
  0x51   :  { %697 = vmatmul.bf16.gmra.mxu0 %v480_v40 }
  0x52   :  { %715 = vmatmul.bf16.gmra.mxu1 %v481_v41 }
  0x53   :  { %733 = vmatmul.bf16.gmra.mxu2 %v482_v42 }
  0x54   :  { %751 = vmatmul.bf16.gmra.mxu3 %v483_v43 }
  0x9e   :  { %v331_v44 = vpop.f32.mrf.mxu0 }
  0x9f   :  { %v349_v45 = vpop.f32.mrf.mxu1 }
  0xa0   :  { %v350_v46 = vadd.f32 %v349_v45, %v331_v44 }
  0xa6   :  { %v367_v47 = vpop.f32.mrf.mxu2  ;;  %v333_v50 = vpop.f32.mrf.mxu0 }
  0xa7   :  { %v385_v48 = vpop.f32.mrf.mxu3  ;;  %v368_v49 = vadd.f32 %v367_v47, %v350_v46  ;;  %v351_v51 = vpop.f32.mrf.mxu1 }
  0xa8   :  { %v352_v52 = vadd.f32 %v351_v51, %v333_v50 }
  0xa9   :  { %v386_v53 = vadd.f32 %v385_v48, %v368_v49 }
  0xae   :  { %v369_v54 = vpop.f32.mrf.mxu2  ;;  %v336_v57 = vpop.f32.mrf.mxu0 }
  0xaf   :  { %v387_v55 = vpop.f32.mrf.mxu3  ;;  %v370_v56 = vadd.f32 %v369_v54, %v352_v52  ;;  %v354_v58 = vpop.f32.mrf.mxu1 }
  0xb0   :  { %v355_v59 = vadd.f32 %v354_v58, %v336_v57 }
  0xb1   :  { %v388_v60 = vadd.f32 %v387_v55, %v370_v56 }
  0xb6   :  { %v372_v61 = vpop.f32.mrf.mxu2  ;;  %v338_v0 = vpop.f32.mrf.mxu0 }
  0xb7   :  { %v390_v62 = vpop.f32.mrf.mxu3  ;;  %v373_v63 = vadd.f32 %v372_v61, %v355_v59  ;;  %v356_v1 = vpop.f32.mrf.mxu1 }
  0xb9   :  { %v391_v2 = vadd.f32 %v390_v62, %v373_v63 }
  0xbe   :  { %v374_v3 = vpop.f32.mrf.mxu2  ;;  %v693_v5 = vpop.f32.mrf.mxu0 }
  0xbf   :  { %v392_v4 = vpop.f32.mrf.mxu3  ;;  %v711_v6 = vpop.f32.mrf.mxu1 }
  0xc0   :  { %v712_v7 = vadd.f32 %v711_v6, %v693_v5 }
  0xc6   :  { %v729_v8 = vpop.f32.mrf.mxu2  ;;  %v695_v11 = vpop.f32.mrf.mxu0 }
  0xc7   :  { %v730_v9 = vadd.f32 %v729_v8, %v712_v7  ;;  %v747_v10 = vpop.f32.mrf.mxu3  ;;  %v713_v12 = vpop.f32.mrf.mxu1 }
  0xc8   :  { %v714_v14 = vadd.f32 %v713_v12, %v695_v11 }
  0xc9   :  { %v748_v13 = vadd.f32 %v747_v10, %v730_v9 }
  0xcb   :  { %759 = vrot.lane.b32.xlu0 %v748_v13, %s1162_s1 }
  0xce   :  { %v731_v15 = vpop.f32.mrf.mxu2  ;;  %v698_v18 = vpop.f32.mrf.mxu0 }
  0xcf   :  { %v732_v16 = vadd.f32 %v731_v15, %v714_v14  ;;  %v749_v17 = vpop.f32.mrf.mxu3  ;;  %v716_v19 = vpop.f32.mrf.mxu1 }
  0xd0   :  { %v717_v21 = vadd.f32 %v716_v19, %v698_v18 }
  0xd1   :  { %v750_v20 = vadd.f32 %v749_v17, %v732_v16 }
  0xd3   :  { %761 = vrot.lane.b32.xlu0 %v750_v20, %s1162_s1 }
  0xd6   :  { %v734_v22 = vpop.f32.mrf.mxu2  ;;  %v700_v25 = vpop.f32.mrf.mxu0 }
  0xd7   :  { %v735_v23 = vadd.f32 %v734_v22, %v717_v21  ;;  %v752_v24 = vpop.f32.mrf.mxu3  ;;  %v718_v26 = vpop.f32.mrf.mxu1 }
  0xd9   :  { %v753_v27 = vadd.f32 %v752_v24, %v735_v23 }
  0xdb   :  { %763 = vrot.lane.b32.xlu1 %v753_v27, %s1162_s1 }
  0xde   :  { %v736_v28 = vpop.f32.mrf.mxu2 }
  0xdf   :  { %v754_v29 = vpop.f32.mrf.mxu3 }
 0x13d   :  { %v760_v30 = vpop.permute.xlu0 %759 }
 0x13e   :  { %v769_v32 = vsel %vm768_vm0, %v386_v53, %v760_v30 }
 0x13f   :  { %v776_v33 = vadd.f32 %v1161_v31, %v769_v32 }
 0x141   :  { %v779_v36 = vmul.f32 0.01, %v776_v33 }
 0x143   :  { %v782_v39 = vmax.f32 %v776_v33, %v779_v36 }
 0x145   :  { %v762_v34 = vpop.permute.xlu0 %761 }
 0x146   :  { %v770_v35 = vsel %vm768_vm0, %v388_v60, %v762_v34 }
 0x147   :  { %v777_v37 = vadd.f32 %v1161_v31, %v770_v35 }
 0x149   :  { %v780_v38 = vmul.f32 0.01, %v777_v37 }
 0x14b   :  { %v783_v40 = vmax.f32 %v777_v37, %v780_v38 }
 0x14d   :  { %v1158_v41 = vpack.c.bf16 %v783_v40, %v782_v39  ;;  %v764_v42 = vpop.permute.xlu1 %763 }
 0x14e   :  { %v771_v43 = vsel %vm768_vm0, %v391_v2, %v764_v42 }
 0x14f   :  { %v778_v44 = vadd.f32 %v1161_v31, %v771_v43  ;;  %1159 = vst [vmem:[%s1459_s5] sm:$0xff] %v1158_v41  }
 0x151   :  { %v781_v45 = vmul.f32 0.01, %v778_v44 }
 0x153   :  { %v784_v46 = vmax.f32 %v778_v44, %v781_v45 }
 0x155   :  { %v787_v47 = vpack.c.bf16 %v784_v46, %v784_v46 }
 0x157   :  { %790 = vst [vmem:[%s1459_s5 + $0x8] sm:$0x1] %v787_v47 }

// kernel: rnd_net_forward.8
= control target key start
LH: loop header
LB: loop body
LE: loop exit
PB: predicated region body
PF: predicated region fallthrough
CT: control target
= control target key end

     0   :  { %vm322_vm0 = vcmask 523264   ;;  %s1403_s2 = inlined_call_operand.vmem [shape: bf16[576,64], index: 2, kind: input, shape index: {}]   ;;  %s1404_s0 = inlined_call_operand.vmem [shape: bf16[2,576], index: 0, kind: input, shape index: {}]   ;;  %s1405_s1 = inlined_call_operand.vmem [shape: bf16[2,576], index: 1, kind: input, shape index: {}]   ;;  %s1406_s3 = inlined_call_operand.vmem [shape: bf16[576,64], index: 3, kind: input, shape index: {}]   ;;  %s1407_s4 = inlined_call_operand.vmem [shape: f32[1,128], index: 4, kind: input, shape index: {}]   ;;  %s1408_s5 = inlined_call_operand.vmem [shape: bf16[2,128], index: 5, kind: output, shape index: {}]  }
   0x1   :  { %v1071_v0 = vld [vmem:[%s1403_s2 + $0x38] sm:$0xff]  ;;  %v1070_v4 = vld [vmem:[%s1403_s2 + $0x30] sm:$0xff]  ;;  %v1069_v8 = vld [vmem:[%s1403_s2 + $0x28] sm:$0xff] }
   0x2   :  { %v1079_v1 = vld [vmem:[%s1403_s2 + $0x78] sm:$0xff]  ;;  %325 = vmatpush.bf16.msra.mxu0 %v1071_v0  ;;  %v1078_v5 = vld [vmem:[%s1403_s2 + $0x70] sm:$0xff]  ;;  %v1077_v9 = vld [vmem:[%s1403_s2 + $0x68] sm:$0xff] }
   0x3   :  { %v1087_v2 = vld [vmem:[%s1403_s2 + $0xb8] sm:$0xff]  ;;  %338 = vmatpush.bf16.msra.mxu1 %v1079_v1  ;;  %v1086_v6 = vld [vmem:[%s1403_s2 + $0xb0] sm:$0xff]  ;;  %v1085_v10 = vld [vmem:[%s1403_s2 + $0xa8] sm:$0xff] }
   0x4   :  { %v1095_v3 = vld [vmem:[%s1403_s2 + $0xf8] sm:$0xff]  ;;  %351 = vmatpush.bf16.msra.mxu2 %v1087_v2  ;;  %v1094_v7 = vld [vmem:[%s1403_s2 + $0xf0] sm:$0xff]  ;;  %v1093_v11 = vld [vmem:[%s1403_s2 + $0xe8] sm:$0xff] }
   0x5   :  { %364 = vmatpush.bf16.msra.mxu3 %v1095_v3  ;;  %v1068_v12 = vld [vmem:[%s1403_s2 + $0x20] sm:$0xff]  ;;  %v1067_v17 = vld [vmem:[%s1403_s2 + $0x18] sm:$0xff]  ;;  %v1066_v21 = vld [vmem:[%s1403_s2 + $0x10] sm:$0xff] }
   0x6   :  { %326 = vmatpush.bf16.msra.mxu0 %v1070_v4  ;;  %v1076_v13 = vld [vmem:[%s1403_s2 + $0x60] sm:$0xff]  ;;  %v1075_v18 = vld [vmem:[%s1403_s2 + $0x58] sm:$0xff]  ;;  %v1074_v22 = vld [vmem:[%s1403_s2 + $0x50] sm:$0xff] }
   0x7   :  { %339 = vmatpush.bf16.msra.mxu1 %v1078_v5  ;;  %v1084_v14 = vld [vmem:[%s1403_s2 + $0xa0] sm:$0xff]  ;;  %v1083_v19 = vld [vmem:[%s1403_s2 + $0x98] sm:$0xff]  ;;  %v1082_v23 = vld [vmem:[%s1403_s2 + $0x90] sm:$0xff] }
   0x8   :  { %352 = vmatpush.bf16.msra.mxu2 %v1086_v6  ;;  %v1092_v15 = vld [vmem:[%s1403_s2 + $0xe0] sm:$0xff]  ;;  %v1091_v20 = vld [vmem:[%s1403_s2 + $0xd8] sm:$0xff]  ;;  %v1090_v24 = vld [vmem:[%s1403_s2 + $0xd0] sm:$0xff] }
   0x9   :  { %365 = vmatpush.bf16.msra.mxu3 %v1094_v7  ;;  %v21_v16 = vld [vmem:[%s1404_s0] sm:$0x1f]  ;;  %v1065_v31 = vld [vmem:[%s1403_s2 + $0x8] sm:$0xff]  ;;  %v1099_v39 = vld [vmem:[%s1403_s2 + $0x118] sm:$0xff] }
   0xa   :  { %327 = vmatpush.bf16.msra.mxu0 %v1069_v8  ;;  %96 = vst [vmem:[#allocation1] ss:$9 sm:$0xff] %v21_v16  ;;  %v22_v25 = vld [vmem:[%s1405_s1] sm:$0x1f]  ;;  %v1073_v32 = vld [vmem:[%s1403_s2 + $0x48] sm:$0xff]  ;;  %v1107_v40 = vld [vmem:[%s1406_s3 + $0x38] sm:$0xff] }
   0xb   :  { %340 = vmatpush.bf16.msra.mxu1 %v1077_v9  ;;  %v1081_v33 = vld [vmem:[%s1403_s2 + $0x88] sm:$0xff]  ;;  %v1064_v35 = vld [vmem:[%s1403_s2] sm:$0xff]  ;;  %v1115_v41 = vld [vmem:[%s1406_s3 + $0x78] sm:$0xff] }
   0xc   :  { %353 = vmatpush.bf16.msra.mxu2 %v1085_v10  ;;  %v1089_v34 = vld [vmem:[%s1403_s2 + $0xc8] sm:$0xff]  ;;  %v1072_v36 = vld [vmem:[%s1403_s2 + $0x40] sm:$0xff]  ;;  %v1123_v42 = vld [vmem:[%s1406_s3 + $0xb8] sm:$0xff] }
   0xd   :  { %366 = vmatpush.bf16.msra.mxu3 %v1093_v11  ;;  %v1080_v37 = vld [vmem:[%s1403_s2 + $0x80] sm:$0xff]  ;;  %v1098_v43 = vld [vmem:[%s1403_s2 + $0x110] sm:$0xff]  ;;  %v1097_v47 = vld [vmem:[%s1403_s2 + $0x108] sm:$0xff] }
   0xe   :  { %328 = vmatpush.bf16.msra.mxu0 %v1068_v12  ;;  %v1088_v38 = vld [vmem:[%s1403_s2 + $0xc0] sm:$0xff]  ;;  %v1106_v44 = vld [vmem:[%s1406_s3 + $0x30] sm:$0xff]  ;;  %v1105_v48 = vld [vmem:[%s1406_s3 + $0x28] sm:$0xff] }
   0xf   :  { %341 = vmatpush.bf16.msra.mxu1 %v1076_v13  ;;  %v1114_v45 = vld [vmem:[%s1406_s3 + $0x70] sm:$0xff]  ;;  %v1113_v49 = vld [vmem:[%s1406_s3 + $0x68] sm:$0xff]  ;;  %v1096_v51 = vld [vmem:[%s1403_s2 + $0x100] sm:$0xff] }
  0x10   :  { %354 = vmatpush.bf16.msra.mxu2 %v1084_v14  ;;  %v1122_v46 = vld [vmem:[%s1406_s3 + $0xb0] sm:$0xff]  ;;  %v1121_v50 = vld [vmem:[%s1406_s3 + $0xa8] sm:$0xff]  ;;  %v1104_v52 = vld [vmem:[%s1406_s3 + $0x20] sm:$0xff] }
  0x11   :  { %367 = vmatpush.bf16.msra.mxu3 %v1092_v15  ;;  %v97_v26 = vld [vmem:[#allocation1] sm:$0xff]  ;;  %v98_v27 = vld [vmem:[#allocation1 + $0x9] sm:$0xff]  ;;  %v99_v28 = vld [vmem:[#allocation1 + $0x12] sm:$0xff] }
  0x12   :  { %329 = vmatpush.bf16.msra.mxu0 %v1067_v17  ;;  %v100_v29 = vld [vmem:[#allocation1 + $0x1b] sm:$0xff]  ;;  %v1247_v30 = vld [vmem:[#allocation1 + $0x24] sm:$0xff]  ;;  %v1130_v59 = vld [vmem:[%s1406_s3 + $0xf0] sm:$0xff] }
  0x13   :  { %342 = vmatpush.bf16.msra.mxu1 %v1075_v18  ;;  %463 = vst [vmem:[#allocation1] ss:$9 sm:$0xff] %v22_v25  ;;  %v1112_v53 = vld [vmem:[%s1406_s3 + $0x60] sm:$0xff]  ;;  %v1131_v55 = vld [vmem:[%s1406_s3 + $0xf8] sm:$0xff]  ;;  %v1102_v60 = vld [vmem:[%s1406_s3 + $0x10] sm:$0xff] }
  0x14   :  { %355 = vmatpush.bf16.msra.mxu2 %v1083_v19  ;;  %v1120_v54 = vld [vmem:[%s1406_s3 + $0xa0] sm:$0xff]  ;;  %v1103_v56 = vld [vmem:[%s1406_s3 + $0x18] sm:$0xff]  ;;  %v1110_v61 = vld [vmem:[%s1406_s3 + $0x50] sm:$0xff] }
  0x15   :  { %368 = vmatpush.bf16.msra.mxu3 %v1091_v20  ;;  %v1111_v57 = vld [vmem:[%s1406_s3 + $0x58] sm:$0xff]  ;;  %v1118_v62 = vld [vmem:[%s1406_s3 + $0x90] sm:$0xff]  ;;  %v1129_v63 = vld [vmem:[%s1406_s3 + $0xe8] sm:$0xff] }
  0x16   :  { %330 = vmatpush.bf16.msra.mxu0 %v1066_v21  ;;  %v1119_v58 = vld [vmem:[%s1406_s3 + $0x98] sm:$0xff]  ;;  %v1101_v0 = vld [vmem:[%s1406_s3 + $0x8] sm:$0xff]  ;;  %v1128_v3 = vld [vmem:[%s1406_s3 + $0xe0] sm:$0xff] }
  0x17   :  { %343 = vmatpush.bf16.msra.mxu1 %v1074_v22  ;;  %v1109_v1 = vld [vmem:[%s1406_s3 + $0x48] sm:$0xff]  ;;  %v1100_v4 = vld [vmem:[%s1406_s3] sm:$0xff]  ;;  %v1127_v7 = vld [vmem:[%s1406_s3 + $0xd8] sm:$0xff] }
  0x18   :  { %356 = vmatpush.bf16.msra.mxu2 %v1082_v23  ;;  %v1117_v2 = vld [vmem:[%s1406_s3 + $0x88] sm:$0xff]  ;;  %v1108_v5 = vld [vmem:[%s1406_s3 + $0x40] sm:$0xff]  ;;  %v1135_v8 = vld [vmem:[%s1406_s3 + $0x118] sm:$0xff] }
  0x19   :  { %369 = vmatpush.bf16.msra.mxu3 %v1090_v24  ;;  %v1116_v6 = vld [vmem:[%s1406_s3 + $0x80] sm:$0xff]  ;;  %v1126_v12 = vld [vmem:[%s1406_s3 + $0xd0] sm:$0xff]  ;;  %v1125_v14 = vld [vmem:[%s1406_s3 + $0xc8] sm:$0xff] }
  0x1a   :  { %331 = vmatpush.bf16.msra.mxu0 %v1065_v31  ;;  %v464_v9 = vld [vmem:[#allocation1] sm:$0xff]  ;;  %v465_v10 = vld [vmem:[#allocation1 + $0x9] sm:$0xff]  ;;  %v466_v11 = vld [vmem:[#allocation1 + $0x12] sm:$0xff] }
  0x1b   :  { %344 = vmatpush.bf16.msra.mxu1 %v1073_v32  ;;  %v1134_v13 = vld [vmem:[%s1406_s3 + $0x110] sm:$0xff]  ;;  %v1133_v15 = vld [vmem:[%s1406_s3 + $0x108] sm:$0xff]  ;;  %v1124_v16 = vld [vmem:[%s1406_s3 + $0xc0] sm:$0xff] }
  0x1c   :  { %357 = vmatpush.bf16.msra.mxu2 %v1081_v33  ;;  %v1132_v17 = vld [vmem:[%s1406_s3 + $0x100] sm:$0xff]  ;;  %s1138_s3 = smov 64  }
  0x1d   :  { %370 = vmatpush.bf16.msra.mxu3 %v1089_v34  ;;  %v467_v18 = vld [vmem:[#allocation1 + $0x1b] sm:$0xff]  ;;  %v468_v19 = vld [vmem:[#allocation1 + $0x24] sm:$0xff] }
  0x1e   :  { %332 = vmatpush.bf16.msra.mxu0 %v1064_v35 }
  0x1f   :  { %345 = vmatpush.bf16.msra.mxu1 %v1072_v36 }
  0x20   :  { %358 = vmatpush.bf16.msra.mxu2 %v1080_v37 }
  0x21   :  { %371 = vmatpush.bf16.msra.mxu3 %v1088_v38  ;;  %333 = vmatmul.bf16.vlgmr.msra.gmra.mxu0 %v97_v26 }
  0x22   :  { %381 = vmatpush.bf16.msrb.mxu0 %v1099_v39  ;;  %346 = vmatmul.bf16.vlgmr.msra.gmra.mxu1 %v98_v27 }
  0x23   :  { %691 = vmatpush.bf16.msrb.mxu1 %v1107_v40  ;;  %359 = vmatmul.bf16.vlgmr.msra.gmra.mxu2 %v99_v28 }
  0x24   :  { %704 = vmatpush.bf16.msrb.mxu2 %v1115_v41  ;;  %372 = vmatmul.bf16.vlgmr.msra.gmra.mxu3 %v100_v29 }
  0x25   :  { %717 = vmatpush.bf16.msrb.mxu3 %v1123_v42 }
  0x26   :  { %382 = vmatpush.bf16.msrb.mxu0 %v1098_v43 }
  0x27   :  { %692 = vmatpush.bf16.msrb.mxu1 %v1106_v44 }
  0x28   :  { %705 = vmatpush.bf16.msrb.mxu2 %v1114_v45 }
  0x29   :  { %718 = vmatpush.bf16.msrb.mxu3 %v1122_v46 }
  0x2a   :  { %383 = vmatpush.bf16.msrb.mxu0 %v1097_v47 }
  0x2b   :  { %693 = vmatpush.bf16.msrb.mxu1 %v1105_v48  ;;  %v1137_v48 = vld [vmem:[%s1407_s4] ss:$0 sm:$0xff] }
  0x2c   :  { %706 = vmatpush.bf16.msrb.mxu2 %v1113_v49 }
  0x2d   :  { %719 = vmatpush.bf16.msrb.mxu3 %v1121_v50 }
  0x2e   :  { %384 = vmatpush.bf16.msrb.mxu0 %v1096_v51 }
  0x2f   :  { %694 = vmatpush.bf16.msrb.mxu1 %v1104_v52 }
  0x30   :  { %707 = vmatpush.bf16.msrb.mxu2 %v1112_v53 }
  0x31   :  { %720 = vmatpush.bf16.msrb.mxu3 %v1120_v54  ;;  %918 = vmatmul.msk.bf16.vlgmr.msrb.gmra.mxu0 %vm322_vm0, %v1247_v30 }
  0x32   :  { %730 = vmatpush.bf16.msra.mxu0 %v1131_v55 }
  0x33   :  { %695 = vmatpush.bf16.msrb.mxu1 %v1103_v56 }
  0x34   :  { %708 = vmatpush.bf16.msrb.mxu2 %v1111_v57 }
  0x35   :  { %721 = vmatpush.bf16.msrb.mxu3 %v1119_v58 }
  0x36   :  { %731 = vmatpush.bf16.msra.mxu0 %v1130_v59 }
  0x37   :  { %696 = vmatpush.bf16.msrb.mxu1 %v1102_v60 }
  0x38   :  { %709 = vmatpush.bf16.msrb.mxu2 %v1110_v61 }
  0x39   :  { %722 = vmatpush.bf16.msrb.mxu3 %v1118_v62 }
  0x3a   :  { %732 = vmatpush.bf16.msra.mxu0 %v1129_v63 }
  0x3b   :  { %697 = vmatpush.bf16.msrb.mxu1 %v1101_v0 }
  0x3c   :  { %710 = vmatpush.bf16.msrb.mxu2 %v1109_v1 }
  0x3d   :  { %723 = vmatpush.bf16.msrb.mxu3 %v1117_v2 }
  0x3e   :  { %733 = vmatpush.bf16.msra.mxu0 %v1128_v3 }
  0x3f   :  { %698 = vmatpush.bf16.msrb.mxu1 %v1100_v4 }
  0x40   :  { %711 = vmatpush.bf16.msrb.mxu2 %v1108_v5 }
  0x41   :  { %724 = vmatpush.bf16.msrb.mxu3 %v1116_v6 }
  0x42   :  { %734 = vmatpush.bf16.msra.mxu0 %v1127_v7  ;;  %699 = vmatmul.bf16.vlgmr.msrb.gmra.mxu1 %v464_v9 }
  0x43   :  { %747 = vmatpush.bf16.msra.mxu1 %v1135_v8  ;;  %712 = vmatmul.bf16.vlgmr.msrb.gmra.mxu2 %v465_v10 }
  0x44   :  { %725 = vmatmul.bf16.vlgmr.msrb.gmra.mxu3 %v466_v11 }
  0x46   :  { %735 = vmatpush.bf16.msra.mxu0 %v1126_v12 }
  0x47   :  { %748 = vmatpush.bf16.msra.mxu1 %v1134_v13 }
  0x4a   :  { %736 = vmatpush.bf16.msra.mxu0 %v1125_v14 }
  0x4b   :  { %749 = vmatpush.bf16.msra.mxu1 %v1133_v15 }
  0x4e   :  { %737 = vmatpush.bf16.msra.mxu0 %v1124_v16 }
  0x4f   :  { %750 = vmatpush.bf16.msra.mxu1 %v1132_v17 }
  0x51   :  { %738 = vmatmul.bf16.vlgmr.msra.gmra.mxu0 %v467_v18 }
  0x52   :  { %1063 = vmatmul.msk.bf16.vlgmr.msra.gmra.mxu1 %vm322_vm0, %v468_v19 }
  0x9e   :  { %v334_v20 = vpop.f32.mrf.mxu0 }
  0x9f   :  { %v347_v21 = vpop.f32.mrf.mxu1 }
  0xa0   :  { %v348_v22 = vadd.f32 %v347_v21, %v334_v20 }
  0xa6   :  { %v360_v23 = vpop.f32.mrf.mxu2  ;;  %v336_v25 = vpop.f32.mrf.mxu0 }
  0xa7   :  { %v373_v24 = vpop.f32.mrf.mxu3  ;;  %v349_v26 = vpop.f32.mrf.mxu1  ;;  %v361_v27 = vadd.f32 %v360_v23, %v348_v22 }
  0xa9   :  { %v374_v28 = vadd.f32 %v373_v24, %v361_v27 }
  0xae   :  { %v362_v29 = vpop.f32.mrf.mxu2  ;;  %v386_v31 = vpop.f32.mrf.mxu0 }
  0xaf   :  { %v375_v30 = vpop.f32.mrf.mxu3  ;;  %v387_v32 = vadd.f32 %v386_v31, %v374_v28 }
  0xb6   :  { %v388_v33 = vpop.f32.mrf.mxu0 }
  0xbf   :  { %v700_v34 = vpop.f32.mrf.mxu1 }
  0xc6   :  { %v713_v35 = vpop.f32.mrf.mxu2 }
  0xc7   :  { %v726_v36 = vpop.f32.mrf.mxu3  ;;  %v702_v37 = vpop.f32.mrf.mxu1  ;;  %v714_v38 = vadd.f32 %v713_v35, %v700_v34 }
  0xc9   :  { %v727_v39 = vadd.f32 %v726_v36, %v714_v38 }
  0xce   :  { %v739_v40 = vpop.f32.mrf.mxu0  ;;  %v715_v42 = vpop.f32.mrf.mxu2 }
  0xcf   :  { %v740_v41 = vadd.f32 %v739_v40, %v727_v39  ;;  %v728_v43 = vpop.f32.mrf.mxu3  ;;  %v752_v44 = vpop.f32.mrf.mxu1 }
  0xd1   :  { %v753_v45 = vadd.f32 %v752_v44, %v740_v41 }
  0xd3   :  { %757 = vrot.lane.b32.xlu0 %v753_v45, %s1138_s3 }
  0xd6   :  { %v741_v46 = vpop.f32.mrf.mxu0 }
  0xd7   :  { %v754_v47 = vpop.f32.mrf.mxu1 }
 0x145   :  { %v758_v49 = vpop.permute.xlu0 %757 }
 0x146   :  { %v760_v50 = vsel %vm322_vm0, %v387_v32, %v758_v49 }
 0x147   :  { %v765_v51 = vadd.f32 %v1137_v48, %v760_v50 }
 0x149   :  { %v766_v52 = vmul.f32 0.01, %v765_v51 }
 0x14b   :  { %v767_v53 = vmax.f32 %v765_v51, %v766_v52 }
 0x14d   :  { %v768_v54 = vpack.c.bf16 %v767_v53, %v767_v53 }
 0x14f   :  { %769 = vst [vmem:[%s1408_s5] sm:$0x1] %v768_v54 }

// kernel: rnd_net_forward.9
= control target key start
LH: loop header
LB: loop body
LE: loop exit
PB: predicated region body
PF: predicated region fallthrough
CT: control target
= control target key end

     0   :  { %22 = vsyncpa [#allocation4], 0  ;;  %vm159_vm0 = vcmask 523264   ;;  %s5908_s0 = inlined_call_operand.vmem [shape: bf16[2,64], index: 0, kind: input, shape index: {}]   ;;  %s5909_s1 = inlined_call_operand.vmem [shape: bf16[2,64], index: 1, kind: input, shape index: {}]   ;;  %s5910_s2 = inlined_call_operand.vmem [shape: bf16[64,512], index: 2, kind: input, shape index: {}]   ;;  %s5911_s3 = inlined_call_operand.vmem [shape: f32[1,512], index: 3, kind: input, shape index: {}, may-alias: {3,5,7,9}]   ;;  %s5912_s4 = inlined_call_operand.vmem [shape: bf16[64,512], index: 4, kind: input, shape index: {}]   ;;  %s5913_s5 = inlined_call_operand.vmem [shape: f32[1,512], index: 5, kind: input, shape index: {}, may-alias: {3,5,7,9}]   ;;  %s5914_s6 = inlined_call_operand.vmem [shape: bf16[512,512], index: 6, kind: input, shape index: {}]   ;;  %s5915_s7 = inlined_call_operand.vmem [shape: f32[1,512], index: 7, kind: input, shape index: {}, may-alias: {3,5,7,9}]   ;;  %s5916_s8 = inlined_call_operand.vmem [shape: bf16[512,512], index: 8, kind: input, shape index: {}]   ;;  %s5917_s9 = inlined_call_operand.vmem [shape: f32[1,512], index: 9, kind: input, shape index: {}, may-alias: {3,5,7,9}]   ;;  %s5918_s10 = inlined_call_operand.vmem [shape: f32[2,32], index: 10, kind: input, shape index: {}]   ;;  %s5919_s11 = inlined_call_operand.vmem [shape: f32[1,32], index: 11, kind: input, shape index: {}]   ;;  %s5920_s12 = inlined_call_operand.<no memory space> [shape: f32[1,1], index: 12, kind: input, shape index: {}]   ;;  %s5921_s13 = inlined_call_operand.hbm [shape: f32[2,512], index: 13, kind: output, shape index: {0}]   ;;  %s5922_s14 = inlined_call_operand.hbm [shape: f32[2,512], index: 14, kind: output, shape index: {1}]   ;;  %s5923_s15 = inlined_call_operand.vmem [shape: f32[2,128], index: 15, kind: output, shape index: {2}]  }
   0x1   :  { %v2515_v0 = vld [vmem:[%s5910_s2 + $0x60] sm:$0xf]  ;;  %v3639_v1 = vld [vmem:[%s5910_s2 + $0x6c] sm:$0xf0]  ;;  %v3637_v2 = vld [vmem:[%s5910_s2 + $0x64] sm:$0xf] }
   0x2   :  { %v2516_v3 = vor.u32 %v3639_v1, %v2515_v0  ;;  %v2517_v4 = vld [vmem:[%s5910_s2 + $0x70] sm:$0xf0]  ;;  %v2523_v5 = vld [vmem:[%s5910_s2 + $0x68] sm:$0xf]  ;;  %v3640_v6 = vld [vmem:[%s5910_s2 + $0x74] sm:$0xf0] }
   0x3   :  { %v2520_v7 = vor.u32 %v3637_v2, %v2517_v4  ;;  %v2524_v8 = vor.u32 %v3640_v6, %v2523_v5  ;;  %v3638_v9 = vld [vmem:[%s5910_s2 + $0x6c] sm:$0xf]  ;;  %v2525_v10 = vld [vmem:[%s5910_s2 + $0x78] sm:$0xf0]  ;;  %v2499_v11 = vld [vmem:[%s5910_s2 + $0x40] sm:$0xf] }
   0x4   :  { %167 = vmatpush.bf16.msra.mxu0 %v2516_v3  ;;  %v2528_v12 = vor.u32 %v3638_v9, %v2525_v10  ;;  %v3635_v13 = vld [vmem:[%s5910_s2 + $0x4c] sm:$0xf0]  ;;  %v3633_v14 = vld [vmem:[%s5910_s2 + $0x44] sm:$0xf]  ;;  %v2501_v15 = vld [vmem:[%s5910_s2 + $0x50] sm:$0xf0] }
   0x5   :  { %180 = vmatpush.bf16.msra.mxu1 %v2520_v7  ;;  %193 = vmatpush.bf16.msra.mxu2 %v2524_v8  ;;  %v2500_v16 = vor.u32 %v3635_v13, %v2499_v11  ;;  %v2504_v17 = vor.u32 %v3633_v14, %v2501_v15  ;;  %v2507_v18 = vld [vmem:[%s5910_s2 + $0x48] sm:$0xf]  ;;  %v3636_v19 = vld [vmem:[%s5910_s2 + $0x54] sm:$0xf0]  ;;  %v3634_v20 = vld [vmem:[%s5910_s2 + $0x4c] sm:$0xf] }
   0x6   :  { %206 = vmatpush.bf16.msra.mxu3 %v2528_v12  ;;  %v2508_v21 = vor.u32 %v3636_v19, %v2507_v18  ;;  %v2509_v22 = vld [vmem:[%s5910_s2 + $0x58] sm:$0xf0]  ;;  %v2483_v23 = vld [vmem:[%s5910_s2 + $0x20] sm:$0xf]  ;;  %v3631_v24 = vld [vmem:[%s5910_s2 + $0x2c] sm:$0xf0] }
   0x7   :  { %v2512_v25 = vor.u32 %v3634_v20, %v2509_v22  ;;  %v3629_v26 = vld [vmem:[%s5910_s2 + $0x24] sm:$0xf]  ;;  %v2485_v27 = vld [vmem:[%s5910_s2 + $0x30] sm:$0xf0]  ;;  %v2491_v28 = vld [vmem:[%s5910_s2 + $0x28] sm:$0xf]  ;;  %v2484_v29 = vor.u32 %v3631_v24, %v2483_v23 }
   0x8   :  { %168 = vmatpush.bf16.msra.mxu0 %v2500_v16  ;;  %v3632_v30 = vld [vmem:[%s5910_s2 + $0x34] sm:$0xf0]  ;;  %v3630_v31 = vld [vmem:[%s5910_s2 + $0x2c] sm:$0xf]  ;;  %v2493_v32 = vld [vmem:[%s5910_s2 + $0x38] sm:$0xf0]  ;;  %v2488_v33 = vor.u32 %v3629_v26, %v2485_v27 }
   0x9   :  { %181 = vmatpush.bf16.msra.mxu1 %v2504_v17  ;;  %194 = vmatpush.bf16.msra.mxu2 %v2508_v21  ;;  %v2492_v34 = vor.u32 %v3632_v30, %v2491_v28  ;;  %v2467_v35 = vld [vmem:[%s5910_s2] sm:$0xf]  ;;  %v3627_v36 = vld [vmem:[%s5910_s2 + $0xc] sm:$0xf0]  ;;  %v3625_v37 = vld [vmem:[%s5910_s2 + $0x4] sm:$0xf]  ;;  %v2496_v38 = vor.u32 %v3630_v31, %v2493_v32 }
   0xa   :  { %207 = vmatpush.bf16.msra.mxu3 %v2512_v25  ;;  %v2469_v39 = vld [vmem:[%s5910_s2 + $0x10] sm:$0xf0]  ;;  %v2475_v40 = vld [vmem:[%s5910_s2 + $0x8] sm:$0xf]  ;;  %v3628_v41 = vld [vmem:[%s5910_s2 + $0x14] sm:$0xf0]  ;;  %v2468_v44 = vor.u32 %v3627_v36, %v2467_v35 }
   0xb   :  { %v3626_v42 = vld [vmem:[%s5910_s2 + $0xc] sm:$0xf]  ;;  %v2477_v43 = vld [vmem:[%s5910_s2 + $0x18] sm:$0xf0]  ;;  %v2583_v45 = vld [vmem:[%s5912_s4 + $0x60] sm:$0xf]  ;;  %v2472_v47 = vor.u32 %v3625_v37, %v2469_v39  ;;  %v2476_v48 = vor.u32 %v3628_v41, %v2475_v40 }
   0xc   :  { %169 = vmatpush.bf16.msra.mxu0 %v2484_v29  ;;  %v3655_v46 = vld [vmem:[%s5912_s4 + $0x6c] sm:$0xf0]  ;;  %v3653_v49 = vld [vmem:[%s5912_s4 + $0x64] sm:$0xf]  ;;  %v2585_v50 = vld [vmem:[%s5912_s4 + $0x70] sm:$0xf0]  ;;  %v2480_v51 = vor.u32 %v3626_v42, %v2477_v43 }
   0xd   :  { %182 = vmatpush.bf16.msra.mxu1 %v2488_v33  ;;  %195 = vmatpush.bf16.msra.mxu2 %v2492_v34  ;;  %v51_v52 = vld [vmem:[%s5908_s0] sm:$0x1]  ;;  %v2584_v53 = vor.u32 %v3655_v46, %v2583_v45  ;;  %v2591_v54 = vld [vmem:[%s5912_s4 + $0x68] sm:$0xf]  ;;  %v3656_v55 = vld [vmem:[%s5912_s4 + $0x74] sm:$0xf0]  ;;  %v2588_v57 = vor.u32 %v3653_v49, %v2585_v50 }
   0xe   :  { %208 = vmatpush.bf16.msra.mxu3 %v2496_v38  ;;  %v3654_v56 = vld [vmem:[%s5912_s4 + $0x6c] sm:$0xf]  ;;  %v2593_v58 = vld [vmem:[%s5912_s4 + $0x78] sm:$0xf0]  ;;  %v2567_v59 = vld [vmem:[%s5912_s4 + $0x40] sm:$0xf]  ;;  %v2592_v63 = vor.u32 %v3656_v55, %v2591_v54 }
   0xf   :  { %v3651_v60 = vld [vmem:[%s5912_s4 + $0x4c] sm:$0xf0]  ;;  %v3649_v61 = vld [vmem:[%s5912_s4 + $0x44] sm:$0xf]  ;;  %v2569_v62 = vld [vmem:[%s5912_s4 + $0x50] sm:$0xf0]  ;;  %v2596_v0 = vor.u32 %v3654_v56, %v2593_v58 }
  0x10   :  { %170 = vmatpush.bf16.msra.mxu0 %v2468_v44  ;;  %v2568_v1 = vor.u32 %v3651_v60, %v2567_v59  ;;  %v2575_v2 = vld [vmem:[%s5912_s4 + $0x48] sm:$0xf]  ;;  %v3652_v3 = vld [vmem:[%s5912_s4 + $0x54] sm:$0xf0]  ;;  %v3650_v4 = vld [vmem:[%s5912_s4 + $0x4c] sm:$0xf]  ;;  %v2572_v5 = vor.u32 %v3649_v61, %v2569_v62 }
  0x11   :  { %183 = vmatpush.bf16.msra.mxu1 %v2472_v47  ;;  %196 = vmatpush.bf16.msra.mxu2 %v2476_v48  ;;  %v2577_v6 = vld [vmem:[%s5912_s4 + $0x58] sm:$0xf0]  ;;  %v2551_v7 = vld [vmem:[%s5912_s4 + $0x20] sm:$0xf]  ;;  %v3647_v8 = vld [vmem:[%s5912_s4 + $0x2c] sm:$0xf0]  ;;  %v2576_v11 = vor.u32 %v3652_v3, %v2575_v2 }
  0x12   :  { %209 = vmatpush.bf16.msra.mxu3 %v2480_v51  ;;  %v3645_v9 = vld [vmem:[%s5912_s4 + $0x24] sm:$0xf]  ;;  %v2553_v10 = vld [vmem:[%s5912_s4 + $0x30] sm:$0xf0]  ;;  %v2559_v12 = vld [vmem:[%s5912_s4 + $0x28] sm:$0xf]  ;;  %v2580_v13 = vor.u32 %v3650_v4, %v2577_v6  ;;  %v2552_v14 = vor.u32 %v3647_v8, %v2551_v7 }
  0x13   :  { %2529 = vmatmul.msk.bf16.vlgmr.msra.gmra.mxu0 %vm159_vm0, %v51_v52  ;;  %v3648_v15 = vld [vmem:[%s5912_s4 + $0x34] sm:$0xf0]  ;;  %v3646_v16 = vld [vmem:[%s5912_s4 + $0x2c] sm:$0xf]  ;;  %v2561_v17 = vld [vmem:[%s5912_s4 + $0x38] sm:$0xf0]  ;;  %v2556_v18 = vor.u32 %v3645_v9, %v2553_v10 }
  0x14   :  { %328 = vmatpush.bf16.msrb.mxu0 %v2584_v53  ;;  %2530 = vmatmul.msk.bf16.vlgmr.msra.gmra.mxu1 %vm159_vm0, %v51_v52  ;;  %v2535_v19 = vld [vmem:[%s5912_s4] sm:$0xf]  ;;  %v3643_v20 = vld [vmem:[%s5912_s4 + $0xc] sm:$0xf0]  ;;  %v3641_v21 = vld [vmem:[%s5912_s4 + $0x4] sm:$0xf]  ;;  %v2560_v25 = vor.u32 %v3648_v15, %v2559_v12  ;;  %v2564_v28 = vor.u32 %v3646_v16, %v2561_v17 }
  0x15   :  { %341 = vmatpush.bf16.msrb.mxu1 %v2588_v57  ;;  %2531 = vmatmul.msk.bf16.vlgmr.msra.gmra.mxu2 %vm159_vm0, %v51_v52  ;;  %v2537_v22 = vld [vmem:[%s5912_s4 + $0x10] sm:$0xf0]  ;;  %v2715_v23 = vld [vmem:[%s5914_s6 + $0xe0] sm:$0xf]  ;;  %v3687_v24 = vld [vmem:[%s5914_s6 + $0xec] sm:$0xf0]  ;;  %v2536_v29 = vor.u32 %v3643_v20, %v2535_v19 }
  0x16   :  { %2532 = vmatmul.msk.bf16.vlgmr.msra.gmra.mxu3 %vm159_vm0, %v51_v52  ;;  %354 = vmatpush.bf16.msrb.mxu2 %v2592_v63  ;;  %v2843_v26 = vld [vmem:[%s5914_s6 + $0x1e0] sm:$0xf]  ;;  %v3719_v27 = vld [vmem:[%s5914_s6 + $0x1ec] sm:$0xf0]  ;;  %v2543_v30 = vld [vmem:[%s5912_s4 + $0x8] sm:$0xf]  ;;  %v2540_v33 = vor.u32 %v3641_v21, %v2537_v22  ;;  %v2716_v35 = vor.u32 %v3687_v24, %v2715_v23 }
  0x17   :  { %367 = vmatpush.bf16.msrb.mxu3 %v2596_v0  ;;  %v3644_v31 = vld [vmem:[%s5912_s4 + $0x14] sm:$0xf0]  ;;  %v3642_v32 = vld [vmem:[%s5912_s4 + $0xc] sm:$0xf]  ;;  %v2545_v34 = vld [vmem:[%s5912_s4 + $0x18] sm:$0xf0]  ;;  %v2844_v38 = vor.u32 %v3719_v27, %v2843_v26 }
  0x18   :  { %329 = vmatpush.bf16.msrb.mxu0 %v2568_v1  ;;  %v2971_v36 = vld [vmem:[%s5914_s6 + $0x2e0] sm:$0xf]  ;;  %v3751_v37 = vld [vmem:[%s5914_s6 + $0x2ec] sm:$0xf0]  ;;  %v2544_v41 = vor.u32 %v3644_v31, %v2543_v30  ;;  %v2548_v42 = vor.u32 %v3642_v32, %v2545_v34 }
  0x19   :  { %342 = vmatpush.bf16.msrb.mxu1 %v2572_v5  ;;  %v3099_v39 = vld [vmem:[%s5914_s6 + $0x3e0] sm:$0xf]  ;;  %v3783_v40 = vld [vmem:[%s5914_s6 + $0x3ec] sm:$0xf0]  ;;  %v2972_v46 = vor.u32 %v3751_v37, %v2971_v36 }
  0x1a   :  { %355 = vmatpush.bf16.msrb.mxu2 %v2576_v11  ;;  %v2699_v43 = vld [vmem:[%s5914_s6 + $0xc0] sm:$0xf]  ;;  %v3683_v44 = vld [vmem:[%s5914_s6 + $0xcc] sm:$0xf0]  ;;  %v3100_v48 = vor.u32 %v3783_v40, %v3099_v39 }
  0x1b   :  { %368 = vmatpush.bf16.msrb.mxu3 %v2580_v13  ;;  %v2827_v45 = vld [vmem:[%s5914_s6 + $0x1c0] sm:$0xf]  ;;  %v3715_v47 = vld [vmem:[%s5914_s6 + $0x1cc] sm:$0xf0]  ;;  %v2700_v54 = vor.u32 %v3683_v44, %v2699_v43 }
  0x1c   :  { %330 = vmatpush.bf16.msrb.mxu0 %v2552_v14  ;;  %v2955_v49 = vld [vmem:[%s5914_s6 + $0x2c0] sm:$0xf]  ;;  %v3747_v50 = vld [vmem:[%s5914_s6 + $0x2cc] sm:$0xf0]  ;;  %v2828_v55 = vor.u32 %v3715_v47, %v2827_v45 }
  0x1d   :  { %343 = vmatpush.bf16.msrb.mxu1 %v2556_v18  ;;  %v52_v51 = vld [vmem:[%s5909_s1] sm:$0x1]  ;;  %v3779_v53 = vld [vmem:[%s5914_s6 + $0x3cc] sm:$0xf0]  ;;  %v2956_v59 = vor.u32 %v3747_v50, %v2955_v49 }
  0x1e   :  { %356 = vmatpush.bf16.msrb.mxu2 %v2560_v25  ;;  %v3083_v52 = vld [vmem:[%s5914_s6 + $0x3c0] sm:$0xf]  ;;  %v3679_v57 = vld [vmem:[%s5914_s6 + $0xac] sm:$0xf0] }
  0x1f   :  { %369 = vmatpush.bf16.msrb.mxu3 %v2564_v28  ;;  %v2683_v56 = vld [vmem:[%s5914_s6 + $0xa0] sm:$0xf]  ;;  %v3711_v60 = vld [vmem:[%s5914_s6 + $0x1ac] sm:$0xf0]  ;;  %v3084_v61 = vor.u32 %v3779_v53, %v3083_v52 }
  0x20   :  { %331 = vmatpush.bf16.msrb.mxu0 %v2536_v29  ;;  %v2811_v58 = vld [vmem:[%s5914_s6 + $0x1a0] sm:$0xf]  ;;  %v3743_v63 = vld [vmem:[%s5914_s6 + $0x2ac] sm:$0xf0]  ;;  %v2684_v2 = vor.u32 %v3679_v57, %v2683_v56 }
  0x21   :  { %344 = vmatpush.bf16.msrb.mxu1 %v2540_v33  ;;  %v2939_v62 = vld [vmem:[%s5914_s6 + $0x2a0] sm:$0xf]  ;;  %v3775_v1 = vld [vmem:[%s5914_s6 + $0x3ac] sm:$0xf0]  ;;  %v2812_v3 = vor.u32 %v3711_v60, %v2811_v58 }
  0x22   :  { %357 = vmatpush.bf16.msrb.mxu2 %v2544_v41  ;;  %v3067_v0 = vld [vmem:[%s5914_s6 + $0x3a0] sm:$0xf]  ;;  %v3675_v5 = vld [vmem:[%s5914_s6 + $0x8c] sm:$0xf0]  ;;  %v2940_v7 = vor.u32 %v3743_v63, %v2939_v62 }
  0x23   :  { %370 = vmatpush.bf16.msrb.mxu3 %v2548_v42  ;;  %2597 = vmatmul.msk.bf16.vlgmr.msrb.gmra.mxu0 %vm159_vm0, %v52_v51  ;;  %v2667_v4 = vld [vmem:[%s5914_s6 + $0x80] sm:$0xf]  ;;  %v3707_v8 = vld [vmem:[%s5914_s6 + $0x18c] sm:$0xf0]  ;;  %v3068_v9 = vor.u32 %v3775_v1, %v3067_v0 }
  0x24   :  { %1162 = vmatpush.bf16.msra.mxu0 %v2716_v35  ;;  %2598 = vmatmul.msk.bf16.vlgmr.msrb.gmra.mxu1 %vm159_vm0, %v52_v51  ;;  %v2795_v6 = vld [vmem:[%s5914_s6 + $0x180] sm:$0xf]  ;;  %v3739_v11 = vld [vmem:[%s5914_s6 + $0x28c] sm:$0xf0]  ;;  %v2668_v14 = vor.u32 %v3675_v5, %v2667_v4 }
  0x25   :  { %1175 = vmatpush.bf16.msra.mxu1 %v2844_v38  ;;  %2599 = vmatmul.msk.bf16.vlgmr.msrb.gmra.mxu2 %vm159_vm0, %v52_v51  ;;  %v2923_v10 = vld [vmem:[%s5914_s6 + $0x280] sm:$0xf]  ;;  %v3771_v13 = vld [vmem:[%s5914_s6 + $0x38c] sm:$0xf0]  ;;  %v2796_v15 = vor.u32 %v3707_v8, %v2795_v6 }
  0x26   :  { %1188 = vmatpush.bf16.msra.mxu2 %v2972_v46  ;;  %2600 = vmatmul.msk.bf16.vlgmr.msrb.gmra.mxu3 %vm159_vm0, %v52_v51  ;;  %v3051_v12 = vld [vmem:[%s5914_s6 + $0x380] sm:$0xf]  ;;  %v3671_v17 = vld [vmem:[%s5914_s6 + $0x6c] sm:$0xf0]  ;;  %v2924_v19 = vor.u32 %v3739_v11, %v2923_v10 }
  0x27   :  { %1201 = vmatpush.bf16.msra.mxu3 %v3100_v48  ;;  %v2651_v16 = vld [vmem:[%s5914_s6 + $0x60] sm:$0xf]  ;;  %v3703_v20 = vld [vmem:[%s5914_s6 + $0x16c] sm:$0xf0]  ;;  %v3052_v21 = vor.u32 %v3771_v13, %v3051_v12 }
  0x28   :  { %1163 = vmatpush.bf16.msra.mxu0 %v2700_v54  ;;  %v2779_v18 = vld [vmem:[%s5914_s6 + $0x160] sm:$0xf]  ;;  %v3735_v23 = vld [vmem:[%s5914_s6 + $0x26c] sm:$0xf0]  ;;  %v2652_v26 = vor.u32 %v3671_v17, %v2651_v16 }
  0x29   :  { %1176 = vmatpush.bf16.msra.mxu1 %v2828_v55  ;;  %v2907_v22 = vld [vmem:[%s5914_s6 + $0x260] sm:$0xf]  ;;  %v3767_v25 = vld [vmem:[%s5914_s6 + $0x36c] sm:$0xf0]  ;;  %v2780_v28 = vor.u32 %v3703_v20, %v2779_v18 }
  0x2a   :  { %1189 = vmatpush.bf16.msra.mxu2 %v2956_v59  ;;  %v3035_v24 = vld [vmem:[%s5914_s6 + $0x360] sm:$0xf]  ;;  %v3667_v29 = vld [vmem:[%s5914_s6 + $0x4c] sm:$0xf0]  ;;  %v2908_v32 = vor.u32 %v3735_v23, %v2907_v22 }
  0x2b   :  { %1202 = vmatpush.bf16.msra.mxu3 %v3084_v61  ;;  %v2635_v27 = vld [vmem:[%s5914_s6 + $0x40] sm:$0xf]  ;;  %v3699_v31 = vld [vmem:[%s5914_s6 + $0x14c] sm:$0xf0]  ;;  %v3036_v33 = vor.u32 %v3767_v25, %v3035_v24 }
  0x2c   :  { %1164 = vmatpush.bf16.msra.mxu0 %v2684_v2  ;;  %v2763_v30 = vld [vmem:[%s5914_s6 + $0x140] sm:$0xf]  ;;  %v3731_v35 = vld [vmem:[%s5914_s6 + $0x24c] sm:$0xf0] }
  0x2d   :  { %1177 = vmatpush.bf16.msra.mxu1 %v2812_v3  ;;  %v2891_v34 = vld [vmem:[%s5914_s6 + $0x240] sm:$0xf]  ;;  %v3763_v37 = vld [vmem:[%s5914_s6 + $0x34c] sm:$0xf0] }
  0x2e   :  { %1190 = vmatpush.bf16.msra.mxu2 %v2940_v7  ;;  %v3019_v36 = vld [vmem:[%s5914_s6 + $0x340] sm:$0xf] }
  0x2f   :  { %1203 = vmatpush.bf16.msra.mxu3 %v3068_v9 }
  0x30   :  { %1165 = vmatpush.bf16.msra.mxu0 %v2668_v14 }
  0x31   :  { %1178 = vmatpush.bf16.msra.mxu1 %v2796_v15 }
  0x32   :  { %1191 = vmatpush.bf16.msra.mxu2 %v2924_v19 }
  0x33   :  { %1204 = vmatpush.bf16.msra.mxu3 %v3052_v21 }
  0x34   :  { %23 = vsyncpa [#allocation6], 0  ;;  %1166 = vmatpush.bf16.msra.mxu0 %v2652_v26  ;;  %v2636_v38 = vor.u32 %v3667_v29, %v2635_v27  ;;  %v2764_v39 = vor.u32 %v3699_v31, %v2763_v30  ;;  %v2619_v40 = vld [vmem:[%s5914_s6 + $0x20] sm:$0xf]  ;;  %v3663_v41 = vld [vmem:[%s5914_s6 + $0x2c] sm:$0xf0]  ;;  %v2892_v43 = vor.u32 %v3731_v35, %v2891_v34  ;;  %v3020_v45 = vor.u32 %v3763_v37, %v3019_v36 }
  0x35   :  { %1179 = vmatpush.bf16.msra.mxu1 %v2780_v28  ;;  %v2747_v42 = vld [vmem:[%s5914_s6 + $0x120] sm:$0xf]  ;;  %v3695_v44 = vld [vmem:[%s5914_s6 + $0x12c] sm:$0xf0]  ;;  %v2620_v50 = vor.u32 %v3663_v41, %v2619_v40  ;;  %v3685_v57 = vld [vmem:[%s5914_s6 + $0xe4] sm:$0xf] }
  0x36   :  { %1192 = vmatpush.bf16.msra.mxu2 %v2908_v32  ;;  %v2875_v46 = vld [vmem:[%s5914_s6 + $0x220] sm:$0xf]  ;;  %v3727_v47 = vld [vmem:[%s5914_s6 + $0x22c] sm:$0xf0]  ;;  %v2748_v52 = vor.u32 %v3695_v44, %v2747_v42  ;;  %v2717_v58 = vld [vmem:[%s5914_s6 + $0xf0] sm:$0xf0] }
  0x37   :  { %1205 = vmatpush.bf16.msra.mxu3 %v3036_v33  ;;  %v3003_v48 = vld [vmem:[%s5914_s6 + $0x320] sm:$0xf]  ;;  %v3759_v49 = vld [vmem:[%s5914_s6 + $0x32c] sm:$0xf0]  ;;  %v2876_v56 = vor.u32 %v3727_v47, %v2875_v46  ;;  %v3717_v59 = vld [vmem:[%s5914_s6 + $0x1e4] sm:$0xf]  ;;  %v2720_v4 = vor.u32 %v3685_v57, %v2717_v58 }
  0x38   :  { %1167 = vmatpush.bf16.msra.mxu0 %v2636_v38  ;;  %v2603_v51 = vld [vmem:[%s5914_s6] sm:$0xf]  ;;  %v3659_v53 = vld [vmem:[%s5914_s6 + $0xc] sm:$0xf0]  ;;  %v3004_v60 = vor.u32 %v3759_v49, %v3003_v48  ;;  %v2845_v61 = vld [vmem:[%s5914_s6 + $0x1f0] sm:$0xf0] }
  0x39   :  { %1180 = vmatpush.bf16.msra.mxu1 %v2764_v39  ;;  %v2731_v54 = vld [vmem:[%s5914_s6 + $0x100] sm:$0xf]  ;;  %v3691_v55 = vld [vmem:[%s5914_s6 + $0x10c] sm:$0xf0]  ;;  %v2604_v0 = vor.u32 %v3659_v53, %v2603_v51  ;;  %v2848_v5 = vor.u32 %v3717_v59, %v2845_v61  ;;  %v3681_v6 = vld [vmem:[%s5914_s6 + $0xc4] sm:$0xf] }
  0x3a   :  { %1193 = vmatpush.bf16.msra.mxu2 %v2892_v43  ;;  %v2859_v62 = vld [vmem:[%s5914_s6 + $0x200] sm:$0xf]  ;;  %v3723_v63 = vld [vmem:[%s5914_s6 + $0x20c] sm:$0xf0]  ;;  %v2732_v3 = vor.u32 %v3691_v55, %v2731_v54  ;;  %v2701_v7 = vld [vmem:[%s5914_s6 + $0xd0] sm:$0xf0] }
  0x3b   :  { %1206 = vmatpush.bf16.msra.mxu3 %v3020_v45  ;;  %v2987_v1 = vld [vmem:[%s5914_s6 + $0x300] sm:$0xf]  ;;  %v3755_v2 = vld [vmem:[%s5914_s6 + $0x30c] sm:$0xf0]  ;;  %v2860_v8 = vor.u32 %v3723_v63, %v2859_v62  ;;  %v3713_v9 = vld [vmem:[%s5914_s6 + $0x1c4] sm:$0xf]  ;;  %v2704_v12 = vor.u32 %v3681_v6, %v2701_v7 }
  0x3c   :  { %1168 = vmatpush.bf16.msra.mxu0 %v2620_v50  ;;  %v2829_v10 = vld [vmem:[%s5914_s6 + $0x1d0] sm:$0xf0]  ;;  %v2988_v11 = vor.u32 %v3755_v2, %v2987_v1  ;;  %v3749_v14 = vld [vmem:[%s5914_s6 + $0x2e4] sm:$0xf]  ;;  %vm2371_vm1 = vcmask 1041408   ;;  %vm2373_vm2 = vcmask 1045508  }
  0x3d   :  { %1181 = vmatpush.bf16.msra.mxu1 %v2748_v52  ;;  %v2832_v13 = vor.u32 %v3713_v9, %v2829_v10  ;;  %v2973_v15 = vld [vmem:[%s5914_s6 + $0x2f0] sm:$0xf0]  ;;  %v3781_v16 = vld [vmem:[%s5914_s6 + $0x3e4] sm:$0xf]  ;;  %vm2375_vm3 = vcmask 1043456   ;;  %vm2415_vm4 = vcmask 254976  }
  0x3e   :  { %1194 = vmatpush.bf16.msra.mxu2 %v2876_v56  ;;  %v2976_v17 = vor.u32 %v3749_v14, %v2973_v15  ;;  %v3101_v18 = vld [vmem:[%s5914_s6 + $0x3f0] sm:$0xf0]  ;;  %v3677_v20 = vld [vmem:[%s5914_s6 + $0xa4] sm:$0xf]  ;;  %s2436_s21 = sshll.u32 %s5921_s13, 4  ;;  %s3969_s1 = smov [#allocation5]   ;;  %s2437_s21 = int_to_ptr.hbm [resolvable:$true] %s2436_s21 }
  0x3f   :  { %1207 = vmatpush.bf16.msra.mxu3 %v3004_v60  ;;  %v3104_v19 = vor.u32 %v3781_v16, %v3101_v18  ;;  %v2685_v21 = vld [vmem:[%s5914_s6 + $0xb0] sm:$0xf0]  ;;  %v3709_v23 = vld [vmem:[%s5914_s6 + $0x1a4] sm:$0xf]  ;;  %s2447_s23 = sshll.u32 %s5922_s14, 4  ;;  %s2448_s23 = int_to_ptr.hbm [resolvable:$true] %s2447_s23 }
  0x40   :  { %1169 = vmatpush.bf16.msra.mxu0 %v2604_v0  ;;  %v2688_v22 = vor.u32 %v3677_v20, %v2685_v21  ;;  %v2813_v24 = vld [vmem:[%s5914_s6 + $0x1b0] sm:$0xf0]  ;;  %v3745_v26 = vld [vmem:[%s5914_s6 + $0x2c4] sm:$0xf] }
  0x41   :  { %1182 = vmatpush.bf16.msra.mxu1 %v2732_v3  ;;  %v2816_v25 = vor.u32 %v3709_v23, %v2813_v24  ;;  %v2957_v27 = vld [vmem:[%s5914_s6 + $0x2d0] sm:$0xf0]  ;;  %v3777_v28 = vld [vmem:[%s5914_s6 + $0x3c4] sm:$0xf] }
  0x42   :  { %1195 = vmatpush.bf16.msra.mxu2 %v2860_v8  ;;  %v2960_v29 = vor.u32 %v3745_v26, %v2957_v27  ;;  %v3085_v30 = vld [vmem:[%s5914_s6 + $0x3d0] sm:$0xf0]  ;;  %v3673_v32 = vld [vmem:[%s5914_s6 + $0x84] sm:$0xf] }
  0x43   :  { %1208 = vmatpush.bf16.msra.mxu3 %v2988_v11  ;;  %v3088_v31 = vor.u32 %v3777_v28, %v3085_v30  ;;  %v2669_v33 = vld [vmem:[%s5914_s6 + $0x90] sm:$0xf0]  ;;  %v3705_v34 = vld [vmem:[%s5914_s6 + $0x184] sm:$0xf]  ;;  %v69_v30 = vld [vmem:[%s5911_s3] sm:$0xf] }
  0x44   :  { %1214 = vmatpush.bf16.msrb.mxu0 %v2720_v4  ;;  %v2672_v35 = vor.u32 %v3673_v32, %v2669_v33  ;;  %v2797_v36 = vld [vmem:[%s5914_s6 + $0x190] sm:$0xf0]  ;;  %v3741_v38 = vld [vmem:[%s5914_s6 + $0x2a4] sm:$0xf] }
  0x45   :  { %1227 = vmatpush.bf16.msrb.mxu1 %v2848_v5  ;;  %v2800_v37 = vor.u32 %v3705_v34, %v2797_v36  ;;  %v2941_v39 = vld [vmem:[%s5914_s6 + $0x2b0] sm:$0xf0]  ;;  %v3773_v41 = vld [vmem:[%s5914_s6 + $0x3a4] sm:$0xf] }
  0x46   :  { %1240 = vmatpush.bf16.msrb.mxu2 %v2976_v17  ;;  %v2944_v40 = vor.u32 %v3741_v38, %v2941_v39  ;;  %v3069_v42 = vld [vmem:[%s5914_s6 + $0x3b0] sm:$0xf0]  ;;  %v3669_v44 = vld [vmem:[%s5914_s6 + $0x64] sm:$0xf]  ;;  %v71_v38 = vperm.slane %v69_v30, 0 }
  0x47   :  { %1253 = vmatpush.bf16.msrb.mxu3 %v3104_v19  ;;  %v3072_v43 = vor.u32 %v3773_v41, %v3069_v42  ;;  %v2653_v45 = vld [vmem:[%s5914_s6 + $0x70] sm:$0xf0]  ;;  %v3701_v46 = vld [vmem:[%s5914_s6 + $0x164] sm:$0xf]  ;;  %v74_v41 = vperm.slane %v69_v30, 3 }
  0x48   :  { %1215 = vmatpush.bf16.msrb.mxu0 %v2704_v12  ;;  %v2656_v47 = vor.u32 %v3669_v44, %v2653_v45  ;;  %v2781_v48 = vld [vmem:[%s5914_s6 + $0x170] sm:$0xf0]  ;;  %v3737_v50 = vld [vmem:[%s5914_s6 + $0x284] sm:$0xf] }
  0x49   :  { %1228 = vmatpush.bf16.msrb.mxu1 %v2832_v13  ;;  %v2784_v49 = vor.u32 %v3701_v46, %v2781_v48  ;;  %v2925_v51 = vld [vmem:[%s5914_s6 + $0x290] sm:$0xf0]  ;;  %v3769_v52 = vld [vmem:[%s5914_s6 + $0x384] sm:$0xf] }
  0x4a   :  { %1241 = vmatpush.bf16.msrb.mxu2 %v2960_v29  ;;  %v2928_v53 = vor.u32 %v3737_v50, %v2925_v51  ;;  %v3053_v54 = vld [vmem:[%s5914_s6 + $0x390] sm:$0xf0]  ;;  %v3665_v56 = vld [vmem:[%s5914_s6 + $0x44] sm:$0xf]  ;;  %v231_v51 = vld [vmem:[%s5913_s5] sm:$0xf] }
  0x4b   :  { %1254 = vmatpush.bf16.msrb.mxu3 %v3088_v31  ;;  %v3056_v55 = vor.u32 %v3769_v52, %v3053_v54  ;;  %v2637_v57 = vld [vmem:[%s5914_s6 + $0x50] sm:$0xf0]  ;;  %v3697_v58 = vld [vmem:[%s5914_s6 + $0x144] sm:$0xf]  ;;  %v233_v54 = vperm.slane %v231_v51, 0 }
  0x4c   :  { %1216 = vmatpush.bf16.msrb.mxu0 %v2688_v22  ;;  %v2640_v59 = vor.u32 %v3665_v56, %v2637_v57  ;;  %v2765_v60 = vld [vmem:[%s5914_s6 + $0x150] sm:$0xf0]  ;;  %v3733_v62 = vld [vmem:[%s5914_s6 + $0x264] sm:$0xf]  ;;  %v234_v56 = vperm.slane %v231_v51, 1 }
  0x4d   :  { %1229 = vmatpush.bf16.msrb.mxu1 %v2816_v25  ;;  %v2768_v61 = vor.u32 %v3697_v58, %v2765_v60  ;;  %v2909_v63 = vld [vmem:[%s5914_s6 + $0x270] sm:$0xf0]  ;;  %v3765_v0 = vld [vmem:[%s5914_s6 + $0x364] sm:$0xf] }
  0x4e   :  { %1242 = vmatpush.bf16.msrb.mxu2 %v2944_v40  ;;  %v2912_v1 = vor.u32 %v3733_v62, %v2909_v63  ;;  %v3037_v2 = vld [vmem:[%s5914_s6 + $0x370] sm:$0xf0]  ;;  %v3661_v4 = vld [vmem:[%s5914_s6 + $0x24] sm:$0xf]  ;;  %v73_v40 = vperm.slane %v69_v30, 2 }
  0x4f   :  { %1255 = vmatpush.bf16.msrb.mxu3 %v3072_v43  ;;  %v3040_v3 = vor.u32 %v3765_v0, %v3037_v2  ;;  %v2621_v5 = vld [vmem:[%s5914_s6 + $0x30] sm:$0xf0]  ;;  %v3693_v7 = vld [vmem:[%s5914_s6 + $0x124] sm:$0xf]  ;;  %v2723_v63 = vld [vmem:[%s5914_s6 + $0xe8] sm:$0xf] }
  0x50   :  { %1217 = vmatpush.bf16.msrb.mxu0 %v2672_v35  ;;  %v2624_v6 = vor.u32 %v3661_v4, %v2621_v5  ;;  %v2749_v8 = vld [vmem:[%s5914_s6 + $0x130] sm:$0xf0]  ;;  %v3729_v10 = vld [vmem:[%s5914_s6 + $0x244] sm:$0xf]  ;;  %v72_v35 = vperm.slane %v69_v30, 1 }
  0x51   :  { %1230 = vmatpush.bf16.msrb.mxu1 %v2800_v37  ;;  %v2752_v9 = vor.u32 %v3693_v7, %v2749_v8  ;;  %v2893_v11 = vld [vmem:[%s5914_s6 + $0x250] sm:$0xf0]  ;;  %v3761_v12 = vld [vmem:[%s5914_s6 + $0x344] sm:$0xf]  ;;  %v3688_v0 = vld [vmem:[%s5914_s6 + $0xf4] sm:$0xf0] }
  0x52   :  { %1243 = vmatpush.bf16.msrb.mxu2 %v2928_v53  ;;  %v2896_v13 = vor.u32 %v3729_v10, %v2893_v11  ;;  %v3021_v14 = vld [vmem:[%s5914_s6 + $0x350] sm:$0xf0]  ;;  %v3657_v16 = vld [vmem:[%s5914_s6 + $0x4] sm:$0xf]  ;;  %v2851_v2 = vld [vmem:[%s5914_s6 + $0x1e8] sm:$0xf]  ;;  %v2724_v7 = vor.u32 %v3688_v0, %v2723_v63 }
  0x53   :  { %1256 = vmatpush.bf16.msrb.mxu3 %v3056_v55  ;;  %v3024_v15 = vor.u32 %v3761_v12, %v3021_v14  ;;  %v2605_v17 = vld [vmem:[%s5914_s6 + $0x10] sm:$0xf0]  ;;  %v3689_v18 = vld [vmem:[%s5914_s6 + $0x104] sm:$0xf]  ;;  %v2707_v11 = vld [vmem:[%s5914_s6 + $0xc8] sm:$0xf] }
  0x54   :  { %1218 = vmatpush.bf16.msrb.mxu0 %v2656_v47  ;;  %v2608_v19 = vor.u32 %v3657_v16, %v2605_v17  ;;  %v2733_v20 = vld [vmem:[%s5914_s6 + $0x110] sm:$0xf0]  ;;  %v3725_v22 = vld [vmem:[%s5914_s6 + $0x224] sm:$0xf]  ;;  %v3684_v12 = vld [vmem:[%s5914_s6 + $0xd4] sm:$0xf0] }
  0x55   :  { %1231 = vmatpush.bf16.msrb.mxu1 %v2784_v49  ;;  %v2736_v21 = vor.u32 %v3689_v18, %v2733_v20  ;;  %v2877_v23 = vld [vmem:[%s5914_s6 + $0x230] sm:$0xf0]  ;;  %v3757_v25 = vld [vmem:[%s5914_s6 + $0x324] sm:$0xf]  ;;  %v2835_v14 = vld [vmem:[%s5914_s6 + $0x1c8] sm:$0xf]  ;;  %v2708_v20 = vor.u32 %v3684_v12, %v2707_v11 }
  0x56   :  { %1244 = vmatpush.bf16.msrb.mxu2 %v2912_v1  ;;  %v2880_v24 = vor.u32 %v3725_v22, %v2877_v23  ;;  %v3005_v26 = vld [vmem:[%s5914_s6 + $0x330] sm:$0xf0]  ;;  %v3721_v28 = vld [vmem:[%s5914_s6 + $0x204] sm:$0xf]  ;;  %v3752_v22 = vld [vmem:[%s5914_s6 + $0x2f4] sm:$0xf0] }
  0x57   :  { %1257 = vmatpush.bf16.msrb.mxu3 %v3040_v3  ;;  %v3008_v27 = vor.u32 %v3757_v25, %v3005_v26  ;;  %v2861_v29 = vld [vmem:[%s5914_s6 + $0x210] sm:$0xf0]  ;;  %v3753_v32 = vld [vmem:[%s5914_s6 + $0x304] sm:$0xf]  ;;  %v3720_v3 = vld [vmem:[%s5914_s6 + $0x1f4] sm:$0xf0] }
  0x58   :  { %1219 = vmatpush.bf16.msrb.mxu0 %v2640_v59  ;;  %v2864_v31 = vor.u32 %v3721_v28, %v2861_v29  ;;  %v2989_v33 = vld [vmem:[%s5914_s6 + $0x310] sm:$0xf0]  ;;  %v2852_v10 = vor.u32 %v3720_v3, %v2851_v2  ;;  %v3107_v23 = vld [vmem:[%s5914_s6 + $0x3e8] sm:$0xf]  ;;  %v3680_v29 = vld [vmem:[%s5914_s6 + $0xb4] sm:$0xf0] }
  0x59   :  { %1232 = vmatpush.bf16.msrb.mxu1 %v2768_v61  ;;  %v2992_v34 = vor.u32 %v3753_v32, %v2989_v33  ;;  %v2691_v28 = vld [vmem:[%s5914_s6 + $0xa8] sm:$0xf]  ;;  %v3712_v32 = vld [vmem:[%s5914_s6 + $0x1b4] sm:$0xf0] }
  0x5a   :  { %1245 = vmatpush.bf16.msrb.mxu2 %v2896_v13  ;;  %v3672_v63 = vld [vmem:[%s5914_s6 + $0x74] sm:$0xf0]  ;;  %v2787_v0 = vld [vmem:[%s5914_s6 + $0x168] sm:$0xf] }
  0x5b   :  { %1258 = vmatpush.bf16.msrb.mxu3 %v3024_v15  ;;  %v3716_v15 = vld [vmem:[%s5914_s6 + $0x1d4] sm:$0xf0]  ;;  %v2643_v11 = vld [vmem:[%s5914_s6 + $0x48] sm:$0xf] }
  0x5c   :  { %1220 = vmatpush.bf16.msrb.mxu0 %v2624_v6  ;;  %v235_v6 = vperm.slane %v231_v51, 2  ;;  %v2836_v26 = vor.u32 %v3716_v15, %v2835_v14  ;;  %v3668_v12 = vld [vmem:[%s5914_s6 + $0x54] sm:$0xf0]  ;;  %v2771_v14 = vld [vmem:[%s5914_s6 + $0x148] sm:$0xf] }
  0x5d   :  { %1233 = vmatpush.bf16.msrb.mxu1 %v2752_v9  ;;  %v236_v9 = vperm.slane %v231_v51, 3  ;;  %v3708_v51 = vld [vmem:[%s5914_s6 + $0x194] sm:$0xf0] }
  0x5e   :  { %1246 = vmatpush.bf16.msrb.mxu2 %v2880_v24  ;;  %v3700_v15 = vld [vmem:[%s5914_s6 + $0x154] sm:$0xf0] }
  0x5f   :  { %1259 = vmatpush.bf16.msrb.mxu3 %v3008_v27  ;;  %v3784_v27 = vld [vmem:[%s5914_s6 + $0x3f4] sm:$0xf0] }
  0x60   :  { %1221 = vmatpush.bf16.msrb.mxu0 %v2608_v19 }
  0x61   :  { %1234 = vmatpush.bf16.msrb.mxu1 %v2736_v21  ;;  %v2979_v21 = vld [vmem:[%s5914_s6 + $0x2e8] sm:$0xf] }
  0x62   :  { %1247 = vmatpush.bf16.msrb.mxu2 %v2864_v31  ;;  %v2819_v31 = vld [vmem:[%s5914_s6 + $0x1a8] sm:$0xf] }
  0x63   :  { %1260 = vmatpush.bf16.msrb.mxu3 %v2992_v34  ;;  %v2980_v34 = vor.u32 %v3752_v22, %v2979_v21  ;;  %v2772_v21 = vor.u32 %v3700_v15, %v2771_v14  ;;  %v3043_v22 = vld [vmem:[%s5914_s6 + $0x368] sm:$0xf]  ;;  %v3678_v14 = vld [vmem:[%s5914_s6 + $0xac] sm:$0xf] }
  0x90   :  { %v172_v36 = vpop.f32.mrf.mxu0 }
  0x91   :  { %v185_v37 = vpop.f32.mrf.mxu1  ;;  %v4645_v42 = vadd.f32 %v172_v36, %v71_v38  ;;  %v3108_v36 = vor.u32 %v3784_v27, %v3107_v23  ;;  %v2963_v38 = vld [vmem:[%s5914_s6 + $0x2c8] sm:$0xf]  ;;  %v3768_v23 = vld [vmem:[%s5914_s6 + $0x374] sm:$0xf0] }
  0x92   :  { %v4643_v39 = vadd.f32 %v185_v37, %v72_v35  ;;  %v2692_v37 = vor.u32 %v3680_v29, %v2691_v28  ;;  %v3696_v27 = vld [vmem:[%s5914_s6 + $0x134] sm:$0xf0]  ;;  %v3044_v29 = vor.u32 %v3768_v23, %v3043_v22  ;;  %v3746_v22 = vld [vmem:[%s5914_s6 + $0x2cc] sm:$0xf]  ;;  %v2965_v23 = vld [vmem:[%s5914_s6 + $0x2d8] sm:$0xf0] }
  0x94   :  { %v2368_v43 = vrot.slane %v4643_v39, 6 }
  0x96   :  { %v2372_v53 = vsel %vm2371_vm1, %v4645_v42, %v2368_v43 }
  0x98   :  { %v198_v44 = vpop.f32.mrf.mxu2  ;;  %v174_v47 = vpop.f32.mrf.mxu0 }
  0x99   :  { %v4648_v45 = vadd.f32 %v198_v44, %v73_v40  ;;  %v211_v46 = vpop.f32.mrf.mxu3  ;;  %v187_v49 = vpop.f32.mrf.mxu1  ;;  %v3748_v40 = vld [vmem:[%s5914_s6 + $0x2d4] sm:$0xf0]  ;;  %v2820_v44 = vor.u32 %v3712_v32, %v2819_v31  ;;  %v2675_v47 = vld [vmem:[%s5914_s6 + $0x88] sm:$0xf] }
  0x9a   :  { %v4650_v48 = vadd.f32 %v211_v46, %v74_v41  ;;  %v3091_v41 = vld [vmem:[%s5914_s6 + $0x3c8] sm:$0xf]  ;;  %v3780_v46 = vld [vmem:[%s5914_s6 + $0x3d4] sm:$0xf0] }
  0x9b   :  { %v2369_v50 = vrot.slane %v4648_v45, 4  ;;  %v3676_v49 = vld [vmem:[%s5914_s6 + $0x94] sm:$0xf0]  ;;  %v3027_v32 = vld [vmem:[%s5914_s6 + $0x348] sm:$0xf] }
  0x9c   :  { %v2370_v52 = vrot.slane %v4650_v48, 2  ;;  %v3732_v31 = vld [vmem:[%s5914_s6 + $0x254] sm:$0xf0] }
  0x9e   :  { %v2374_v55 = vsel %vm2373_vm2, %v2369_v50, %v2370_v52  ;;  %v2803_v50 = vld [vmem:[%s5914_s6 + $0x188] sm:$0xf] }
  0x9f   :  { %v2376_v57 = vsel %vm2375_vm3, %v2372_v53, %v2374_v55  ;;  %v2964_v53 = vor.u32 %v3748_v40, %v2963_v38  ;;  %v3092_v55 = vor.u32 %v3780_v46, %v3091_v41  ;;  %v3660_v38 = vld [vmem:[%s5914_s6 + $0x14] sm:$0xf0]  ;;  %v2739_v40 = vld [vmem:[%s5914_s6 + $0x108] sm:$0xf] }
  0xa0   :  { %v200_v58 = vpop.f32.mrf.mxu2  ;;  %v333_v60 = vpop.f32.mrf.mxu0  ;;  %2378 = vst [vmem:[#allocation3] sm:$0xff] %v2376_v57  ;;  %v2947_v57 = vld [vmem:[%s5914_s6 + $0x2a8] sm:$0xf]  ;;  %v3692_v41 = vld [vmem:[%s5914_s6 + $0x114] sm:$0xf0] }
  0xa1   :  { %v213_v59 = vpop.f32.mrf.mxu3  ;;  %v334_v61 = vadd.f32 %v333_v60, %v233_v54  ;;  %v346_v62 = vpop.f32.mrf.mxu1  ;;  %v3744_v58 = vld [vmem:[%s5914_s6 + $0x2b4] sm:$0xf0]  ;;  %v3075_v60 = vld [vmem:[%s5914_s6 + $0x3a8] sm:$0xf] }
  0xa2   :  { %v347_v1 = vadd.f32 %v346_v62, %v234_v56  ;;  %v2676_v56 = vor.u32 %v3676_v49, %v2675_v47  ;;  %v2804_v59 = vor.u32 %v3708_v51, %v2803_v50  ;;  %v2659_v62 = vld [vmem:[%s5914_s6 + $0x68] sm:$0xf]  ;;  %v2948_v2 = vor.u32 %v3744_v58, %v2947_v57  ;;  %v2725_v47 = vld [vmem:[%s5914_s6 + $0xf8] sm:$0xf0]  ;;  %v3718_v49 = vld [vmem:[%s5914_s6 + $0x1ec] sm:$0xf] }
  0xa3   :  { %v376_v4 = vmax.f32 %v334_v61, 0.0  ;;  %v3776_v61 = vld [vmem:[%s5914_s6 + $0x3b4] sm:$0xf0]  ;;  %v2853_v50 = vld [vmem:[%s5914_s6 + $0x1f8] sm:$0xf0] }
  0xa4   :  { %v377_v5 = vmax.f32 %v347_v1, 0.0  ;;  %v3704_v1 = vld [vmem:[%s5914_s6 + $0x174] sm:$0xf0]  ;;  %v3076_v3 = vor.u32 %v3776_v61, %v3075_v60  ;;  %v3682_v60 = vld [vmem:[%s5914_s6 + $0xcc] sm:$0xf] }
  0xa5   :  { %v4673_v8 = vpack.c.bf16 %v376_v4, %v376_v4  ;;  %v2931_v4 = vld [vmem:[%s5914_s6 + $0x288] sm:$0xf]  ;;  %v3760_v57 = vld [vmem:[%s5914_s6 + $0x334] sm:$0xf0] }
  0xa6   :  { %v4681_v13 = vpack.c.bf16 %v377_v5, %v377_v5  ;;  %v3740_v5 = vld [vmem:[%s5914_s6 + $0x294] sm:$0xf0] }
  0xa7   :  { %1170 = vmatmul.bf16.vlgmr.msra.gmra.mxu0 %v4673_v8 }
  0xa8   :  { %v359_v16 = vpop.f32.mrf.mxu2  ;;  %1183 = vmatmul.bf16.vlgmr.msra.gmra.mxu1 %v4681_v13  ;;  %1266 = vmatpush.bf16.msra.mxu0 %v2724_v7  ;;  %v335_v19 = vpop.f32.mrf.mxu0  ;;  %v2788_v7 = vor.u32 %v3704_v1, %v2787_v0  ;;  %v2837_v0 = vld [vmem:[%s5914_s6 + $0x1d8] sm:$0xf0] }
  0xa9   :  { %v360_v17 = vadd.f32 %v359_v16, %v235_v6  ;;  %v372_v18 = vpop.f32.mrf.mxu3  ;;  %1279 = vmatpush.bf16.msra.mxu1 %v2852_v10  ;;  %v348_v25 = vpop.f32.mrf.mxu1  ;;  %v2660_v6 = vor.u32 %v3672_v63, %v2659_v62  ;;  %v3772_v10 = vld [vmem:[%s5914_s6 + $0x394] sm:$0xf0]  ;;  %v2932_v16 = vor.u32 %v3740_v5, %v2931_v4  ;;  %v2709_v62 = vld [vmem:[%s5914_s6 + $0xd8] sm:$0xf0]  ;;  %v3714_v63 = vld [vmem:[%s5914_s6 + $0x1cc] sm:$0xf] }
  0xaa   :  { %v373_v24 = vadd.f32 %v372_v18, %v236_v9  ;;  %v3059_v9 = vld [vmem:[%s5914_s6 + $0x388] sm:$0xf]  ;;  %v3736_v19 = vld [vmem:[%s5914_s6 + $0x274] sm:$0xf0] }
  0xab   :  { %v378_v30 = vmax.f32 %v360_v17, 0.0  ;;  %v3060_v17 = vor.u32 %v3772_v10, %v3059_v9  ;;  %v2915_v18 = vld [vmem:[%s5914_s6 + $0x268] sm:$0xf]  ;;  %v3664_v25 = vld [vmem:[%s5914_s6 + $0x34] sm:$0xf0]  ;;  %v2712_v9 = vor.u32 %v3682_v60, %v2709_v62  ;;  %v2840_v10 = vor.u32 %v3714_v63, %v2837_v0 }
  0xac   :  { %v379_v33 = vmax.f32 %v373_v24, 0.0  ;;  %1267 = vmatpush.bf16.msra.mxu0 %v2708_v20  ;;  %v2644_v20 = vor.u32 %v3668_v12, %v2643_v11  ;;  %v2627_v24 = vld [vmem:[%s5914_s6 + $0x28] sm:$0xf]  ;;  %v2916_v28 = vor.u32 %v3736_v19, %v2915_v18  ;;  %v3756_v5 = vld [vmem:[%s5914_s6 + $0x314] sm:$0xf0] }
  0xad   :  { %v4715_v35 = vpack.c.bf16 %v378_v30, %v378_v30  ;;  %1280 = vmatpush.bf16.msra.mxu1 %v2836_v26  ;;  %v2755_v26 = vld [vmem:[%s5914_s6 + $0x128] sm:$0xf]  ;;  %v3782_v11 = vld [vmem:[%s5914_s6 + $0x3ec] sm:$0xf]  ;;  %v3109_v12 = vld [vmem:[%s5914_s6 + $0x3f8] sm:$0xf0] }
  0xae   :  { %v4726_v43 = vpack.c.bf16 %v379_v33, %v379_v33  ;;  %v2899_v30 = vld [vmem:[%s5914_s6 + $0x248] sm:$0xf]  ;;  %v2628_v33 = vor.u32 %v3664_v25, %v2627_v24  ;;  %v2821_v18 = vld [vmem:[%s5914_s6 + $0x1b8] sm:$0xf0]  ;;  %v3698_v60 = vld [vmem:[%s5914_s6 + $0x14c] sm:$0xf] }
  0xaf   :  { %1196 = vmatmul.bf16.vlgmr.msra.gmra.mxu2 %v4715_v35  ;;  %v2900_v46 = vor.u32 %v3732_v31, %v2899_v30  ;;  %v2995_v4 = vld [vmem:[%s5914_s6 + $0x308] sm:$0xf]  ;;  %v3706_v30 = vld [vmem:[%s5914_s6 + $0x18c] sm:$0xf]  ;;  %v2805_v31 = vld [vmem:[%s5914_s6 + $0x198] sm:$0xf0] }
  0xb0   :  { %1209 = vmatmul.bf16.vlgmr.msra.gmra.mxu3 %v4726_v43  ;;  %1292 = vmatpush.bf16.msra.mxu2 %v2980_v34  ;;  %v361_v52 = vpop.f32.mrf.mxu2  ;;  %v2756_v34 = vor.u32 %v3696_v27, %v2755_v26  ;;  %v2996_v19 = vor.u32 %v3756_v5, %v2995_v4  ;;  %v3778_v26 = vld [vmem:[%s5914_s6 + $0x3cc] sm:$0xf]  ;;  %v3093_v27 = vld [vmem:[%s5914_s6 + $0x3d8] sm:$0xf0] }
  0xb1   :  { %1305 = vmatpush.bf16.msra.mxu3 %v3108_v36  ;;  %v374_v54 = vpop.f32.mrf.mxu3  ;;  %1268 = vmatpush.bf16.msra.mxu0 %v2692_v37  ;;  %v3764_v36 = vld [vmem:[%s5914_s6 + $0x354] sm:$0xf0]  ;;  %v2611_v37 = vld [vmem:[%s5914_s6 + $0x8] sm:$0xf]  ;;  %v3734_v0 = vld [vmem:[%s5914_s6 + $0x26c] sm:$0xf] }
  0xb2   :  { %1281 = vmatpush.bf16.msra.mxu1 %v2820_v44  ;;  %v3686_v44 = vld [vmem:[%s5914_s6 + $0xec] sm:$0xf]  ;;  %v3028_v51 = vor.u32 %v3764_v36, %v3027_v32  ;;  %v2883_v52 = vld [vmem:[%s5914_s6 + $0x228] sm:$0xf]  ;;  %v2612_v54 = vor.u32 %v3660_v38, %v2611_v37  ;;  %v2968_v32 = vor.u32 %v3746_v22, %v2965_v23  ;;  %v2949_v36 = vld [vmem:[%s5914_s6 + $0x2b8] sm:$0xf0]  ;;  %v2808_v38 = vor.u32 %v3706_v30, %v2805_v31 }
  0xb3   :  { %v2728_v58 = vor.u32 %v3686_v44, %v2725_v47  ;;  %v3670_v44 = vld [vmem:[%s5914_s6 + $0x6c] sm:$0xf]  ;;  %v3045_v5 = vld [vmem:[%s5914_s6 + $0x378] sm:$0xf0] }
  0xb4   :  { %1293 = vmatpush.bf16.msra.mxu2 %v2964_v53  ;;  %v3728_v53 = vld [vmem:[%s5914_s6 + $0x234] sm:$0xf0]  ;;  %v3702_v47 = vld [vmem:[%s5914_s6 + $0x16c] sm:$0xf]  ;;  %v2741_v23 = vld [vmem:[%s5914_s6 + $0x118] sm:$0xf0] }
  0xb5   :  { %1306 = vmatpush.bf16.msra.mxu3 %v3092_v55  ;;  %1269 = vmatpush.bf16.msra.mxu0 %v2676_v56  ;;  %v2740_v55 = vor.u32 %v3692_v41, %v2739_v40  ;;  %v3011_v56 = vld [vmem:[%s5914_s6 + $0x328] sm:$0xf]  ;;  %v2884_v61 = vor.u32 %v3728_v53, %v2883_v52  ;;  %v3774_v40 = vld [vmem:[%s5914_s6 + $0x3ac] sm:$0xf]  ;;  %v3077_v41 = vld [vmem:[%s5914_s6 + $0x3b8] sm:$0xf0] }
  0xb6   :  { %1282 = vmatpush.bf16.msra.mxu1 %v2804_v59  ;;  %v2856_v59 = vor.u32 %v3718_v49, %v2853_v50  ;;  %v3012_v1 = vor.u32 %v3760_v57, %v3011_v56  ;;  %v2789_v49 = vld [vmem:[%s5914_s6 + $0x178] sm:$0xf0]  ;;  %v3738_v52 = vld [vmem:[%s5914_s6 + $0x28c] sm:$0xf] }
  0xb7   :  { %1222 = vmatmul.bf16.vlgmr.msrb.gmra.mxu0 %v4673_v8  ;;  %v2933_v53 = vld [vmem:[%s5914_s6 + $0x298] sm:$0xf0]  ;;  %v3770_v56 = vld [vmem:[%s5914_s6 + $0x38c] sm:$0xf] }
  0xb8   :  { %1294 = vmatpush.bf16.msra.mxu2 %v2948_v2  ;;  %1235 = vmatmul.bf16.vlgmr.msrb.gmra.mxu1 %v4681_v13  ;;  %v2867_v2 = vld [vmem:[%s5914_s6 + $0x208] sm:$0xf]  ;;  %v3061_v57 = vld [vmem:[%s5914_s6 + $0x398] sm:$0xf0]  ;;  %v2936_v62 = vor.u32 %v3738_v52, %v2933_v53  ;;  %v3766_v4 = vld [vmem:[%s5914_s6 + $0x36c] sm:$0xf] }
  0xb9   :  { %1307 = vmatpush.bf16.msra.mxu3 %v3076_v3  ;;  %1270 = vmatpush.bf16.msra.mxu0 %v2660_v6  ;;  %v3724_v3 = vld [vmem:[%s5914_s6 + $0x214] sm:$0xf0]  ;;  %v3750_v6 = vld [vmem:[%s5914_s6 + $0x2ec] sm:$0xf]  ;;  %v3064_v63 = vor.u32 %v3770_v56, %v3061_v57  ;;  %v2885_v31 = vld [vmem:[%s5914_s6 + $0x238] sm:$0xf0] }
  0xba   :  { %1283 = vmatpush.bf16.msra.mxu1 %v2788_v7  ;;  %v2981_v7 = vld [vmem:[%s5914_s6 + $0x2f8] sm:$0xf0]  ;;  %v2868_v15 = vor.u32 %v3724_v3, %v2867_v2  ;;  %v3690_v22 = vld [vmem:[%s5914_s6 + $0x10c] sm:$0xf] }
  0xbb   :  { %v3726_v30 = vld [vmem:[%s5914_s6 + $0x22c] sm:$0xf]  ;;  %v2997_v53 = vld [vmem:[%s5914_s6 + $0x318] sm:$0xf0] }
  0xbc   :  { %1295 = vmatpush.bf16.msra.mxu2 %v2932_v16  ;;  %v2693_v16 = vld [vmem:[%s5914_s6 + $0xb8] sm:$0xf0]  ;;  %v3754_v52 = vld [vmem:[%s5914_s6 + $0x30c] sm:$0xf] }
  0xbd   :  { %1308 = vmatpush.bf16.msra.mxu3 %v3060_v17  ;;  %1271 = vmatpush.bf16.msra.mxu0 %v2644_v20  ;;  %v3710_v17 = vld [vmem:[%s5914_s6 + $0x1ac] sm:$0xf]  ;;  %v2984_v20 = vor.u32 %v3750_v6, %v2981_v7  ;;  %v2696_v24 = vor.u32 %v3678_v14, %v2693_v16  ;;  %v2629_v7 = vld [vmem:[%s5914_s6 + $0x38] sm:$0xf0] }
  0xbe   :  { %1284 = vmatpush.bf16.msra.mxu1 %v2772_v21  ;;  %v3112_v21 = vor.u32 %v3782_v11, %v3109_v12  ;;  %v2824_v25 = vor.u32 %v3710_v17, %v2821_v18  ;;  %v3662_v6 = vld [vmem:[%s5914_s6 + $0x2c] sm:$0xf]  ;;  %v3048_v12 = vor.u32 %v3766_v4, %v3045_v5  ;;  %v3307_v5 = vld [vmem:[%s5916_s8 + $0x180] sm:$0xf] }
  0xbf   :  { %1248 = vmatmul.bf16.vlgmr.msrb.gmra.mxu2 %v4715_v35  ;;  %v3730_v14 = vld [vmem:[%s5914_s6 + $0x24c] sm:$0xf]  ;;  %v2632_v17 = vor.u32 %v3662_v6, %v2629_v7  ;;  %v3835_v6 = vld [vmem:[%s5916_s8 + $0x18c] sm:$0xf0] }
  0xc0   :  { %1261 = vmatmul.bf16.vlgmr.msrb.gmra.mxu3 %v4726_v43  ;;  %1296 = vmatpush.bf16.msra.mxu2 %v2916_v28  ;;  %v3674_v28 = vld [vmem:[%s5914_s6 + $0x8c] sm:$0xf] }
  0xc1   :  { %1309 = vmatpush.bf16.msra.mxu3 %v3044_v29  ;;  %1272 = vmatpush.bf16.msra.mxu0 %v2628_v33  ;;  %v2677_v29 = vld [vmem:[%s5914_s6 + $0x98] sm:$0xf0]  ;;  %v3096_v33 = vor.u32 %v3778_v26, %v3093_v27  ;;  %v3762_v16 = vld [vmem:[%s5914_s6 + $0x34c] sm:$0xf]  ;;  %v3815_v26 = vld [vmem:[%s5916_s8 + $0xec] sm:$0xf0] }
  0xc2   :  { %1285 = vmatpush.bf16.msra.mxu1 %v2756_v34  ;;  %v3742_v34 = vld [vmem:[%s5914_s6 + $0x2ac] sm:$0xf]  ;;  %v2680_v37 = vor.u32 %v3674_v28, %v2677_v29  ;;  %v3355_v27 = vld [vmem:[%s5916_s8 + $0x1e0] sm:$0xf]  ;;  %v3847_v28 = vld [vmem:[%s5916_s8 + $0x1ec] sm:$0xf0] }
  0xc3   :  { %v2952_v50 = vor.u32 %v3742_v34, %v2949_v36  ;;  %v3758_v34 = vld [vmem:[%s5914_s6 + $0x32c] sm:$0xf]  ;;  %v3013_v36 = vld [vmem:[%s5914_s6 + $0x338] sm:$0xf0] }
  0xc4   :  { %1297 = vmatpush.bf16.msra.mxu2 %v2900_v46  ;;  %v2661_v46 = vld [vmem:[%s5914_s6 + $0x78] sm:$0xf0] }
  0xc5   :  { %1310 = vmatpush.bf16.msra.mxu3 %v3028_v51  ;;  %1273 = vmatpush.bf16.msra.mxu0 %v2612_v54  ;;  %v3080_v51 = vor.u32 %v3774_v40, %v3077_v41  ;;  %v2664_v54 = vor.u32 %v3670_v44, %v2661_v46  ;;  %v3356_v40 = vor.u32 %v3847_v28, %v3355_v27  ;;  %v3811_v44 = vld [vmem:[%s5916_s8 + $0xcc] sm:$0xf0]  ;;  %v3339_v46 = vld [vmem:[%s5916_s8 + $0x1c0] sm:$0xf]  ;;  %v3813_v27 = vld [vmem:[%s5916_s8 + $0xe4] sm:$0xf] }
  0xc6   :  { %1286 = vmatpush.bf16.msra.mxu1 %v2740_v55  ;;  %v2792_v55 = vor.u32 %v3702_v47, %v2789_v49  ;;  %v2888_v41 = vor.u32 %v3726_v30, %v2885_v31  ;;  %v3843_v47 = vld [vmem:[%s5916_s8 + $0x1cc] sm:$0xf0]  ;;  %v3016_v49 = vor.u32 %v3758_v34, %v3013_v36  ;;  %v3229_v28 = vld [vmem:[%s5916_s8 + $0xf0] sm:$0xf0]  ;;  %v3809_v31 = vld [vmem:[%s5916_s8 + $0xc4] sm:$0xf] }
  0xc7   :  { %v3340_v57 = vor.u32 %v3843_v47, %v3339_v46  ;;  %v3232_v30 = vor.u32 %v3813_v27, %v3229_v28  ;;  %v3805_v34 = vld [vmem:[%s5916_s8 + $0xa4] sm:$0xf]  ;;  %v3197_v36 = vld [vmem:[%s5916_s8 + $0xb0] sm:$0xf0]  ;;  %v3871_v46 = vld [vmem:[%s5916_s8 + $0x2ac] sm:$0xf0] }
  0xc8   :  { %1298 = vmatpush.bf16.msra.mxu2 %v2884_v61  ;;  %1274 = vmatmul.bf16.vlgmr.msra.gmra.mxu0 %v4673_v8  ;;  %v2773_v61 = vld [vmem:[%s5914_s6 + $0x158] sm:$0xf0]  ;;  %v3801_v47 = vld [vmem:[%s5916_s8 + $0x84] sm:$0xf]  ;;  %v3611_v27 = vld [vmem:[%s5916_s8 + $0x3e0] sm:$0xf] }
  0xc9   :  { %1318 = vmatpush.bf16.msrb.mxu0 %v2728_v58  ;;  %1311 = vmatpush.bf16.msra.mxu3 %v3012_v1  ;;  %v3666_v58 = vld [vmem:[%s5914_s6 + $0x4c] sm:$0xf]  ;;  %v2917_v1 = vld [vmem:[%s5914_s6 + $0x278] sm:$0xf0]  ;;  %v2776_v3 = vor.u32 %v3698_v60, %v2773_v61  ;;  %v3807_v60 = vld [vmem:[%s5916_s8 + $0xac] sm:$0xf0]  ;;  %v3000_v61 = vor.u32 %v3754_v52, %v2997_v53 }
  0xca   :  { %1331 = vmatpush.bf16.msrb.mxu1 %v2856_v59  ;;  %v2645_v59 = vld [vmem:[%s5914_s6 + $0x58] sm:$0xf0]  ;;  %v2920_v11 = vor.u32 %v3734_v0, %v2917_v1  ;;  %v3467_v1 = vld [vmem:[%s5916_s8 + $0x2c0] sm:$0xf]  ;;  %v3819_v53 = vld [vmem:[%s5916_s8 + $0x10c] sm:$0xf0] }
  0xcb   :  { %1287 = vmatmul.bf16.vlgmr.msra.gmra.mxu1 %v4681_v13  ;;  %v2648_v2 = vor.u32 %v3666_v58, %v2645_v59  ;;  %v3195_v59 = vld [vmem:[%s5916_s8 + $0xa0] sm:$0xf] }
  0xcc   :  { %1299 = vmatpush.bf16.msra.mxu2 %v2868_v15  ;;  %v2901_v15 = vld [vmem:[%s5914_s6 + $0x258] sm:$0xf0]  ;;  %v3243_v52 = vld [vmem:[%s5916_s8 + $0x100] sm:$0xf] }
  0xcd   :  { %1319 = vmatpush.bf16.msrb.mxu0 %v2712_v9  ;;  %1312 = vmatpush.bf16.msra.mxu3 %v2996_v19  ;;  %v3694_v9 = vld [vmem:[%s5914_s6 + $0x12c] sm:$0xf]  ;;  %v3029_v19 = vld [vmem:[%s5914_s6 + $0x358] sm:$0xf0] }
  0xce   :  { %1332 = vmatpush.bf16.msrb.mxu1 %v2840_v10  ;;  %v2757_v10 = vld [vmem:[%s5914_s6 + $0x138] sm:$0xf0]  ;;  %v3032_v29 = vor.u32 %v3762_v16, %v3029_v19  ;;  %v3795_v16 = vld [vmem:[%s5916_s8 + $0x4c] sm:$0xf0] }
  0xcf   :  { %1300 = vmatmul.bf16.vlgmr.msra.gmra.mxu2 %v4715_v35  ;;  %v2760_v18 = vor.u32 %v3694_v9, %v2757_v10  ;;  %v3163_v10 = vld [vmem:[%s5916_s8 + $0x60] sm:$0xf]  ;;  %v3827_v19 = vld [vmem:[%s5916_s8 + $0x14c] sm:$0xf0] }
  0xd0   :  { %1344 = vmatpush.bf16.msrb.mxu2 %v2984_v20  ;;  %1313 = vmatmul.bf16.vlgmr.msra.gmra.mxu3 %v4726_v43  ;;  %v3658_v20 = vld [vmem:[%s5914_s6 + $0xc] sm:$0xf] }
  0xd1   :  { %1357 = vmatpush.bf16.msrb.mxu3 %v3112_v21  ;;  %1320 = vmatpush.bf16.msrb.mxu0 %v2696_v24  ;;  %v2613_v21 = vld [vmem:[%s5914_s6 + $0x18] sm:$0xf0]  ;;  %v3227_v24 = vld [vmem:[%s5916_s8 + $0xe0] sm:$0xf] }
  0xd2   :  { %1333 = vmatpush.bf16.msrb.mxu1 %v2824_v25  ;;  %v2904_v25 = vor.u32 %v3730_v14, %v2901_v15  ;;  %v3291_v14 = vld [vmem:[%s5916_s8 + $0x160] sm:$0xf] }
  0xd3   :  { %v3147_v15 = vld [vmem:[%s5916_s8 + $0x40] sm:$0xf] }
  0xd4   :  { %1345 = vmatpush.bf16.msrb.mxu2 %v2968_v32  ;;  %v2616_v32 = vor.u32 %v3658_v20, %v2613_v21  ;;  %v3148_v20 = vor.u32 %v3795_v16, %v3147_v15  ;;  %v3131_v21 = vld [vmem:[%s5916_s8 + $0x20] sm:$0xf] }
  0xd5   :  { %1358 = vmatpush.bf16.msrb.mxu3 %v3096_v33  ;;  %1321 = vmatpush.bf16.msrb.mxu0 %v2680_v37  ;;  %v2744_v33 = vor.u32 %v3690_v22, %v2741_v23  ;;  %v3228_v37 = vor.u32 %v3815_v26, %v3227_v24  ;;  %v3791_v22 = vld [vmem:[%s5916_s8 + $0x2c] sm:$0xf0]  ;;  %v3387_v16 = vld [vmem:[%s5916_s8 + $0x220] sm:$0xf] }
  0xd6   :  { %1334 = vmatpush.bf16.msrb.mxu1 %v2808_v38  ;;  %v3211_v38 = vld [vmem:[%s5916_s8 + $0xc0] sm:$0xf]  ;;  %v3132_v24 = vor.u32 %v3791_v22, %v3131_v21  ;;  %v3787_v26 = vld [vmem:[%s5916_s8 + $0xc] sm:$0xf0]  ;;  %v3833_v21 = vld [vmem:[%s5916_s8 + $0x184] sm:$0xf] }
  0xd7   :  { %v3212_v56 = vor.u32 %v3811_v44, %v3211_v38  ;;  %v3259_v38 = vld [vmem:[%s5916_s8 + $0x120] sm:$0xf] }
  0xd8   :  { %1346 = vmatpush.bf16.msrb.mxu2 %v2952_v50  ;;  %v3722_v50 = vld [vmem:[%s5914_s6 + $0x20c] sm:$0xf] }
  0xd9   :  { %1359 = vmatpush.bf16.msrb.mxu3 %v3080_v51  ;;  %1322 = vmatpush.bf16.msrb.mxu0 %v2664_v54  ;;  %v2869_v51 = vld [vmem:[%s5914_s6 + $0x218] sm:$0xf0]  ;;  %v3483_v54 = vld [vmem:[%s5916_s8 + $0x2e0] sm:$0xf] }
  0xda   :  { %1335 = vmatpush.bf16.msrb.mxu1 %v2792_v55  ;;  %v3879_v55 = vld [vmem:[%s5916_s8 + $0x2ec] sm:$0xf0]  ;;  %v2872_v58 = vor.u32 %v3722_v50, %v2869_v51 }
  0xdb   :  { %v3484_v0 = vor.u32 %v3879_v55, %v3483_v54  ;;  %v3435_v54 = vld [vmem:[%s5916_s8 + $0x280] sm:$0xf]  ;;  %v3244_v55 = vor.u32 %v3819_v53, %v3243_v52 }
  0xdc   :  { %1347 = vmatpush.bf16.msrb.mxu2 %v2936_v62  ;;  %v3323_v62 = vld [vmem:[%s5916_s8 + $0x1a0] sm:$0xf] }
  0xdd   :  { %1360 = vmatpush.bf16.msrb.mxu3 %v3064_v63  ;;  %1323 = vmatpush.bf16.msrb.mxu0 %v2648_v2  ;;  %v3839_v63 = vld [vmem:[%s5916_s8 + $0x1ac] sm:$0xf0]  ;;  %v3196_v2 = vor.u32 %v3807_v60, %v3195_v59  ;;  %v3165_v59 = vld [vmem:[%s5916_s8 + $0x70] sm:$0xf0]  ;;  %v3845_v60 = vld [vmem:[%s5916_s8 + $0x1e4] sm:$0xf] }
  0xde   :  { %1336 = vmatpush.bf16.msrb.mxu1 %v2776_v3  ;;  %v3179_v3 = vld [vmem:[%s5916_s8 + $0x80] sm:$0xf]  ;;  %v3324_v4 = vor.u32 %v3839_v63, %v3323_v62  ;;  %v3357_v62 = vld [vmem:[%s5916_s8 + $0x1f0] sm:$0xf0] }
  0xdf   :  { %v3419_v63 = vld [vmem:[%s5916_s8 + $0x260] sm:$0xf] }
  0xe0   :  { %1348 = vmatpush.bf16.msrb.mxu2 %v2920_v11  ;;  %v3799_v11 = vld [vmem:[%s5916_s8 + $0x6c] sm:$0xf0]  ;;  %v5324_v52 = vld [vmem:[%s5915_s7] sm:$0xf]  ;;  %s2445_s7 = sshll.u32 %s3969_s1, 4  ;;  %s2446_s7 = int_to_ptr.vmem [resolvable:$true] %s2445_s7 }
  0xe1   :  { %1361 = vmatpush.bf16.msrb.mxu3 %v3048_v12  ;;  %1324 = vmatpush.bf16.msrb.mxu0 %v2632_v17  ;;  %v3308_v12 = vor.u32 %v3835_v6, %v3307_v5  ;;  %v3341_v5 = vld [vmem:[%s5916_s8 + $0x1d0] sm:$0xf0]  ;;  %v3579_v53 = vld [vmem:[%s5916_s8 + $0x3a0] sm:$0xf] }
  0xe2   :  { %1337 = vmatpush.bf16.msrb.mxu1 %v2760_v18  ;;  %v3275_v18 = vld [vmem:[%s5916_s8 + $0x140] sm:$0xf] }
  0xe3   :  { %v3276_v23 = vor.u32 %v3827_v19, %v3275_v18  ;;  %v3785_v19 = vld [vmem:[%s5916_s8 + $0x4] sm:$0xf] }
  0xe4   :  { %1349 = vmatpush.bf16.msrb.mxu2 %v2904_v25  ;;  %v3115_v25 = vld [vmem:[%s5916_s8] sm:$0xf] }
  0xe5   :  { %1362 = vmatpush.bf16.msrb.mxu3 %v3032_v29  ;;  %1325 = vmatpush.bf16.msrb.mxu0 %v2616_v32  ;;  %v3116_v29 = vor.u32 %v3787_v26, %v3115_v25  ;;  %v3213_v32 = vld [vmem:[%s5916_s8 + $0xd0] sm:$0xf0]  ;;  %v3371_v25 = vld [vmem:[%s5916_s8 + $0x200] sm:$0xf]  ;;  %v3851_v26 = vld [vmem:[%s5916_s8 + $0x20c] sm:$0xf0] }
  0xe6   :  { %1338 = vmatpush.bf16.msrb.mxu1 %v2744_v33  ;;  %v3216_v33 = vor.u32 %v3809_v31, %v3213_v32  ;;  %v3372_v28 = vor.u32 %v3851_v26, %v3371_v25  ;;  %v3293_v31 = vld [vmem:[%s5916_s8 + $0x170] sm:$0xf0] }
  0xe8   :  { %1350 = vmatpush.bf16.msrb.mxu2 %v2888_v41  ;;  %1326 = vmatmul.bf16.vlgmr.msrb.gmra.mxu0 %v4673_v8  ;;  %v3875_v8 = vld [vmem:[%s5916_s8 + $0x2cc] sm:$0xf0]  ;;  %v3451_v41 = vld [vmem:[%s5916_s8 + $0x2a0] sm:$0xf] }
  0xe9   :  { %2156 = vmatpush.bf16.msra.mxu0 %v3228_v37  ;;  %1363 = vmatpush.bf16.msrb.mxu3 %v3016_v49  ;;  %v3468_v7 = vor.u32 %v3875_v8, %v3467_v1  ;;  %v3200_v37 = vor.u32 %v3805_v34, %v3197_v36  ;;  %v3181_v49 = vld [vmem:[%s5916_s8 + $0x90] sm:$0xf0]  ;;  %v3452_v50 = vor.u32 %v3871_v46, %v3451_v41  ;;  %v3877_v34 = vld [vmem:[%s5916_s8 + $0x2e4] sm:$0xf] }
  0xea   :  { %2169 = vmatpush.bf16.msra.mxu1 %v3356_v40  ;;  %v3823_v40 = vld [vmem:[%s5916_s8 + $0x12c] sm:$0xf0]  ;;  %v3184_v51 = vor.u32 %v3801_v47, %v3181_v49  ;;  %v3360_v1 = vor.u32 %v3845_v60, %v3357_v62  ;;  %v3485_v36 = vld [vmem:[%s5916_s8 + $0x2f0] sm:$0xf0]  ;;  %v3873_v47 = vld [vmem:[%s5916_s8 + $0x2c4] sm:$0xf] }
  0xeb   :  { %1339 = vmatmul.bf16.vlgmr.msrb.gmra.mxu1 %v4681_v13  ;;  %v3803_v13 = vld [vmem:[%s5916_s8 + $0x8c] sm:$0xf0]  ;;  %v3260_v44 = vor.u32 %v3823_v40, %v3259_v38  ;;  %v3595_v38 = vld [vmem:[%s5916_s8 + $0x3c0] sm:$0xf]  ;;  %v3277_v46 = vld [vmem:[%s5916_s8 + $0x150] sm:$0xf0] }
  0xec   :  { %1351 = vmatpush.bf16.msrb.mxu2 %v2872_v58  ;;  %v3180_v9 = vor.u32 %v3803_v13, %v3179_v3  ;;  %v3797_v58 = vld [vmem:[%s5916_s8 + $0x64] sm:$0xf]  ;;  %v3149_v3 = vld [vmem:[%s5916_s8 + $0x50] sm:$0xf0]  ;;  %v3907_v40 = vld [vmem:[%s5916_s8 + $0x3cc] sm:$0xf0] }
  0xed   :  { %2157 = vmatpush.bf16.msra.mxu0 %v3212_v56  ;;  %1364 = vmatpush.bf16.msrb.mxu3 %v3000_v61  ;;  %v3867_v56 = vld [vmem:[%s5916_s8 + $0x28c] sm:$0xf0]  ;;  %v3168_v61 = vor.u32 %v3797_v58, %v3165_v59  ;;  %v3841_v13 = vld [vmem:[%s5916_s8 + $0x1c4] sm:$0xf]  ;;  %v3596_v41 = vor.u32 %v3907_v40, %v3595_v38  ;;  %v3261_v58 = vld [vmem:[%s5916_s8 + $0x130] sm:$0xf0] }
  0xee   :  { %2170 = vmatpush.bf16.msra.mxu1 %v3340_v57  ;;  %v3436_v57 = vor.u32 %v3867_v56, %v3435_v54  ;;  %v3344_v6 = vor.u32 %v3841_v13, %v3341_v5  ;;  %v3903_v54 = vld [vmem:[%s5916_s8 + $0x3ac] sm:$0xf0]  ;;  %v3869_v59 = vld [vmem:[%s5916_s8 + $0x2a4] sm:$0xf]  ;;  %v3453_v62 = vld [vmem:[%s5916_s8 + $0x2b0] sm:$0xf0] }
  0xef   :  { %1352 = vmatmul.bf16.vlgmr.msrb.gmra.mxu2 %v4715_v35  ;;  %v3831_v35 = vld [vmem:[%s5916_s8 + $0x16c] sm:$0xf0]  ;;  %v3580_v56 = vor.u32 %v3903_v54, %v3579_v53  ;;  %v3245_v13 = vld [vmem:[%s5916_s8 + $0x110] sm:$0xf0]  ;;  %v3849_v54 = vld [vmem:[%s5916_s8 + $0x204] sm:$0xf] }
  0xf0   :  { %2182 = vmatpush.bf16.msra.mxu2 %v3484_v0  ;;  %1365 = vmatmul.bf16.vlgmr.msrb.gmra.mxu3 %v4726_v43  ;;  %v3164_v43 = vor.u32 %v3799_v11, %v3163_v10  ;;  %v3292_v17 = vor.u32 %v3831_v35, %v3291_v14  ;;  %v3863_v0 = vld [vmem:[%s5916_s8 + $0x26c] sm:$0xf0]  ;;  %v3789_v11 = vld [vmem:[%s5916_s8 + $0x24] sm:$0xf] }
  0xf1   :  { %2158 = vmatpush.bf16.msra.mxu0 %v3196_v2  ;;  %v3420_v8 = vor.u32 %v3863_v0, %v3419_v63  ;;  %v3793_v2 = vld [vmem:[%s5916_s8 + $0x44] sm:$0xf]  ;;  %v514_v63 = vperm.slane %v5324_v52, 0  ;;  %v3456_v0 = vor.u32 %v3869_v59, %v3453_v62  ;;  %v3613_v59 = vld [vmem:[%s5916_s8 + $0x3f0] sm:$0xf0] }
  0xf2   :  { %2171 = vmatpush.bf16.msra.mxu1 %v3324_v4  ;;  %v3152_v4 = vor.u32 %v3793_v2, %v3149_v3  ;;  %v3837_v14 = vld [vmem:[%s5916_s8 + $0x1a4] sm:$0xf] }
  0xf3   :  { %v3817_v3 = vld [vmem:[%s5916_s8 + $0x104] sm:$0xf] }
  0xf4   :  { %2183 = vmatpush.bf16.msra.mxu2 %v3468_v7  ;;  %v3403_v7 = vld [vmem:[%s5916_s8 + $0x240] sm:$0xf]  ;;  %v3248_v5 = vor.u32 %v3817_v3, %v3245_v13  ;;  %v3597_v3 = vld [vmem:[%s5916_s8 + $0x3d0] sm:$0xf0] }
  0xf5   :  { %2159 = vmatpush.bf16.msra.mxu0 %v3180_v9  ;;  %v3859_v9 = vld [vmem:[%s5916_s8 + $0x24c] sm:$0xf0] }
  0xf6   :  { %2172 = vmatpush.bf16.msra.mxu1 %v3308_v12  ;;  %v3404_v10 = vor.u32 %v3859_v9, %v3403_v7  ;;  %v3133_v12 = vld [vmem:[%s5916_s8 + $0x30] sm:$0xf0] }
  0xf7   :  { %v3136_v35 = vor.u32 %v3789_v11, %v3133_v12  ;;  %v3895_v11 = vld [vmem:[%s5916_s8 + $0x36c] sm:$0xf0] }
  0xf8   :  { %2184 = vmatpush.bf16.msra.mxu2 %v3452_v50  ;;  %v3469_v50 = vld [vmem:[%s5916_s8 + $0x2d0] sm:$0xf0] }
  0xf9   :  { %2160 = vmatpush.bf16.msra.mxu0 %v3164_v43  ;;  %v3325_v43 = vld [vmem:[%s5916_s8 + $0x1b0] sm:$0xf0] }
  0xfa   :  { %2173 = vmatpush.bf16.msra.mxu1 %v3292_v17  ;;  %v3328_v15 = vor.u32 %v3837_v14, %v3325_v43  ;;  %v3855_v17 = vld [vmem:[%s5916_s8 + $0x22c] sm:$0xf0]  ;;  %v3421_v43 = vld [vmem:[%s5916_s8 + $0x270] sm:$0xf0] }
  0xfb   :  { %v3388_v18 = vor.u32 %v3855_v17, %v3387_v16 }
  0xfc   :  { %2185 = vmatpush.bf16.msra.mxu2 %v3436_v57  ;;  %v3821_v57 = vld [vmem:[%s5916_s8 + $0x124] sm:$0xf] }
  0xfd   :  { %2161 = vmatpush.bf16.msra.mxu0 %v3148_v20  ;;  %v3117_v20 = vld [vmem:[%s5916_s8 + $0x10] sm:$0xf0] }
  0xfe   :  { %2174 = vmatpush.bf16.msra.mxu1 %v3276_v23  ;;  %v3120_v22 = vor.u32 %v3785_v19, %v3117_v20  ;;  %v3309_v23 = vld [vmem:[%s5916_s8 + $0x190] sm:$0xf0]  ;;  %v3891_v19 = vld [vmem:[%s5916_s8 + $0x34c] sm:$0xf0] }
 0x100   :  { %2186 = vmatpush.bf16.msra.mxu2 %v3420_v8  ;;  %v3899_v8 = vld [vmem:[%s5916_s8 + $0x38c] sm:$0xf0] }
 0x101   :  { %2162 = vmatpush.bf16.msra.mxu0 %v3132_v24  ;;  %v3312_v24 = vor.u32 %v3833_v21, %v3309_v23  ;;  %v3857_v21 = vld [vmem:[%s5916_s8 + $0x244] sm:$0xf] }
 0x102   :  { %2175 = vmatpush.bf16.msra.mxu1 %v3260_v44  ;;  %v3825_v44 = vld [vmem:[%s5916_s8 + $0x144] sm:$0xf] }
 0x103   :  { %v3280_v49 = vor.u32 %v3825_v44, %v3277_v46  ;;  %v3219_v44 = vld [vmem:[%s5916_s8 + $0xc8] sm:$0xf] }
 0x104   :  { %2187 = vmatpush.bf16.msra.mxu2 %v3404_v10  ;;  %v3547_v10 = vld [vmem:[%s5916_s8 + $0x360] sm:$0xf] }
 0x105   :  { %2163 = vmatpush.bf16.msra.mxu0 %v3116_v29  ;;  %v3911_v29 = vld [vmem:[%s5916_s8 + $0x3ec] sm:$0xf0]  ;;  %v3548_v14 = vor.u32 %v3895_v11, %v3547_v10  ;;  %v3901_v10 = vld [vmem:[%s5916_s8 + $0x3a4] sm:$0xf]  ;;  %v3581_v11 = vld [vmem:[%s5916_s8 + $0x3b0] sm:$0xf0] }
 0x106   :  { %2176 = vmatpush.bf16.msra.mxu1 %v3244_v55  ;;  %v3612_v32 = vor.u32 %v3911_v29, %v3611_v27  ;;  %v3235_v27 = vld [vmem:[%s5916_s8 + $0xe8] sm:$0xf]  ;;  %v3887_v29 = vld [vmem:[%s5916_s8 + $0x32c] sm:$0xf0] }
 0x108   :  { %2188 = vmatpush.bf16.msra.mxu2 %v3388_v18  ;;  %2195 = vmatpush.bf16.msra.mxu3 %v3612_v32  ;;  %v3531_v18 = vld [vmem:[%s5916_s8 + $0x340] sm:$0xf]  ;;  %v3816_v32 = vld [vmem:[%s5916_s8 + $0xf4] sm:$0xf0] }
 0x109   :  { %2208 = vmatpush.bf16.msrb.mxu0 %v3232_v30  ;;  %v3829_v30 = vld [vmem:[%s5916_s8 + $0x164] sm:$0xf]  ;;  %v3532_v20 = vor.u32 %v3891_v19, %v3531_v18  ;;  %v3236_v46 = vor.u32 %v3816_v32, %v3235_v27  ;;  %v3363_v18 = vld [vmem:[%s5916_s8 + $0x1e8] sm:$0xf] }
 0x10a   :  { %2221 = vmatpush.bf16.msrb.mxu1 %v3360_v1  ;;  %v3563_v1 = vld [vmem:[%s5916_s8 + $0x380] sm:$0xf] }
 0x10b   :  { %v3564_v2 = vor.u32 %v3899_v8, %v3563_v1  ;;  %v3808_v8 = vld [vmem:[%s5916_s8 + $0xb4] sm:$0xf0] }
 0x10c   :  { %2189 = vmatpush.bf16.msra.mxu2 %v3372_v28  ;;  %2196 = vmatpush.bf16.msra.mxu3 %v3596_v41  ;;  %v3515_v28 = vld [vmem:[%s5916_s8 + $0x320] sm:$0xf]  ;;  %v515_v41 = vperm.slane %v5324_v52, 1 }
 0x10d   :  { %2209 = vmatpush.bf16.msrb.mxu0 %v3216_v33  ;;  %v3296_v33 = vor.u32 %v3829_v30, %v3293_v31 }
 0x10e   :  { %2222 = vmatpush.bf16.msrb.mxu1 %v3344_v6  ;;  %v3437_v6 = vld [vmem:[%s5916_s8 + $0x290] sm:$0xf0] }
 0x110   :  { %2197 = vmatpush.bf16.msra.mxu3 %v3580_v56  ;;  %v3909_v56 = vld [vmem:[%s5916_s8 + $0x3e4] sm:$0xf] }
 0x111   :  { %2210 = vmatpush.bf16.msrb.mxu0 %v3200_v37  ;;  %v3488_v37 = vor.u32 %v3877_v34, %v3485_v36  ;;  %v3853_v34 = vld [vmem:[%s5916_s8 + $0x224] sm:$0xf]  ;;  %v3389_v36 = vld [vmem:[%s5916_s8 + $0x230] sm:$0xf0] }
 0x112   :  { %2223 = vmatpush.bf16.msrb.mxu1 %v3328_v15  ;;  %v3392_v38 = vor.u32 %v3853_v34, %v3389_v36  ;;  %v3893_v34 = vld [vmem:[%s5916_s8 + $0x364] sm:$0xf]  ;;  %v3549_v36 = vld [vmem:[%s5916_s8 + $0x370] sm:$0xf0] }
 0x113   :  { %2234 = vmatpush.bf16.msrb.mxu2 %v3488_v37 }
 0x114   :  { %2198 = vmatpush.bf16.msra.mxu3 %v3564_v2  ;;  %v3905_v2 = vld [vmem:[%s5916_s8 + $0x3c4] sm:$0xf] }
 0x115   :  { %2211 = vmatpush.bf16.msrb.mxu0 %v3184_v51  ;;  %v3472_v51 = vor.u32 %v3873_v47, %v3469_v50  ;;  %v3812_v47 = vld [vmem:[%s5916_s8 + $0xd4] sm:$0xf0]  ;;  %v3883_v50 = vld [vmem:[%s5916_s8 + $0x30c] sm:$0xf0] }
 0x116   :  { %2224 = vmatpush.bf16.msrb.mxu1 %v3312_v24  ;;  %v3220_v62 = vor.u32 %v3812_v47, %v3219_v44  ;;  %v3139_v47 = vld [vmem:[%s5916_s8 + $0x28] sm:$0xf] }
 0x117   :  { %2235 = vmatpush.bf16.msrb.mxu2 %v3472_v51 }
 0x118   :  { %2199 = vmatpush.bf16.msra.mxu3 %v3548_v14  ;;  %v3584_v14 = vor.u32 %v3901_v10, %v3581_v11 }
 0x119   :  { %2212 = vmatpush.bf16.msrb.mxu0 %v3168_v61  ;;  %v3264_v61 = vor.u32 %v3821_v57, %v3261_v58 }
 0x11a   :  { %2225 = vmatpush.bf16.msrb.mxu1 %v3296_v33  ;;  %v3516_v33 = vor.u32 %v3887_v29, %v3515_v28  ;;  %v3155_v29 = vld [vmem:[%s5916_s8 + $0x48] sm:$0xf] }
 0x11b   :  { %2236 = vmatpush.bf16.msrb.mxu2 %v3456_v0 }
 0x11c   :  { %2200 = vmatpush.bf16.msra.mxu3 %v3532_v20  ;;  %v3848_v20 = vld [vmem:[%s5916_s8 + $0x1f4] sm:$0xf0] }
 0x11d   :  { %2213 = vmatpush.bf16.msrb.mxu0 %v3152_v4  ;;  %v3865_v4 = vld [vmem:[%s5916_s8 + $0x284] sm:$0xf]  ;;  %v3364_v28 = vor.u32 %v3848_v20, %v3363_v18  ;;  %v3880_v18 = vld [vmem:[%s5916_s8 + $0x2f4] sm:$0xf0]  ;;  %v3221_v20 = vld [vmem:[%s5916_s8 + $0xd8] sm:$0xf0] }
 0x11e   :  { %2226 = vmatpush.bf16.msrb.mxu1 %v3280_v49  ;;  %v3440_v9 = vor.u32 %v3865_v4, %v3437_v6  ;;  %v3499_v49 = vld [vmem:[%s5916_s8 + $0x300] sm:$0xf]  ;;  %v3600_v4 = vor.u32 %v3905_v2, %v3597_v3  ;;  %v3187_v6 = vld [vmem:[%s5916_s8 + $0x88] sm:$0xf]  ;;  %v3517_v2 = vld [vmem:[%s5916_s8 + $0x330] sm:$0xf0] }
 0x11f   :  { %v3500_v53 = vor.u32 %v3883_v50, %v3499_v49  ;;  %v3792_v49 = vld [vmem:[%s5916_s8 + $0x34] sm:$0xf0]  ;;  %v3331_v50 = vld [vmem:[%s5916_s8 + $0x1a8] sm:$0xf] }
 0x120   :  { %2237 = vmatpush.bf16.msrb.mxu2 %v3440_v9  ;;  %2201 = vmatpush.bf16.msra.mxu3 %v3516_v33  ;;  %v3804_v9 = vld [vmem:[%s5916_s8 + $0x94] sm:$0xf0] }
 0x121   :  { %2214 = vmatpush.bf16.msrb.mxu0 %v3136_v35  ;;  %v3861_v35 = vld [vmem:[%s5916_s8 + $0x264] sm:$0xf]  ;;  %v3844_v33 = vld [vmem:[%s5916_s8 + $0x1d4] sm:$0xf0] }
 0x122   :  { %2227 = vmatpush.bf16.msrb.mxu1 %v3264_v61  ;;  %v3424_v16 = vor.u32 %v3861_v35, %v3421_v43  ;;  %v3616_v61 = vor.u32 %v3909_v56, %v3613_v59 }
 0x124   :  { %v1171_v55 = vpop.f32.mrf.mxu0  ;;  %2238 = vmatpush.bf16.msrb.mxu2 %v3424_v16  ;;  %2202 = vmatpush.bf16.msra.mxu3 %v3500_v53  ;;  %v3171_v16 = vld [vmem:[%s5916_s8 + $0x68] sm:$0xf]  ;;  %v3840_v53 = vld [vmem:[%s5916_s8 + $0x1b4] sm:$0xf0] }
 0x125   :  { %2215 = vmatpush.bf16.msrb.mxu0 %v3120_v22  ;;  %v1184_v60 = vpop.f32.mrf.mxu1  ;;  %v1172_v7 = vadd.f32 %v1171_v55, %v514_v63  ;;  %v3405_v22 = vld [vmem:[%s5916_s8 + $0x250] sm:$0xf0]  ;;  %v3203_v63 = vld [vmem:[%s5916_s8 + $0xa8] sm:$0xf] }
 0x126   :  { %2228 = vmatpush.bf16.msrb.mxu1 %v3248_v5  ;;  %v3408_v24 = vor.u32 %v3857_v21, %v3405_v22  ;;  %v3373_v55 = vld [vmem:[%s5916_s8 + $0x210] sm:$0xf0]  ;;  %v3204_v5 = vor.u32 %v3808_v8, %v3203_v63  ;;  %v3897_v21 = vld [vmem:[%s5916_s8 + $0x384] sm:$0xf]  ;;  %v3788_v63 = vld [vmem:[%s5916_s8 + $0x14] sm:$0xf0] }
 0x127   :  { %v1185_v17 = vadd.f32 %v1184_v60, %v1172_v7  ;;  %v3376_v58 = vor.u32 %v3849_v54, %v3373_v55  ;;  %v3565_v22 = vld [vmem:[%s5916_s8 + $0x390] sm:$0xf0]  ;;  %v3889_v54 = vld [vmem:[%s5916_s8 + $0x344] sm:$0xf] }
 0x128   :  { %2239 = vmatpush.bf16.msrb.mxu2 %v3408_v24  ;;  %2247 = vmatpush.bf16.msrb.mxu3 %v3616_v61  ;;  %v3568_v24 = vor.u32 %v3897_v21, %v3565_v22  ;;  %v3533_v55 = vld [vmem:[%s5916_s8 + $0x350] sm:$0xf0]  ;;  %v3332_v61 = vor.u32 %v3840_v53, %v3331_v50  ;;  %v3885_v8 = vld [vmem:[%s5916_s8 + $0x324] sm:$0xf]  ;;  %v3189_v50 = vld [vmem:[%s5916_s8 + $0x98] sm:$0xf0] }
 0x12c   :  { %v1173_v12 = vpop.f32.mrf.mxu0  ;;  %2240 = vmatpush.bf16.msrb.mxu2 %v3392_v38  ;;  %2248 = vmatpush.bf16.msrb.mxu3 %v3600_v4  ;;  %v3237_v4 = vld [vmem:[%s5916_s8 + $0xf8] sm:$0xf0] }
 0x12d   :  { %v1186_v15 = vpop.f32.mrf.mxu1 }
 0x12e   :  { %v3188_v15 = vor.u32 %v3804_v9, %v3187_v6 }
 0x130   :  { %2241 = vmatpush.bf16.msrb.mxu2 %v3376_v58  ;;  %2249 = vmatpush.bf16.msrb.mxu3 %v3584_v14  ;;  %v3536_v58 = vor.u32 %v3889_v54, %v3533_v55  ;;  %v3832_v14 = vld [vmem:[%s5916_s8 + $0x174] sm:$0xf0] }
 0x132   :  { %v1197_v23 = vpop.f32.mrf.mxu2 }
 0x133   :  { %v1198_v25 = vadd.f32 %v1197_v23, %v1185_v17  ;;  %v1210_v26 = vpop.f32.mrf.mxu3  ;;  %v3800_v17 = vld [vmem:[%s5916_s8 + $0x74] sm:$0xf0] }
 0x134   :  { %v1223_v31 = vpop.f32.mrf.mxu0  ;;  %v3172_v27 = vor.u32 %v3800_v17, %v3171_v16  ;;  %2250 = vmatpush.bf16.msrb.mxu3 %v3568_v24  ;;  %v3501_v16 = vld [vmem:[%s5916_s8 + $0x310] sm:$0xf0] }
 0x135   :  { %v1211_v30 = vadd.f32 %v1210_v26, %v1198_v25  ;;  %v1236_v37 = vpop.f32.mrf.mxu1  ;;  %v1224_v0 = vadd.f32 %v1223_v31, %v515_v41  ;;  %v3347_v31 = vld [vmem:[%s5916_s8 + $0x1c8] sm:$0xf] }
 0x137   :  { %v1370_v40 = vmax.f32 %v1211_v30, 0.0  ;;  %v1237_v7 = vadd.f32 %v1236_v37, %v1224_v0  ;;  %v3796_v30 = vld [vmem:[%s5916_s8 + $0x54] sm:$0xf0]  ;;  %v516_v37 = vperm.slane %v5324_v52, 2  ;;  %v3315_v0 = vld [vmem:[%s5916_s8 + $0x188] sm:$0xf] }
 0x138   :  { %v3156_v44 = vor.u32 %v3796_v30, %v3155_v29  ;;  %v3876_v30 = vld [vmem:[%s5916_s8 + $0x2d4] sm:$0xf0] }
 0x139   :  { %v5418_v51 = vpack.c.bf16 %v1370_v40, %v1370_v40  ;;  %v3552_v40 = vor.u32 %v3893_v34, %v3549_v36 }
 0x13a   :  { %v1199_v57 = vpop.f32.mrf.mxu2 }
 0x13b   :  { %v1212_v60 = vpop.f32.mrf.mxu3  ;;  %2164 = vmatmul.bf16.vlgmr.msra.gmra.mxu0 %v5418_v51  ;;  %2251 = vmatpush.bf16.msrb.mxu3 %v3552_v40 }
 0x13c   :  { %2260 = vmatpush.bf16.msra.mxu0 %v3236_v46  ;;  %v1225_v1 = vpop.f32.mrf.mxu0  ;;  %v3348_v46 = vor.u32 %v3844_v33, %v3347_v31  ;;  %v3140_v60 = vor.u32 %v3792_v49, %v3139_v47  ;;  %v3806_v31 = vld [vmem:[%s5916_s8 + $0xac] sm:$0xf]  ;;  %v3205_v33 = vld [vmem:[%s5916_s8 + $0xb8] sm:$0xf0]  ;;  %v3872_v47 = vld [vmem:[%s5916_s8 + $0x2b4] sm:$0xf0] }
 0x13d   :  { %v1238_v13 = vpop.f32.mrf.mxu1  ;;  %v3836_v1 = vld [vmem:[%s5916_s8 + $0x194] sm:$0xf0]  ;;  %v3208_v40 = vor.u32 %v3806_v31, %v3205_v33  ;;  %v3802_v49 = vld [vmem:[%s5916_s8 + $0x8c] sm:$0xf] }
 0x13e   :  { %v3814_v13 = vld [vmem:[%s5916_s8 + $0xec] sm:$0xf]  ;;  %v3316_v11 = vor.u32 %v3836_v1, %v3315_v0  ;;  %v3192_v55 = vor.u32 %v3802_v49, %v3189_v50  ;;  %v3365_v0 = vld [vmem:[%s5916_s8 + $0x1f8] sm:$0xf0]  ;;  %v3619_v49 = vld [vmem:[%s5916_s8 + $0x3e8] sm:$0xf] }
 0x13f   :  { %2252 = vmatpush.bf16.msrb.mxu3 %v3536_v58  ;;  %v3443_v58 = vld [vmem:[%s5916_s8 + $0x288] sm:$0xf]  ;;  %v3834_v33 = vld [vmem:[%s5916_s8 + $0x18c] sm:$0xf]  ;;  %v3912_v50 = vld [vmem:[%s5916_s8 + $0x3f4] sm:$0xf0] }
 0x140   :  { %2261 = vmatpush.bf16.msra.mxu0 %v3220_v62  ;;  %v3123_v62 = vld [vmem:[%s5916_s8 + $0x8] sm:$0xf] }
 0x141   :  { %v3124_v10 = vor.u32 %v3788_v63, %v3123_v62  ;;  %v3846_v63 = vld [vmem:[%s5916_s8 + $0x1ec] sm:$0xf] }
 0x142   :  { %v1249_v12 = vpop.f32.mrf.mxu2 }
 0x143   :  { %v1250_v35 = vadd.f32 %v1249_v12, %v1237_v7  ;;  %v1262_v43 = vpop.f32.mrf.mxu3  ;;  %v3299_v12 = vld [vmem:[%s5916_s8 + $0x168] sm:$0xf] }
 0x144   :  { %2262 = vmatpush.bf16.msra.mxu0 %v3204_v5  ;;  %v3520_v5 = vor.u32 %v3885_v8, %v3517_v2  ;;  %v517_v2 = vperm.slane %v5324_v52, 3  ;;  %v3157_v52 = vld [vmem:[%s5916_s8 + $0x58] sm:$0xf0] }
 0x145   :  { %v1263_v19 = vadd.f32 %v1262_v43, %v1250_v35  ;;  %v1275_v23 = vpop.f32.mrf.mxu0  ;;  %v3240_v35 = vor.u32 %v3814_v13, %v3237_v4  ;;  %v3491_v43 = vld [vmem:[%s5916_s8 + $0x2e8] sm:$0xf] }
 0x146   :  { %v1276_v56 = vadd.f32 %v1275_v23, %v516_v37  ;;  %2253 = vmatpush.bf16.msrb.mxu3 %v3520_v5  ;;  %v3300_v23 = vor.u32 %v3832_v14, %v3299_v12  ;;  %v3492_v24 = vor.u32 %v3880_v18, %v3491_v43  ;;  %v3427_v4 = vld [vmem:[%s5916_s8 + $0x268] sm:$0xf]  ;;  %v3368_v5 = vor.u32 %v3846_v63, %v3365_v0  ;;  %v3908_v0 = vld [vmem:[%s5916_s8 + $0x3d4] sm:$0xf0] }
 0x147   :  { %v1371_v25 = vmax.f32 %v1263_v19, 0.0  ;;  %v3810_v19 = vld [vmem:[%s5916_s8 + $0xcc] sm:$0xf]  ;;  %v3411_v14 = vld [vmem:[%s5916_s8 + $0x248] sm:$0xf] }
 0x148   :  { %v1288_v26 = vpop.f32.mrf.mxu1  ;;  %2263 = vmatpush.bf16.msra.mxu0 %v3188_v15  ;;  %v3881_v15 = vld [vmem:[%s5916_s8 + $0x304] sm:$0xf]  ;;  %v3603_v63 = vld [vmem:[%s5916_s8 + $0x3c8] sm:$0xf] }
 0x149   :  { %v5484_v32 = vpack.c.bf16 %v1371_v25, %v1371_v25  ;;  %v1289_v3 = vadd.f32 %v1288_v26, %v1276_v56  ;;  %v3504_v21 = vor.u32 %v3881_v15, %v3501_v16  ;;  %v3224_v25 = vor.u32 %v3810_v19, %v3221_v20  ;;  %v3283_v26 = vld [vmem:[%s5916_s8 + $0x148] sm:$0xf]  ;;  %v3860_v15 = vld [vmem:[%s5916_s8 + $0x254] sm:$0xf0]  ;;  %v3790_v16 = vld [vmem:[%s5916_s8 + $0x2c] sm:$0xf] }
 0x14a   :  { %v1251_v38 = vpop.f32.mrf.mxu2  ;;  %v3251_v56 = vld [vmem:[%s5916_s8 + $0x108] sm:$0xf]  ;;  %v3838_v19 = vld [vmem:[%s5916_s8 + $0x1ac] sm:$0xf]  ;;  %v3333_v20 = vld [vmem:[%s5916_s8 + $0x1b8] sm:$0xf0] }
 0x14b   :  { %v1264_v41 = vpop.f32.mrf.mxu3  ;;  %2177 = vmatmul.bf16.vlgmr.msra.gmra.mxu1 %v5484_v32  ;;  %2216 = vmatmul.bf16.vlgmr.msrb.gmra.mxu0 %v5418_v51 }
 0x14c   :  { %2264 = vmatpush.bf16.msra.mxu0 %v3172_v27  ;;  %2273 = vmatpush.bf16.msra.mxu1 %v3364_v28  ;;  %v3828_v27 = vld [vmem:[%s5916_s8 + $0x154] sm:$0xf0]  ;;  %v3475_v28 = vld [vmem:[%s5916_s8 + $0x2c8] sm:$0xf] }
 0x14d   :  { %v1277_v57 = vpop.f32.mrf.mxu0  ;;  %2254 = vmatpush.bf16.msrb.mxu3 %v3504_v21  ;;  %v3284_v37 = vor.u32 %v3828_v27, %v3283_v26  ;;  %v3476_v38 = vor.u32 %v3876_v30, %v3475_v28  ;;  %v3267_v41 = vld [vmem:[%s5916_s8 + $0x128] sm:$0xf]  ;;  %v3336_v26 = vor.u32 %v3838_v19, %v3333_v20  ;;  %v3856_v27 = vld [vmem:[%s5916_s8 + $0x234] sm:$0xf0]  ;;  %v3786_v28 = vld [vmem:[%s5916_s8 + $0xc] sm:$0xf] }
 0x14e   :  { %v3820_v57 = vld [vmem:[%s5916_s8 + $0x114] sm:$0xf0]  ;;  %v3125_v30 = vld [vmem:[%s5916_s8 + $0x18] sm:$0xf0]  ;;  %v3866_v19 = vld [vmem:[%s5916_s8 + $0x28c] sm:$0xf] }
 0x14f   :  { %v3252_v8 = vor.u32 %v3820_v57, %v3251_v56  ;;  %v3493_v56 = vld [vmem:[%s5916_s8 + $0x2f8] sm:$0xf0] }
 0x150   :  { %v1290_v59 = vpop.f32.mrf.mxu1  ;;  %2265 = vmatpush.bf16.msra.mxu0 %v3156_v44  ;;  %2274 = vmatpush.bf16.msra.mxu1 %v3348_v46  ;;  %v3824_v44 = vld [vmem:[%s5916_s8 + $0x134] sm:$0xf0]  ;;  %v3459_v46 = vld [vmem:[%s5916_s8 + $0x2a8] sm:$0xf]  ;;  %v3445_v20 = vld [vmem:[%s5916_s8 + $0x298] sm:$0xf0] }
 0x151   :  { %v3268_v53 = vor.u32 %v3824_v44, %v3267_v41  ;;  %v3460_v54 = vor.u32 %v3872_v47, %v3459_v46  ;;  %v3868_v59 = vld [vmem:[%s5916_s8 + $0x294] sm:$0xf0]  ;;  %v3379_v41 = vld [vmem:[%s5916_s8 + $0x208] sm:$0xf] }
 0x152   :  { %v1301_v6 = vpop.f32.mrf.mxu2  ;;  %v3852_v44 = vld [vmem:[%s5916_s8 + $0x214] sm:$0xf0] }
 0x153   :  { %v1314_v7 = vpop.f32.mrf.mxu3  ;;  %v1302_v9 = vadd.f32 %v1301_v6, %v1289_v3  ;;  %v3444_v3 = vor.u32 %v3868_v59, %v3443_v58  ;;  %v3864_v6 = vld [vmem:[%s5916_s8 + $0x274] sm:$0xf0]  ;;  %v3380_v58 = vor.u32 %v3852_v44, %v3379_v41  ;;  %v3620_v59 = vor.u32 %v3912_v50, %v3619_v49  ;;  %v3854_v44 = vld [vmem:[%s5916_s8 + $0x22c] sm:$0xf]  ;;  %v3507_v49 = vld [vmem:[%s5916_s8 + $0x308] sm:$0xf] }
 0x154   :  { %2266 = vmatpush.bf16.msra.mxu0 %v3140_v60  ;;  %2275 = vmatpush.bf16.msra.mxu1 %v3332_v61  ;;  %v3798_v60 = vld [vmem:[%s5916_s8 + $0x6c] sm:$0xf]  ;;  %v3173_v61 = vld [vmem:[%s5916_s8 + $0x78] sm:$0xf0]  ;;  %v3888_v41 = vld [vmem:[%s5916_s8 + $0x334] sm:$0xf0] }
 0x155   :  { %v1315_v17 = vadd.f32 %v1314_v7, %v1302_v9  ;;  %v3176_v13 = vor.u32 %v3798_v60, %v3173_v61  ;;  %v3794_v7 = vld [vmem:[%s5916_s8 + $0x4c] sm:$0xf]  ;;  %v3884_v50 = vld [vmem:[%s5916_s8 + $0x314] sm:$0xf0] }
 0x156   :  { %v3842_v9 = vld [vmem:[%s5916_s8 + $0x1cc] sm:$0xf]  ;;  %v3160_v12 = vor.u32 %v3794_v7, %v3157_v52  ;;  %v3587_v52 = vld [vmem:[%s5916_s8 + $0x3a8] sm:$0xf] }
 0x157   :  { %v1372_v22 = vmax.f32 %v1315_v17, 0.0  ;;  %v3141_v17 = vld [vmem:[%s5916_s8 + $0x38] sm:$0xf0] }
 0x158   :  { %2267 = vmatpush.bf16.msra.mxu0 %v3124_v10  ;;  %2276 = vmatpush.bf16.msra.mxu1 %v3316_v11  ;;  %v3349_v10 = vld [vmem:[%s5916_s8 + $0x1d8] sm:$0xf0]  ;;  %v3428_v11 = vor.u32 %v3864_v6, %v3427_v4 }
 0x159   :  { %v5573_v29 = vpack.c.bf16 %v1372_v22, %v1372_v22  ;;  %v3352_v43 = vor.u32 %v3842_v9, %v3349_v10  ;;  %v3412_v22 = vor.u32 %v3860_v15, %v3411_v14  ;;  %v3904_v9 = vld [vmem:[%s5916_s8 + $0x3b4] sm:$0xf0]  ;;  %v3822_v10 = vld [vmem:[%s5916_s8 + $0x12c] sm:$0xf]  ;;  %v3571_v15 = vld [vmem:[%s5916_s8 + $0x388] sm:$0xf] }
 0x15a   :  { %v1303_v34 = vpop.f32.mrf.mxu2  ;;  %v3588_v14 = vor.u32 %v3904_v9, %v3587_v52  ;;  %v3886_v9 = vld [vmem:[%s5916_s8 + $0x32c] sm:$0xf] }
 0x15b   :  { %v1316_v36 = vpop.f32.mrf.mxu3  ;;  %2229 = vmatmul.bf16.vlgmr.msrb.gmra.mxu1 %v5484_v32  ;;  %2268 = vmatmul.bf16.vlgmr.msra.gmra.mxu0 %v5418_v51  ;;  %v3317_v34 = vld [vmem:[%s5916_s8 + $0x198] sm:$0xf0] }
 0x15c   :  { %2312 = vmatpush.bf16.msrb.mxu0 %v3240_v35  ;;  %2190 = vmatmul.bf16.vlgmr.msra.gmra.mxu2 %v5573_v29  ;;  %v3320_v47 = vor.u32 %v3834_v33, %v3317_v34  ;;  %v3892_v33 = vld [vmem:[%s5916_s8 + $0x354] sm:$0xf0]  ;;  %v3858_v34 = vld [vmem:[%s5916_s8 + $0x24c] sm:$0xf] }
 0x15d   :  { %2277 = vmatpush.bf16.msra.mxu1 %v3300_v23  ;;  %2286 = vmatpush.bf16.msra.mxu2 %v3492_v24  ;;  %v3144_v23 = vor.u32 %v3790_v16, %v3141_v17  ;;  %v3395_v24 = vld [vmem:[%s5916_s8 + $0x228] sm:$0xf]  ;;  %v3900_v16 = vld [vmem:[%s5916_s8 + $0x394] sm:$0xf0]  ;;  %v3818_v17 = vld [vmem:[%s5916_s8 + $0x10c] sm:$0xf] }
 0x160   :  { %2313 = vmatpush.bf16.msrb.mxu0 %v3224_v25 }
 0x161   :  { %2278 = vmatpush.bf16.msra.mxu1 %v3284_v37  ;;  %2287 = vmatpush.bf16.msra.mxu2 %v3476_v38  ;;  %v3396_v38 = vor.u32 %v3856_v27, %v3395_v24  ;;  %v3555_v24 = vld [vmem:[%s5916_s8 + $0x368] sm:$0xf]  ;;  %v3429_v27 = vld [vmem:[%s5916_s8 + $0x278] sm:$0xf0] }
 0x164   :  { %2314 = vmatpush.bf16.msrb.mxu0 %v3208_v40  ;;  %v3128_v40 = vor.u32 %v3786_v28, %v3125_v30 }
 0x165   :  { %v1327_v62 = vpop.f32.mrf.mxu0  ;;  %2279 = vmatpush.bf16.msra.mxu1 %v3268_v53  ;;  %2288 = vmatpush.bf16.msra.mxu2 %v3460_v54  ;;  %v3830_v53 = vld [vmem:[%s5916_s8 + $0x16c] sm:$0xf]  ;;  %v3301_v54 = vld [vmem:[%s5916_s8 + $0x178] sm:$0xf0] }
 0x166   :  { %v1328_v35 = vadd.f32 %v1327_v62, %v517_v2  ;;  %v3304_v61 = vor.u32 %v3830_v53, %v3301_v54  ;;  %v3285_v2 = vld [vmem:[%s5916_s8 + $0x158] sm:$0xf0]  ;;  %v3850_v53 = vld [vmem:[%s5916_s8 + $0x20c] sm:$0xf] }
 0x167   :  { %v3381_v54 = vld [vmem:[%s5916_s8 + $0x218] sm:$0xf0] }
 0x168   :  { %v1340_v1 = vpop.f32.mrf.mxu1  ;;  %2315 = vmatpush.bf16.msrb.mxu0 %v3192_v55  ;;  %v3878_v55 = vld [vmem:[%s5916_s8 + $0x2ec] sm:$0xf] }
 0x169   :  { %2280 = vmatpush.bf16.msra.mxu1 %v3252_v8  ;;  %2289 = vmatpush.bf16.msra.mxu2 %v3444_v3  ;;  %v1341_v25 = vadd.f32 %v1340_v1, %v1328_v35  ;;  %v3496_v62 = vor.u32 %v3878_v55, %v3493_v56  ;;  %v3826_v1 = vld [vmem:[%s5916_s8 + $0x14c] sm:$0xf]  ;;  %v3621_v56 = vld [vmem:[%s5916_s8 + $0x3f8] sm:$0xf0] }
 0x16a   :  { %v3874_v3 = vld [vmem:[%s5916_s8 + $0x2cc] sm:$0xf]  ;;  %v3288_v6 = vor.u32 %v3826_v1, %v3285_v2  ;;  %v3589_v1 = vld [vmem:[%s5916_s8 + $0x3b8] sm:$0xf0] }
 0x16b   :  { %v3910_v55 = vld [vmem:[%s5916_s8 + $0x3ec] sm:$0xf] }
 0x16c   :  { %2316 = vmatpush.bf16.msrb.mxu0 %v3176_v13  ;;  %2281 = vmatmul.bf16.vlgmr.msra.gmra.mxu1 %v5484_v32  ;;  %v3477_v13 = vld [vmem:[%s5916_s8 + $0x2d8] sm:$0xf0]  ;;  %v3898_v2 = vld [vmem:[%s5916_s8 + $0x38c] sm:$0xf] }
 0x16d   :  { %2325 = vmatpush.bf16.msrb.mxu1 %v3368_v5  ;;  %v1329_v18 = vpop.f32.mrf.mxu0  ;;  %2242 = vmatmul.bf16.vlgmr.msrb.gmra.mxu2 %v5573_v29  ;;  %v3604_v5 = vor.u32 %v3908_v0, %v3603_v63  ;;  %v3480_v7 = vor.u32 %v3874_v3, %v3477_v13  ;;  %v3902_v0 = vld [vmem:[%s5916_s8 + $0x3ac] sm:$0xf]  ;;  %v3573_v3 = vld [vmem:[%s5916_s8 + $0x398] sm:$0xf0] }
 0x16e   :  { %2290 = vmatpush.bf16.msra.mxu2 %v3428_v11  ;;  %v3870_v11 = vld [vmem:[%s5916_s8 + $0x2ac] sm:$0xf]  ;;  %v3253_v18 = vld [vmem:[%s5916_s8 + $0x118] sm:$0xf0]  ;;  %v3576_v13 = vor.u32 %v3898_v2, %v3573_v3 }
 0x170   :  { %v1342_v21 = vpop.f32.mrf.mxu1  ;;  %2317 = vmatpush.bf16.msrb.mxu0 %v3160_v12  ;;  %v3461_v12 = vld [vmem:[%s5916_s8 + $0x2b8] sm:$0xf0] }
 0x171   :  { %2326 = vmatpush.bf16.msrb.mxu1 %v3352_v43  ;;  %v3464_v43 = vor.u32 %v3870_v11, %v3461_v12  ;;  %v3572_v21 = vor.u32 %v3900_v16, %v3571_v15  ;;  %v3882_v11 = vld [vmem:[%s5916_s8 + $0x30c] sm:$0xf]  ;;  %v3509_v12 = vld [vmem:[%s5916_s8 + $0x318] sm:$0xf0] }
 0x172   :  { %v1353_v31 = vpop.f32.mrf.mxu2  ;;  %2291 = vmatpush.bf16.msra.mxu2 %v3412_v22  ;;  %v3256_v22 = vor.u32 %v3818_v17, %v3253_v18 }
 0x173   :  { %v1354_v36 = vadd.f32 %v1353_v31, %v1341_v25  ;;  %v1366_v37 = vpop.f32.mrf.mxu3  ;;  %v3896_v25 = vld [vmem:[%s5916_s8 + $0x374] sm:$0xf0]  ;;  %v3539_v31 = vld [vmem:[%s5916_s8 + $0x348] sm:$0xf] }
 0x174   :  { %2318 = vmatpush.bf16.msrb.mxu0 %v3144_v23  ;;  %v3448_v23 = vor.u32 %v3866_v19, %v3445_v20  ;;  %v3556_v28 = vor.u32 %v3896_v25, %v3555_v24 }
 0x175   :  { %v1367_v46 = vadd.f32 %v1366_v37, %v1354_v36  ;;  %2327 = vmatpush.bf16.msrb.mxu1 %v3336_v26  ;;  %v3862_v26 = vld [vmem:[%s5916_s8 + $0x26c] sm:$0xf]  ;;  %v3413_v36 = vld [vmem:[%s5916_s8 + $0x258] sm:$0xf0]  ;;  %v3540_v37 = vor.u32 %v3892_v33, %v3539_v31 }
 0x176   :  { %2292 = vmatpush.bf16.msra.mxu2 %v3396_v38  ;;  %v3432_v30 = vor.u32 %v3862_v26, %v3429_v27  ;;  %v3416_v38 = vor.u32 %v3858_v34, %v3413_v36 }
 0x177   :  { %v1373_v57 = vmax.f32 %v1367_v46, 0.0  ;;  %v3397_v46 = vld [vmem:[%s5916_s8 + $0x238] sm:$0xf0] }
 0x178   :  { %2319 = vmatpush.bf16.msrb.mxu0 %v3128_v40  ;;  %v3523_v40 = vld [vmem:[%s5916_s8 + $0x328] sm:$0xf] }
 0x179   :  { %v5710_v60 = vpack.c.bf16 %v1373_v57, %v1373_v57  ;;  %2328 = vmatpush.bf16.msrb.mxu1 %v3320_v47  ;;  %v3400_v47 = vor.u32 %v3854_v44, %v3397_v46  ;;  %v3508_v57 = vor.u32 %v3884_v50, %v3507_v49 }
 0x17a   :  { %v1355_v8 = vpop.f32.mrf.mxu2  ;;  %2293 = vmatpush.bf16.msra.mxu2 %v3380_v58  ;;  %v3384_v58 = vor.u32 %v3850_v53, %v3381_v54 }
 0x17b   :  { %v1368_v4 = vpop.f32.mrf.mxu3  ;;  %2203 = vmatmul.bf16.vlgmr.msra.gmra.mxu3 %v5710_v60  ;;  %2320 = vmatmul.bf16.vlgmr.msrb.gmra.mxu0 %v5418_v51  ;;  %v3269_v51 = vld [vmem:[%s5916_s8 + $0x138] sm:$0xf0]  ;;  %v3592_v8 = vor.u32 %v3902_v0, %v3589_v1 }
 0x17c   :  { %2299 = vmatpush.bf16.msra.mxu3 %v3620_v59  ;;  %v3272_v35 = vor.u32 %v3822_v10, %v3269_v51  ;;  %v3624_v59 = vor.u32 %v3910_v55, %v3621_v56  ;;  %v3894_v4 = vld [vmem:[%s5916_s8 + $0x36c] sm:$0xf]  ;;  %v3525_v10 = vld [vmem:[%s5916_s8 + $0x338] sm:$0xf0] }
 0x17d   :  { %2329 = vmatpush.bf16.msrb.mxu1 %v3304_v61  ;;  %2294 = vmatmul.bf16.vlgmr.msra.gmra.mxu2 %v5573_v29  ;;  %v3906_v61 = vld [vmem:[%s5916_s8 + $0x3cc] sm:$0xf]  ;;  %v3528_v51 = vor.u32 %v3886_v9, %v3525_v10 }
 0x17e   :  { %2338 = vmatpush.bf16.msrb.mxu2 %v3496_v62  ;;  %v3605_v62 = vld [vmem:[%s5916_s8 + $0x3d8] sm:$0xf0] }
 0x17f   :  { %v3608_v63 = vor.u32 %v3906_v61, %v3605_v62 }
 0x180   :  { %2300 = vmatpush.bf16.msra.mxu3 %v3604_v5 }
 0x181   :  { %2330 = vmatpush.bf16.msrb.mxu1 %v3288_v6  ;;  %v3890_v6 = vld [vmem:[%s5916_s8 + $0x34c] sm:$0xf] }
 0x182   :  { %2339 = vmatpush.bf16.msrb.mxu2 %v3480_v7  ;;  %v3541_v7 = vld [vmem:[%s5916_s8 + $0x358] sm:$0xf0] }
 0x183   :  { %v3544_v52 = vor.u32 %v3890_v6, %v3541_v7 }
 0x184   :  { %2301 = vmatpush.bf16.msra.mxu3 %v3588_v14  ;;  %v3512_v14 = vor.u32 %v3882_v11, %v3509_v12 }
 0x185   :  { %2331 = vmatpush.bf16.msrb.mxu1 %v3272_v35 }
 0x186   :  { %2340 = vmatpush.bf16.msrb.mxu2 %v3464_v43  ;;  %v5873_v43 = vld [vmem:[%s5917_s9] sm:$0xf] }
 0x187   :  { %v1508_v16 = vperm.slane %v5873_v43, 0  ;;  %v1510_v33 = vperm.slane %v5873_v43, 2 }
 0x188   :  { %2302 = vmatpush.bf16.msra.mxu3 %v3572_v21 }
 0x189   :  { %2332 = vmatpush.bf16.msrb.mxu1 %v3256_v22 }
 0x18a   :  { %2341 = vmatpush.bf16.msrb.mxu2 %v3448_v23  ;;  %v1509_v23 = vperm.slane %v5873_v43, 1 }
 0x18b   :  { %2255 = vmatmul.bf16.vlgmr.msrb.gmra.mxu3 %v5710_v60 }
 0x18c   :  { %2303 = vmatpush.bf16.msra.mxu3 %v3556_v28  ;;  %2333 = vmatmul.bf16.vlgmr.msrb.gmra.mxu1 %v5484_v32  ;;  %v3524_v32 = vor.u32 %v3888_v41, %v3523_v40 }
 0x18e   :  { %2342 = vmatpush.bf16.msrb.mxu2 %v3432_v30 }
 0x190   :  { %2304 = vmatpush.bf16.msra.mxu3 %v3540_v37 }
 0x192   :  { %2343 = vmatpush.bf16.msrb.mxu2 %v3416_v38 }
 0x194   :  { %2305 = vmatpush.bf16.msra.mxu3 %v3524_v32 }
 0x196   :  { %2344 = vmatpush.bf16.msrb.mxu2 %v3400_v47 }
 0x198   :  { %2306 = vmatpush.bf16.msra.mxu3 %v3508_v57 }
 0x19a   :  { %2345 = vmatpush.bf16.msrb.mxu2 %v3384_v58 }
 0x19b   :  { %2307 = vmatmul.bf16.vlgmr.msra.gmra.mxu3 %v5710_v60 }
 0x19c   :  { %2351 = vmatpush.bf16.msrb.mxu3 %v3624_v59 }
 0x19d   :  { %2346 = vmatmul.bf16.vlgmr.msrb.gmra.mxu2 %v5573_v29  ;;  %v3557_v29 = vld [vmem:[%s5916_s8 + $0x378] sm:$0xf0] }
 0x19e   :  { %v3560_v5 = vor.u32 %v3894_v4, %v3557_v29  ;;  %v2409_v29 = vld [vmem:[%s5918_s10] sm:$0x3]  ;;  %s3968_s10 = smov [#allocation3]  }
 0x1a0   :  { %2352 = vmatpush.bf16.msrb.mxu3 %v3608_v63 }
 0x1a4   :  { %2353 = vmatpush.bf16.msrb.mxu3 %v3592_v8 }
 0x1a8   :  { %2354 = vmatpush.bf16.msrb.mxu3 %v3576_v13 }
 0x1ac   :  { %2355 = vmatpush.bf16.msrb.mxu3 %v3560_v5 }
 0x1b0   :  { %2356 = vmatpush.bf16.msrb.mxu3 %v3544_v52 }
 0x1b4   :  { %2357 = vmatpush.bf16.msrb.mxu3 %v3528_v51 }
 0x1b8   :  { %2358 = vmatpush.bf16.msrb.mxu3 %v3512_v14  ;;  %v2165_v35 = vpop.f32.mrf.mxu0 }
 0x1b9   :  { %v2166_v17 = vadd.f32 %v2165_v35, %v1508_v16 }
 0x1bb   :  { %2359 = vmatmul.bf16.vlgmr.msrb.gmra.mxu3 %v5710_v60 }
 0x1c0   :  { %v2167_v15 = vpop.f32.mrf.mxu0 }
 0x1c1   :  { %v1511_v15 = vperm.slane %v5873_v43, 3 }
 0x1c8   :  { %v2178_v18 = vpop.f32.mrf.mxu1  ;;  %v2217_v19 = vpop.f32.mrf.mxu0 }
 0x1c9   :  { %v2179_v20 = vadd.f32 %v2178_v18, %v2166_v17  ;;  %v2218_v24 = vadd.f32 %v2217_v19, %v1509_v23 }
 0x1d0   :  { %v2180_v21 = vpop.f32.mrf.mxu1  ;;  %v2219_v22 = vpop.f32.mrf.mxu0 }
 0x1d8   :  { %v2230_v25 = vpop.f32.mrf.mxu1  ;;  %v2269_v60 = vpop.f32.mrf.mxu0 }
 0x1d9   :  { %v2231_v26 = vadd.f32 %v2230_v25, %v2218_v24  ;;  %v2270_v34 = vadd.f32 %v2269_v60, %v1510_v33 }
 0x1df   :  { %v2191_v27 = vpop.f32.mrf.mxu2 }
 0x1e0   :  { %v2192_v28 = vadd.f32 %v2191_v27, %v2179_v20  ;;  %v2232_v30 = vpop.f32.mrf.mxu1  ;;  %v2271_v31 = vpop.f32.mrf.mxu0 }
 0x1e7   :  { %v2193_v36 = vpop.f32.mrf.mxu2 }
 0x1e9   :  { %v2282_v37 = vpop.f32.mrf.mxu1 }
 0x1ea   :  { %v2283_v38 = vadd.f32 %v2282_v37, %v2270_v34 }
 0x1f0   :  { %v2243_v40 = vpop.f32.mrf.mxu2 }
 0x1f1   :  { %v2244_v41 = vadd.f32 %v2243_v40, %v2231_v26  ;;  %v2284_v44 = vpop.f32.mrf.mxu1 }
 0x1f8   :  { %v2321_v46 = vpop.f32.mrf.mxu0  ;;  %v2245_v32 = vpop.f32.mrf.mxu2 }
 0x1f9   :  { %v2322_v16 = vadd.f32 %v2321_v46, %v1511_v15 }
 0x1fe   :  { %v2204_v47 = vpop.f32.mrf.mxu3 }
 0x1ff   :  { %v2205_v54 = vadd.f32 %v2204_v47, %v2192_v28  ;;  %v2422_v28 = vlaneseq }
 0x200   :  { %v2323_v49 = vpop.f32.mrf.mxu0  ;;  %v2295_v50 = vpop.f32.mrf.mxu2 }
 0x201   :  { %v2391_v57 = vsub.f32 %v4645_v42, %v2205_v54  ;;  %v3915_v42 = vld [vmem:[%s5919_s11] ss:$0 sm:$0xff]  ;;  %v2296_v6 = vadd.f32 %v2295_v50, %v2283_v38  ;;  %s2434_s11 = sshll.u32 %s3968_s10, 4  ;;  %v2423_v30 = vand.u32 127, %v2422_v28  ;;  %s2435_s11 = int_to_ptr.vmem [resolvable:$true] %s2434_s11 }
 0x202   :  { %v2414_v5 = vmul.f32 %v3915_v42, %v2409_v29  ;;  %2439 = dma.vmem_to_hbm [thread:$0]  %s2435_s11, 128, %s2437_s21, [#allocation4]  }
 0x203   :  { %v2395_v61 = vmul.f32 %v2391_v57, %v2391_v57  ;;  %vm2425_vm5 = vcmp.eq.s32.totalorder %v2423_v30, 1  ;;  %vm2424_vm6 = vcmp.eq.s32.totalorder %v2423_v30, 0 }
 0x205   :  { %v2399_v2 = vsel %vm2371_vm1, %v2395_v61, 0.0 }
 0x206   :  { %v2206_v53 = vpop.f32.mrf.mxu3 }
 0x208   :  { %v2297_v56 = vpop.f32.mrf.mxu2 }
 0x209   :  { %v2334_v55 = vpop.f32.mrf.mxu1 }
 0x20a   :  { %v2335_v17 = vadd.f32 %v2334_v55, %v2322_v16 }
 0x20e   :  { %v2256_v58 = vpop.f32.mrf.mxu3 }
 0x20f   :  { %v2257_v59 = vadd.f32 %v2256_v58, %v2244_v41 }
 0x211   :  { %v2383_v62 = vrot.slane %v2257_v59, 6  ;;  %v2392_v63 = vsub.f32 %v4643_v39, %v2257_v59  ;;  %v2336_v0 = vpop.f32.mrf.mxu1  ;;  %v2416_v39 = vsel %vm2415_vm4, %v2414_v5, 0.0 }
 0x212   :  { %2417 = vadd.xlane.f32.xlu0 %v2416_v39 }
 0x213   :  { %v2396_v1 = vmul.f32 %v2392_v63, %v2392_v63  ;;  %v2386_v8 = vsel %vm2371_vm1, %v2205_v54, %v2383_v62 }
 0x215   :  { %v2400_v3 = vsel %vm2371_vm1, %v2396_v1, 0.0 }
 0x216   :  { %v2258_v13 = vpop.f32.mrf.mxu3  ;;  %v2401_v4 = vadd.f32 %v2400_v3, %v2399_v2 }
 0x21e   :  { %v2308_v7 = vpop.f32.mrf.mxu3 }
 0x21f   :  { %v2309_v52 = vadd.f32 %v2308_v7, %v2296_v6 }
 0x220   :  { %v2347_v9 = vpop.f32.mrf.mxu2 }
 0x221   :  { %v2393_v10 = vsub.f32 %v4648_v45, %v2309_v52  ;;  %v2348_v18 = vadd.f32 %v2347_v9, %v2335_v17  ;;  %v2384_v43 = vrot.slane %v2309_v52, 4 }
 0x223   :  { %v2397_v51 = vmul.f32 %v2393_v10, %v2393_v10 }
 0x225   :  { %v2402_v11 = vsel %vm2371_vm1, %v2397_v51, 0.0 }
 0x226   :  { %v2310_v12 = vpop.f32.mrf.mxu3  ;;  %v2403_v14 = vadd.f32 %v2402_v11, %v2401_v4 }
 0x228   :  { %v2349_v35 = vpop.f32.mrf.mxu2 }
 0x23e   :  { %v2360_v19 = vpop.f32.mrf.mxu3 }
 0x23f   :  { %v2361_v45 = vadd.f32 %v2360_v19, %v2348_v18 }
 0x241   :  { %v2385_v20 = vrot.slane %v2361_v45, 2  ;;  %v2394_v21 = vsub.f32 %v4650_v48, %v2361_v45  ;;  %v2420_v48 = vstv %s5920_s12 }
 0x243   :  { %v2398_v22 = vmul.f32 %v2394_v21, %v2394_v21  ;;  %v2387_v23 = vsel %vm2373_vm2, %v2384_v43, %v2385_v20 }
 0x244   :  { %v2388_v24 = vsel %vm2375_vm3, %v2386_v8, %v2387_v23 }
 0x245   :  { %v2404_v25 = vsel %vm2371_vm1, %v2398_v22, 0.0  ;;  %2390 = vst [vmem:[#allocation5] sm:$0xff] %v2388_v24 }
 0x246   :  { %v2362_v60 = vpop.f32.mrf.mxu3  ;;  %v2405_v26 = vadd.f32 %v2404_v25, %v2403_v14  ;;  %2450 = dma.vmem_to_hbm [thread:$0]  %s2446_s7, 128, %s2448_s23, [#allocation6]  }
 0x248   :  { %2406 = vadd.xlane.f32.xlu0 %v2405_v26 }
 0x285   :  { %v2418_v27 = vpop.xlane.xlu0 %2417 }
 0x286   :  { %v2421_v31 = vadd.f32 %v2420_v48, %v2418_v27 }
 0x288   :  { %v2426_v36 = vsel %vm2425_vm5, %v2421_v31, 0.0 }
 0x2bb   :  { %v2407_v33 = vpop.xlane.xlu0 %2406 }
 0x2bc   :  { %v2408_v34 = vmul.f32 0.5, %v2407_v33 }
 0x2be   :  { %v2427_v37 = vsel %vm2424_vm6, %v2408_v34, %v2426_v36 }
 0x2bf   :  { %2428 = vst [vmem:[%s5923_s15] sm:$0x3] %v2427_v37 }
 0x2c0   :  { %3964 = dma.done.wait [#allocation4], 128  }
 0x2c1   :  { %3965 = vsyncadd [#allocation4], 4294967168 }
 0x2c2   :  { %3966 = dma.done.wait [#allocation6], 128  }
 0x2c3   :  { %3967 = vsyncadd [#allocation6], 4294967168 }
 0x2c4   :  { %2463 = vsyncpa [#allocation4], 1 }
 0x2c5   :  { %2464 = vsyncpa [#allocation6], 1 }

</bundles_post_ra>
